<compile_context>
chip_gen: v7x
topology: tpu7x:2x2x1
jax: 0.10.0
libtpu: 0.0.40
codegen_flags: <defaults>
</compile_context>

<pallas_src>
import functools

import jax
import jax.numpy as jnp
from jax.experimental import pallas as pl
from jax.experimental.pallas import tpu as pltpu

_KW = 4          # kernel size of every Conv3d in the module
_PAD = 2         # int(ceil((4 - 1) / 2))
_BN_EPS = 1e-5   # nn.SyncBatchNorm default eps


def _round_up(x, m):
    return (x + m - 1) // m * m


# --------------------------------------------------------------------------
# Pallas kernel: one (TM, TN) tile of  LeakyReLU(scale * (patches @ W) + shift)
# --------------------------------------------------------------------------
def _conv_fused_kernel(p_ref, w_ref, scale_ref, shift_ref, o_ref, acc_ref, *,
                       slope):
    @pl.when(pl.program_id(2) == 0)
    def _():
        acc_ref[...] = jnp.zeros_like(acc_ref)

    acc_ref[...] += jnp.dot(p_ref[...], w_ref[...],
                            preferred_element_type=jnp.float32)

    @pl.when(pl.program_id(2) == pl.num_programs(2) - 1)
    def _():
        y = acc_ref[...] * scale_ref[...] + shift_ref[...]
        y = jnp.where(y >= 0.0, y, slope * y)          # LeakyReLU (slope=1 -> id)
        o_ref[...] = y.astype(o_ref.dtype)


# --------------------------------------------------------------------------
# im2col for 3D conv (layout plumbing only; ordering matches PyTorch weights)
# --------------------------------------------------------------------------
def _im2col3d(x, k, stride, pad):
    """(N,C,D,H,W) -> ((N*Do*Ho*Wo, C*k^3), (Do,Ho,Wo)); K ordered (ci,kd,kh,kw)."""
    n, c, d, h, w = x.shape
    xp = jnp.pad(x, ((0, 0), (0, 0), (pad, pad), (pad, pad), (pad, pad)))
    do = (d + 2 * pad - k) // stride + 1
    ho = (h + 2 * pad - k) // stride + 1
    wo = (w + 2 * pad - k) // stride + 1
    taps = []
    for kd in range(k):
        for kh in range(k):
            for kw in range(k):
                taps.append(jax.lax.slice(
                    xp,
                    (0, 0, kd, kh, kw),
                    (n, c,
                     kd + (do - 1) * stride + 1,
                     kh + (ho - 1) * stride + 1,
                     kw + (wo - 1) * stride + 1),
                    (1, 1, stride, stride, stride)))     # (N,C,Do,Ho,Wo)
    p = jnp.stack(taps, axis=0)                          # (k^3,N,C,Do,Ho,Wo)
    p = p.transpose(1, 3, 4, 5, 2, 0)                    # (N,Do,Ho,Wo,C,k^3)
    return p.reshape(n * do * ho * wo, c * k ** 3), (do, ho, wo)


# --------------------------------------------------------------------------
# One discriminator layer: Conv3d + folded norm + LeakyReLU via Pallas matmul
# --------------------------------------------------------------------------
def conv3d_norm_lrelu(x, w, scale, shift, *, stride, slope,
                      tm=128, tn=128, tk=512):
    """x: (N,Cin,D,H,W); w: (Cout,Cin,4,4,4); scale/shift: (Cout,)."""
    n = x.shape[0]
    cout = w.shape[0]
    patches, (do, ho, wo) = _im2col3d(x, _KW, stride, _PAD)
    m, kdim = patches.shape
    w_mat = w.reshape(cout, kdim).T                      # (K, Cout), same K order

    tm_ = min(tm, _round_up(m, 8))                       # sublane multiple of 8
    tk_ = min(tk, _round_up(kdim, 128))
    m_pad = _round_up(m, tm_)
    k_pad = _round_up(kdim, tk_)
    n_pad = _round_up(cout, tn)                          # lane-dense output

    patches_p = jnp.pad(patches, ((0, m_pad - m), (0, k_pad - kdim)))
    w_p = jnp.pad(w_mat, ((0, k_pad - kdim), (0, n_pad - cout)))
    scale_p = jnp.pad(scale.reshape(1, cout), ((0, 0), (0, n_pad - cout)))
    shift_p = jnp.pad(shift.reshape(1, cout), ((0, 0), (0, n_pad - cout)))

    out = pl.pallas_call(
        functools.partial(_conv_fused_kernel, slope=slope),
        out_shape=jax.ShapeDtypeStruct((m_pad, n_pad), x.dtype),
        grid_spec=pltpu.PrefetchScalarGridSpec(
            num_scalar_prefetch=0,
            grid=(m_pad // tm_, n_pad // tn, k_pad // tk_),
            in_specs=[
                pl.BlockSpec((tm_, tk_), lambda i, j, k: (i, k)),
                pl.BlockSpec((tk_, tn), lambda i, j, k: (k, j)),
                pl.BlockSpec((1, tn), lambda i, j, k: (0, j)),
                pl.BlockSpec((1, tn), lambda i, j, k: (0, j)),
            ],
            out_specs=pl.BlockSpec((tm_, tn), lambda i, j, k: (i, j)),
            scratch_shapes=[pltpu.VMEM((tm_, tn), jnp.float32)],
        ),
        compiler_params=pltpu.CompilerParams(
            dimension_semantics=("parallel", "parallel", "arbitrary")),
    )(patches_p, w_p, scale_p, shift_p)

    out = out[:m, :cout]                                 # drop padding
    return out.reshape(n, do, ho, wo, cout).transpose(0, 4, 1, 2, 3)


# --------------------------------------------------------------------------
# Module: parameter construction, norm folding, forward
# --------------------------------------------------------------------------
def init_discriminator_params(key, input_nc=3, ndf=8, n_layers=3):
    """Layer configs + deterministic parameters mirroring NLayerDiscriminator3D."""
    cfgs = [(input_nc, ndf, 2, False, 0.2)]              # (cin,cout,stride,norm,slope)
    nf = ndf
    for _ in range(1, n_layers):
        nf_prev, nf = nf, min(nf * 2, 512)
        cfgs.append((nf_prev, nf, 2, True, 0.2))
    nf_prev, nf = nf, min(nf * 2, 512)
    cfgs.append((nf_prev, nf, 1, True, 0.2))
    cfgs.append((nf, 1, 1, False, 1.0))                  # final conv, no activation

    params = []
    for (cin, cout, _, has_norm, _) in cfgs:
        key, kw_, kb, kg, kbt, km, kv = jax.random.split(key, 7)
        p = dict(
            w=0.02 * jax.random.normal(kw_, (cout, cin, _KW, _KW, _KW), jnp.float32),
            b=0.01 * jax.random.normal(kb, (cout,), jnp.float32),
        )
        if has_norm:
            p.update(
                gamma=1.0 + 0.1 * jax.random.normal(kg, (cout,), jnp.float32),
                beta=0.1 * jax.random.normal(kbt, (cout,), jnp.float32),
                mean=0.1 * jax.random.normal(km, (cout,), jnp.float32),
                var=jnp.abs(1.0 + 0.1 * jax.random.normal(kv, (cout,), jnp.float32)),
            )
        params.append(p)
    return cfgs, params


def _fold_norm(p, has_norm):
    """Fold conv bias + eval-mode BatchNorm into per-channel (scale, shift)."""
    if has_norm:
        s = p["gamma"] / jnp.sqrt(p["var"] + _BN_EPS)
        return s, s * (p["b"] - p["mean"]) + p["beta"]
    return jnp.ones_like(p["b"]), p["b"]


def make_forward(cfgs):
    strides = tuple(c[2] for c in cfgs)
    has_norms = tuple(c[3] for c in cfgs)
    slopes = tuple(c[4] for c in cfgs)

    @jax.jit
    def forward(x, params):
        feats = []
        h = x
        for i, p in enumerate(params):
            scale, shift = _fold_norm(p, has_norms[i])
            h = conv3d_norm_lrelu(h, p["w"], scale, shift,
                                  stride=strides[i], slope=slopes[i])
            feats.append(h)
        return feats[-1], feats                          # getIntermFeat=True

    return forward


# --------------------------------------------------------------------------
# Pure-JAX reference (mirrors the PyTorch forward) for verification
# --------------------------------------------------------------------------
def reference_forward(x, cfgs, params):
    h = x
    feats = []
    for (_, _, stride, has_norm, slope), p in zip(cfgs, params):
        y = jax.lax.conv_general_dilated(
            h, p["w"], (stride,) * 3, [(_PAD, _PAD)] * 3,
            dimension_numbers=("NCDHW", "OIDHW", "NCDHW"),
            precision=jax.lax.Precision.HIGHEST)
        y = y + p["b"].reshape(1, -1, 1, 1, 1)
        if has_norm:
            rs = lambda a: a.reshape(1, -1, 1, 1, 1)
            y = (y - rs(p["mean"])) / jnp.sqrt(rs(p["var"]) + _BN_EPS)
            y = y * rs(p["gamma"]) + rs(p["beta"])
        y = jnp.where(y >= 0.0, y, slope * y)
        feats.append(y)
        h = y
    return feats[-1], feats


if __name__ == "__main__":
    key = jax.random.PRNGKey(0)
    kx, kp = jax.random.split(key)

    # Small 5D NCDHW input consistent with a video discriminator.
    N, C, D, H, W = 2, 3, 8, 16, 16
    x = jax.random.normal(kx, (N, C, D, H, W), jnp.float32)

    cfgs, params = init_discriminator_params(kp, input_nc=C, ndf=8, n_layers=3)
    forward = make_forward(cfgs)

    out, feats = forward(x, params)
    out = jax.block_until_ready(out)

    ref_out, ref_feats = reference_forward(x, cfgs, params)
    for got, ref in zip(feats, ref_feats):
        assert got.shape == ref.shape, (got.shape, ref.shape)
        rel = jnp.max(jnp.abs(got - ref)) / (jnp.max(jnp.abs(ref)) + 1e-6)
        assert rel < 5e-3, float(rel)
    assert out.shape == ref_out.shape

    print("KERNEL_OK")
</pallas_src>

<mosaic_0001>
module attributes {stable_mosaic.version = 11 : i64} {
  func.func @_conv_fused_kernel(%arg0: i32, %arg1: i32, %arg2: i32, %arg3: memref<128x256xf32, #tpu.memory_space<vmem>>, %arg4: memref<256x128xf32, #tpu.memory_space<vmem>>, %arg5: memref<1x128xf32, #tpu.memory_space<vmem>>, %arg6: memref<1x128xf32, #tpu.memory_space<vmem>>, %arg7: memref<128x128xf32, #tpu.memory_space<vmem>>, %arg8: memref<128x128xf32, #tpu.memory_space<vmem>>) attributes {dimension_semantics = [#tpu.dimension_semantics<parallel>, #tpu.dimension_semantics<parallel>, #tpu.dimension_semantics<arbitrary>], iteration_bounds = array<i64: 7, 1, 1>, scalar_prefetch = 0 : i64, scratch_operands = 1 : i64, tpu.core_type = #tpu.core_type<tc>, window_params = [{transform_indices = @transform_0, window_bounds = array<i64: 128, 256>}, {transform_indices = @transform_1, window_bounds = array<i64: 256, 128>}, {transform_indices = @transform_2, window_bounds = array<i64: 1, 128>}, {transform_indices = @transform_3, window_bounds = array<i64: 1, 128>}, {transform_indices = @transform_4, window_bounds = array<i64: 128, 128>}]} {
    %c0_i32 = arith.constant 0 : i32
    %0 = arith.cmpi eq, %arg2, %c0_i32 : i32
    %1 = arith.extui %0 : i1 to i32
    %c0_i32_0 = arith.constant 0 : i32
    %2 = arith.cmpi ne, %1, %c0_i32_0 : i32
    scf.if %2 {
      %cst_10 = arith.constant 0.000000e+00 : f32
      %12 = vector.broadcast %cst_10 : f32 to vector<128x128xf32>
      %c0_11 = arith.constant 0 : index
      %c0_12 = arith.constant 0 : index
      %13 = vector.load %arg8[%c0_11, %c0_12] : memref<128x128xf32, #tpu.memory_space<vmem>>, vector<128x128xf32>
      tpu.vector_store %arg8[%c0_11, %c0_12], %12 {strides = array<i32>} : memref<128x128xf32, #tpu.memory_space<vmem>>, vector<128x128xf32>,
    } else {
    }
    %c0 = arith.constant 0 : index
    %c0_1 = arith.constant 0 : index
    %3 = vector.load %arg8[%c0, %c0_1] : memref<128x128xf32, #tpu.memory_space<vmem>>, vector<128x128xf32>
    %c0_2 = arith.constant 0 : index
    %c0_3 = arith.constant 0 : index
    %4 = vector.load %arg3[%c0_2, %c0_3] : memref<128x256xf32, #tpu.memory_space<vmem>>, vector<128x256xf32>
    %c0_4 = arith.constant 0 : index
    %c0_5 = arith.constant 0 : index
    %5 = vector.load %arg4[%c0_4, %c0_5] : memref<256x128xf32, #tpu.memory_space<vmem>>, vector<256x128xf32>
    %cst = arith.constant dense<0.000000e+00> : vector<128x128xf32>
    %6 = tpu.matmul %4, %5, %cst {dimension_numbers = #tpu.dot_dimension_numbers<[1], [0], [0], [1], [0, 0, 1, 1], [], []>} : vector<128x256xf32>, vector<256x128xf32>, vector<128x128xf32> -> vector<128x128xf32>
    %7 = arith.addf %3, %6 : vector<128x128xf32>
    %c0_6 = arith.constant 0 : index
    %c0_7 = arith.constant 0 : index
    %8 = vector.load %arg8[%c0_6, %c0_7] : memref<128x128xf32, #tpu.memory_space<vmem>>, vector<128x128xf32>
    tpu.vector_store %arg8[%c0_6, %c0_7], %7 {strides = array<i32>} : memref<128x128xf32, #tpu.memory_space<vmem>>, vector<128x128xf32>,
    %c0_i32_8 = arith.constant 0 : i32
    %9 = arith.cmpi eq, %arg2, %c0_i32_8 : i32
    %10 = arith.extui %9 : i1 to i32
    %c0_i32_9 = arith.constant 0 : i32
    %11 = arith.cmpi ne, %10, %c0_i32_9 : i32
    scf.if %11 {
      %c0_10 = arith.constant 0 : index
      %c0_11 = arith.constant 0 : index
      %12 = vector.load %arg8[%c0_10, %c0_11] : memref<128x128xf32, #tpu.memory_space<vmem>>, vector<128x128xf32>
      %c0_12 = arith.constant 0 : index
      %c0_13 = arith.constant 0 : index
      %13 = vector.load %arg5[%c0_12, %c0_13] : memref<1x128xf32, #tpu.memory_space<vmem>>, vector<1x128xf32>
      %14 = vector.broadcast %13 : vector<1x128xf32> to vector<128x128xf32>
      %15 = arith.mulf %12, %14 : vector<128x128xf32>
      %c0_14 = arith.constant 0 : index
      %c0_15 = arith.constant 0 : index
      %16 = vector.load %arg6[%c0_14, %c0_15] : memref<1x128xf32, #tpu.memory_space<vmem>>, vector<1x128xf32>
      %17 = vector.broadcast %16 : vector<1x128xf32> to vector<128x128xf32>
      %18 = arith.addf %15, %17 : vector<128x128xf32>
      %cst_16 = arith.constant 0.000000e+00 : f32
      %19 = vector.broadcast %cst_16 : f32 to vector<128x128xf32>
      %20 = arith.cmpf oge, %18, %19 : vector<128x128xf32>
      %cst_17 = arith.constant 2.000000e-01 : f32
      %21 = vector.broadcast %cst_17 : f32 to vector<128x128xf32>
      %22 = arith.mulf %21, %18 : vector<128x128xf32>
      %23 = arith.select %20, %18, %22 : vector<128x128xi1>, vector<128x128xf32>
      %c0_18 = arith.constant 0 : index
      %c0_19 = arith.constant 0 : index
      %24 = vector.load %arg7[%c0_18, %c0_19] : memref<128x128xf32, #tpu.memory_space<vmem>>, vector<128x128xf32>
      tpu.vector_store %arg7[%c0_18, %c0_19], %23 {strides = array<i32>} : memref<128x128xf32, #tpu.memory_space<vmem>>, vector<128x128xf32>,
    } else {
    }
    return
  }
  func.func @transform_0(%arg0: i32, %arg1: i32, %arg2: i32) -> (i32, i32) {
    %c0_i32 = arith.constant 0 : i32
    return %arg0, %arg2 : i32, i32
  }
  func.func @transform_1(%arg0: i32, %arg1: i32, %arg2: i32) -> (i32, i32) {
    %c0_i32 = arith.constant 0 : i32
    return %arg2, %arg1 : i32, i32
  }
  func.func @transform_2(%arg0: i32, %arg1: i32, %arg2: i32) -> (i32, i32) {
    %c0_i32 = arith.constant 0 : i32
    %c0_i32_0 = arith.constant 0 : i32
    return %c0_i32, %arg1 : i32, i32
  }
  func.func @transform_3(%arg0: i32, %arg1: i32, %arg2: i32) -> (i32, i32) {
    %c0_i32 = arith.constant 0 : i32
    %c0_i32_0 = arith.constant 0 : i32
    return %c0_i32, %arg1 : i32, i32
  }
  func.func @transform_4(%arg0: i32, %arg1: i32, %arg2: i32) -> (i32, i32) {
    %c0_i32 = arith.constant 0 : i32
    return %arg0, %arg1 : i32, i32
  }
}

module attributes {stable_mosaic.version = 11 : i64} {
  func.func @_conv_fused_kernel(%arg0: i32, %arg1: i32, %arg2: i32, %arg3: memref<128x512xf32, #tpu.memory_space<vmem>>, %arg4: memref<512x128xf32, #tpu.memory_space<vmem>>, %arg5: memref<1x128xf32, #tpu.memory_space<vmem>>, %arg6: memref<1x128xf32, #tpu.memory_space<vmem>>, %arg7: memref<128x128xf32, #tpu.memory_space<vmem>>, %arg8: memref<128x128xf32, #tpu.memory_space<vmem>>) attributes {dimension_semantics = [#tpu.dimension_semantics<parallel>, #tpu.dimension_semantics<parallel>, #tpu.dimension_semantics<arbitrary>], iteration_bounds = array<i64: 2, 1, 1>, scalar_prefetch = 0 : i64, scratch_operands = 1 : i64, tpu.core_type = #tpu.core_type<tc>, window_params = [{transform_indices = @transform_0, window_bounds = array<i64: 128, 512>}, {transform_indices = @transform_1, window_bounds = array<i64: 512, 128>}, {transform_indices = @transform_2, window_bounds = array<i64: 1, 128>}, {transform_indices = @transform_3, window_bounds = array<i64: 1, 128>}, {transform_indices = @transform_4, window_bounds = array<i64: 128, 128>}]} {
    %c0_i32 = arith.constant 0 : i32
    %0 = arith.cmpi eq, %arg2, %c0_i32 : i32
    %1 = arith.extui %0 : i1 to i32
    %c0_i32_0 = arith.constant 0 : i32
    %2 = arith.cmpi ne, %1, %c0_i32_0 : i32
    scf.if %2 {
      %cst_10 = arith.constant 0.000000e+00 : f32
      %12 = vector.broadcast %cst_10 : f32 to vector<128x128xf32>
      %c0_11 = arith.constant 0 : index
      %c0_12 = arith.constant 0 : index
      %13 = vector.load %arg8[%c0_11, %c0_12] : memref<128x128xf32, #tpu.memory_space<vmem>>, vector<128x128xf32>
      tpu.vector_store %arg8[%c0_11, %c0_12], %12 {strides = array<i32>} : memref<128x128xf32, #tpu.memory_space<vmem>>, vector<128x128xf32>,
    } else {
    }
    %c0 = arith.constant 0 : index
    %c0_1 = arith.constant 0 : index
    %3 = vector.load %arg8[%c0, %c0_1] : memref<128x128xf32, #tpu.memory_space<vmem>>, vector<128x128xf32>
    %c0_2 = arith.constant 0 : index
    %c0_3 = arith.constant 0 : index
    %4 = vector.load %arg3[%c0_2, %c0_3] : memref<128x512xf32, #tpu.memory_space<vmem>>, vector<128x512xf32>
    %c0_4 = arith.constant 0 : index
    %c0_5 = arith.constant 0 : index
    %5 = vector.load %arg4[%c0_4, %c0_5] : memref<512x128xf32, #tpu.memory_space<vmem>>, vector<512x128xf32>
    %cst = arith.constant dense<0.000000e+00> : vector<128x128xf32>
    %6 = tpu.matmul %4, %5, %cst {dimension_numbers = #tpu.dot_dimension_numbers<[1], [0], [0], [1], [0, 0, 1, 1], [], []>} : vector<128x512xf32>, vector<512x128xf32>, vector<128x128xf32> -> vector<128x128xf32>
    %7 = arith.addf %3, %6 : vector<128x128xf32>
    %c0_6 = arith.constant 0 : index
    %c0_7 = arith.constant 0 : index
    %8 = vector.load %arg8[%c0_6, %c0_7] : memref<128x128xf32, #tpu.memory_space<vmem>>, vector<128x128xf32>
    tpu.vector_store %arg8[%c0_6, %c0_7], %7 {strides = array<i32>} : memref<128x128xf32, #tpu.memory_space<vmem>>, vector<128x128xf32>,
    %c0_i32_8 = arith.constant 0 : i32
    %9 = arith.cmpi eq, %arg2, %c0_i32_8 : i32
    %10 = arith.extui %9 : i1 to i32
    %c0_i32_9 = arith.constant 0 : i32
    %11 = arith.cmpi ne, %10, %c0_i32_9 : i32
    scf.if %11 {
      %c0_10 = arith.constant 0 : index
      %c0_11 = arith.constant 0 : index
      %12 = vector.load %arg8[%c0_10, %c0_11] : memref<128x128xf32, #tpu.memory_space<vmem>>, vector<128x128xf32>
      %c0_12 = arith.constant 0 : index
      %c0_13 = arith.constant 0 : index
      %13 = vector.load %arg5[%c0_12, %c0_13] : memref<1x128xf32, #tpu.memory_space<vmem>>, vector<1x128xf32>
      %14 = vector.broadcast %13 : vector<1x128xf32> to vector<128x128xf32>
      %15 = arith.mulf %12, %14 : vector<128x128xf32>
      %c0_14 = arith.constant 0 : index
      %c0_15 = arith.constant 0 : index
      %16 = vector.load %arg6[%c0_14, %c0_15] : memref<1x128xf32, #tpu.memory_space<vmem>>, vector<1x128xf32>
      %17 = vector.broadcast %16 : vector<1x128xf32> to vector<128x128xf32>
      %18 = arith.addf %15, %17 : vector<128x128xf32>
      %cst_16 = arith.constant 0.000000e+00 : f32
      %19 = vector.broadcast %cst_16 : f32 to vector<128x128xf32>
      %20 = arith.cmpf oge, %18, %19 : vector<128x128xf32>
      %cst_17 = arith.constant 2.000000e-01 : f32
      %21 = vector.broadcast %cst_17 : f32 to vector<128x128xf32>
      %22 = arith.mulf %21, %18 : vector<128x128xf32>
      %23 = arith.select %20, %18, %22 : vector<128x128xi1>, vector<128x128xf32>
      %c0_18 = arith.constant 0 : index
      %c0_19 = arith.constant 0 : index
      %24 = vector.load %arg7[%c0_18, %c0_19] : memref<128x128xf32, #tpu.memory_space<vmem>>, vector<128x128xf32>
      tpu.vector_store %arg7[%c0_18, %c0_19], %23 {strides = array<i32>} : memref<128x128xf32, #tpu.memory_space<vmem>>, vector<128x128xf32>,
    } else {
    }
    return
  }
  func.func @transform_0(%arg0: i32, %arg1: i32, %arg2: i32) -> (i32, i32) {
    %c0_i32 = arith.constant 0 : i32
    return %arg0, %arg2 : i32, i32
  }
  func.func @transform_1(%arg0: i32, %arg1: i32, %arg2: i32) -> (i32, i32) {
    %c0_i32 = arith.constant 0 : i32
    return %arg2, %arg1 : i32, i32
  }
  func.func @transform_2(%arg0: i32, %arg1: i32, %arg2: i32) -> (i32, i32) {
    %c0_i32 = arith.constant 0 : i32
    %c0_i32_0 = arith.constant 0 : i32
    return %c0_i32, %arg1 : i32, i32
  }
  func.func @transform_3(%arg0: i32, %arg1: i32, %arg2: i32) -> (i32, i32) {
    %c0_i32 = arith.constant 0 : i32
    %c0_i32_0 = arith.constant 0 : i32
    return %c0_i32, %arg1 : i32, i32
  }
  func.func @transform_4(%arg0: i32, %arg1: i32, %arg2: i32) -> (i32, i32) {
    %c0_i32 = arith.constant 0 : i32
    return %arg0, %arg1 : i32, i32
  }
}

module attributes {stable_mosaic.version = 11 : i64} {
  func.func @_conv_fused_kernel(%arg0: i32, %arg1: i32, %arg2: i32, %arg3: memref<40x512xf32, #tpu.memory_space<vmem>>, %arg4: memref<512x128xf32, #tpu.memory_space<vmem>>, %arg5: memref<1x128xf32, #tpu.memory_space<vmem>>, %arg6: memref<1x128xf32, #tpu.memory_space<vmem>>, %arg7: memref<40x128xf32, #tpu.memory_space<vmem>>, %arg8: memref<40x128xf32, #tpu.memory_space<vmem>>) attributes {dimension_semantics = [#tpu.dimension_semantics<parallel>, #tpu.dimension_semantics<parallel>, #tpu.dimension_semantics<arbitrary>], iteration_bounds = array<i64: 1, 1, 2>, scalar_prefetch = 0 : i64, scratch_operands = 1 : i64, tpu.core_type = #tpu.core_type<tc>, window_params = [{transform_indices = @transform_0, window_bounds = array<i64: 40, 512>}, {transform_indices = @transform_1, window_bounds = array<i64: 512, 128>}, {transform_indices = @transform_2, window_bounds = array<i64: 1, 128>}, {transform_indices = @transform_3, window_bounds = array<i64: 1, 128>}, {transform_indices = @transform_4, window_bounds = array<i64: 40, 128>}]} {
    %c0_i32 = arith.constant 0 : i32
    %0 = arith.cmpi eq, %arg2, %c0_i32 : i32
    %1 = arith.extui %0 : i1 to i32
    %c0_i32_0 = arith.constant 0 : i32
    %2 = arith.cmpi ne, %1, %c0_i32_0 : i32
    scf.if %2 {
      %cst_9 = arith.constant 0.000000e+00 : f32
      %12 = vector.broadcast %cst_9 : f32 to vector<40x128xf32>
      %c0_10 = arith.constant 0 : index
      %c0_11 = arith.constant 0 : index
      %13 = vector.load %arg8[%c0_10, %c0_11] : memref<40x128xf32, #tpu.memory_space<vmem>>, vector<40x128xf32>
      tpu.vector_store %arg8[%c0_10, %c0_11], %12 {strides = array<i32>} : memref<40x128xf32, #tpu.memory_space<vmem>>, vector<40x128xf32>,
    } else {
    }
    %c0 = arith.constant 0 : index
    %c0_1 = arith.constant 0 : index
    %3 = vector.load %arg8[%c0, %c0_1] : memref<40x128xf32, #tpu.memory_space<vmem>>, vector<40x128xf32>
    %c0_2 = arith.constant 0 : index
    %c0_3 = arith.constant 0 : index
    %4 = vector.load %arg3[%c0_2, %c0_3] : memref<40x512xf32, #tpu.memory_space<vmem>>, vector<40x512xf32>
    %c0_4 = arith.constant 0 : index
    %c0_5 = arith.constant 0 : index
    %5 = vector.load %arg4[%c0_4, %c0_5] : memref<512x128xf32, #tpu.memory_space<vmem>>, vector<512x128xf32>
    %cst = arith.constant dense<0.000000e+00> : vector<40x128xf32>
    %6 = tpu.matmul %4, %5, %cst {dimension_numbers = #tpu.dot_dimension_numbers<[1], [0], [0], [1], [0, 0, 1, 1], [], []>} : vector<40x512xf32>, vector<512x128xf32>, vector<40x128xf32> -> vector<40x128xf32>
    %7 = arith.addf %3, %6 : vector<40x128xf32>
    %c0_6 = arith.constant 0 : index
    %c0_7 = arith.constant 0 : index
    %8 = vector.load %arg8[%c0_6, %c0_7] : memref<40x128xf32, #tpu.memory_space<vmem>>, vector<40x128xf32>
    tpu.vector_store %arg8[%c0_6, %c0_7], %7 {strides = array<i32>} : memref<40x128xf32, #tpu.memory_space<vmem>>, vector<40x128xf32>,
    %c1_i32 = arith.constant 1 : i32
    %9 = arith.cmpi eq, %arg2, %c1_i32 : i32
    %10 = arith.extui %9 : i1 to i32
    %c0_i32_8 = arith.constant 0 : i32
    %11 = arith.cmpi ne, %10, %c0_i32_8 : i32
    scf.if %11 {
      %c0_9 = arith.constant 0 : index
      %c0_10 = arith.constant 0 : index
      %12 = vector.load %arg8[%c0_9, %c0_10] : memref<40x128xf32, #tpu.memory_space<vmem>>, vector<40x128xf32>
      %c0_11 = arith.constant 0 : index
      %c0_12 = arith.constant 0 : index
      %13 = vector.load %arg5[%c0_11, %c0_12] : memref<1x128xf32, #tpu.memory_space<vmem>>, vector<1x128xf32>
      %14 = vector.broadcast %13 : vector<1x128xf32> to vector<40x128xf32>
      %15 = arith.mulf %12, %14 : vector<40x128xf32>
      %c0_13 = arith.constant 0 : index
      %c0_14 = arith.constant 0 : index
      %16 = vector.load %arg6[%c0_13, %c0_14] : memref<1x128xf32, #tpu.memory_space<vmem>>, vector<1x128xf32>
      %17 = vector.broadcast %16 : vector<1x128xf32> to vector<40x128xf32>
      %18 = arith.addf %15, %17 : vector<40x128xf32>
      %cst_15 = arith.constant 0.000000e+00 : f32
      %19 = vector.broadcast %cst_15 : f32 to vector<40x128xf32>
      %20 = arith.cmpf oge, %18, %19 : vector<40x128xf32>
      %cst_16 = arith.constant 2.000000e-01 : f32
      %21 = vector.broadcast %cst_16 : f32 to vector<40x128xf32>
      %22 = arith.mulf %21, %18 : vector<40x128xf32>
      %23 = arith.select %20, %18, %22 : vector<40x128xi1>, vector<40x128xf32>
      %c0_17 = arith.constant 0 : index
      %c0_18 = arith.constant 0 : index
      %24 = vector.load %arg7[%c0_17, %c0_18] : memref<40x128xf32, #tpu.memory_space<vmem>>, vector<40x128xf32>
      tpu.vector_store %arg7[%c0_17, %c0_18], %23 {strides = array<i32>} : memref<40x128xf32, #tpu.memory_space<vmem>>, vector<40x128xf32>,
    } else {
    }
    return
  }
  func.func @transform_0(%arg0: i32, %arg1: i32, %arg2: i32) -> (i32, i32) {
    %c0_i32 = arith.constant 0 : i32
    return %arg0, %arg2 : i32, i32
  }
  func.func @transform_1(%arg0: i32, %arg1: i32, %arg2: i32) -> (i32, i32) {
    %c0_i32 = arith.constant 0 : i32
    return %arg2, %arg1 : i32, i32
  }
  func.func @transform_2(%arg0: i32, %arg1: i32, %arg2: i32) -> (i32, i32) {
    %c0_i32 = arith.constant 0 : i32
    %c0_i32_0 = arith.constant 0 : i32
    return %c0_i32, %arg1 : i32, i32
  }
  func.func @transform_3(%arg0: i32, %arg1: i32, %arg2: i32) -> (i32, i32) {
    %c0_i32 = arith.constant 0 : i32
    %c0_i32_0 = arith.constant 0 : i32
    return %c0_i32, %arg1 : i32, i32
  }
  func.func @transform_4(%arg0: i32, %arg1: i32, %arg2: i32) -> (i32, i32) {
    %c0_i32 = arith.constant 0 : i32
    return %arg0, %arg1 : i32, i32
  }
}

module attributes {stable_mosaic.version = 11 : i64} {
  func.func @_conv_fused_kernel(%arg0: i32, %arg1: i32, %arg2: i32, %arg3: memref<96x512xf32, #tpu.memory_space<vmem>>, %arg4: memref<512x128xf32, #tpu.memory_space<vmem>>, %arg5: memref<1x128xf32, #tpu.memory_space<vmem>>, %arg6: memref<1x128xf32, #tpu.memory_space<vmem>>, %arg7: memref<96x128xf32, #tpu.memory_space<vmem>>, %arg8: memref<96x128xf32, #tpu.memory_space<vmem>>) attributes {dimension_semantics = [#tpu.dimension_semantics<parallel>, #tpu.dimension_semantics<parallel>, #tpu.dimension_semantics<arbitrary>], iteration_bounds = array<i64: 1, 1, 4>, scalar_prefetch = 0 : i64, scratch_operands = 1 : i64, tpu.core_type = #tpu.core_type<tc>, window_params = [{transform_indices = @transform_0, window_bounds = array<i64: 96, 512>}, {transform_indices = @transform_1, window_bounds = array<i64: 512, 128>}, {transform_indices = @transform_2, window_bounds = array<i64: 1, 128>}, {transform_indices = @transform_3, window_bounds = array<i64: 1, 128>}, {transform_indices = @transform_4, window_bounds = array<i64: 96, 128>}]} {
    %c0_i32 = arith.constant 0 : i32
    %0 = arith.cmpi eq, %arg2, %c0_i32 : i32
    %1 = arith.extui %0 : i1 to i32
    %c0_i32_0 = arith.constant 0 : i32
    %2 = arith.cmpi ne, %1, %c0_i32_0 : i32
    scf.if %2 {
      %cst_9 = arith.constant 0.000000e+00 : f32
      %12 = vector.broadcast %cst_9 : f32 to vector<96x128xf32>
      %c0_10 = arith.constant 0 : index
      %c0_11 = arith.constant 0 : index
      %13 = vector.load %arg8[%c0_10, %c0_11] : memref<96x128xf32, #tpu.memory_space<vmem>>, vector<96x128xf32>
      tpu.vector_store %arg8[%c0_10, %c0_11], %12 {strides = array<i32>} : memref<96x128xf32, #tpu.memory_space<vmem>>, vector<96x128xf32>,
    } else {
    }
    %c0 = arith.constant 0 : index
    %c0_1 = arith.constant 0 : index
    %3 = vector.load %arg8[%c0, %c0_1] : memref<96x128xf32, #tpu.memory_space<vmem>>, vector<96x128xf32>
    %c0_2 = arith.constant 0 : index
    %c0_3 = arith.constant 0 : index
    %4 = vector.load %arg3[%c0_2, %c0_3] : memref<96x512xf32, #tpu.memory_space<vmem>>, vector<96x512xf32>
    %c0_4 = arith.constant 0 : index
    %c0_5 = arith.constant 0 : index
    %5 = vector.load %arg4[%c0_4, %c0_5] : memref<512x128xf32, #tpu.memory_space<vmem>>, vector<512x128xf32>
    %cst = arith.constant dense<0.000000e+00> : vector<96x128xf32>
    %6 = tpu.matmul %4, %5, %cst {dimension_numbers = #tpu.dot_dimension_numbers<[1], [0], [0], [1], [0, 0, 1, 1], [], []>} : vector<96x512xf32>, vector<512x128xf32>, vector<96x128xf32> -> vector<96x128xf32>
    %7 = arith.addf %3, %6 : vector<96x128xf32>
    %c0_6 = arith.constant 0 : index
    %c0_7 = arith.constant 0 : index
    %8 = vector.load %arg8[%c0_6, %c0_7] : memref<96x128xf32, #tpu.memory_space<vmem>>, vector<96x128xf32>
    tpu.vector_store %arg8[%c0_6, %c0_7], %7 {strides = array<i32>} : memref<96x128xf32, #tpu.memory_space<vmem>>, vector<96x128xf32>,
    %c3_i32 = arith.constant 3 : i32
    %9 = arith.cmpi eq, %arg2, %c3_i32 : i32
    %10 = arith.extui %9 : i1 to i32
    %c0_i32_8 = arith.constant 0 : i32
    %11 = arith.cmpi ne, %10, %c0_i32_8 : i32
    scf.if %11 {
      %c0_9 = arith.constant 0 : index
      %c0_10 = arith.constant 0 : index
      %12 = vector.load %arg8[%c0_9, %c0_10] : memref<96x128xf32, #tpu.memory_space<vmem>>, vector<96x128xf32>
      %c0_11 = arith.constant 0 : index
      %c0_12 = arith.constant 0 : index
      %13 = vector.load %arg5[%c0_11, %c0_12] : memref<1x128xf32, #tpu.memory_space<vmem>>, vector<1x128xf32>
      %14 = vector.broadcast %13 : vector<1x128xf32> to vector<96x128xf32>
      %15 = arith.mulf %12, %14 : vector<96x128xf32>
      %c0_13 = arith.constant 0 : index
      %c0_14 = arith.constant 0 : index
      %16 = vector.load %arg6[%c0_13, %c0_14] : memref<1x128xf32, #tpu.memory_space<vmem>>, vector<1x128xf32>
      %17 = vector.broadcast %16 : vector<1x128xf32> to vector<96x128xf32>
      %18 = arith.addf %15, %17 : vector<96x128xf32>
      %cst_15 = arith.constant 0.000000e+00 : f32
      %19 = vector.broadcast %cst_15 : f32 to vector<96x128xf32>
      %20 = arith.cmpf oge, %18, %19 : vector<96x128xf32>
      %cst_16 = arith.constant 2.000000e-01 : f32
      %21 = vector.broadcast %cst_16 : f32 to vector<96x128xf32>
      %22 = arith.mulf %21, %18 : vector<96x128xf32>
      %23 = arith.select %20, %18, %22 : vector<96x128xi1>, vector<96x128xf32>
      %c0_17 = arith.constant 0 : index
      %c0_18 = arith.constant 0 : index
      %24 = vector.load %arg7[%c0_17, %c0_18] : memref<96x128xf32, #tpu.memory_space<vmem>>, vector<96x128xf32>
      tpu.vector_store %arg7[%c0_17, %c0_18], %23 {strides = array<i32>} : memref<96x128xf32, #tpu.memory_space<vmem>>, vector<96x128xf32>,
    } else {
    }
    return
  }
  func.func @transform_0(%arg0: i32, %arg1: i32, %arg2: i32) -> (i32, i32) {
    %c0_i32 = arith.constant 0 : i32
    return %arg0, %arg2 : i32, i32
  }
  func.func @transform_1(%arg0: i32, %arg1: i32, %arg2: i32) -> (i32, i32) {
    %c0_i32 = arith.constant 0 : i32
    return %arg2, %arg1 : i32, i32
  }
  func.func @transform_2(%arg0: i32, %arg1: i32, %arg2: i32) -> (i32, i32) {
    %c0_i32 = arith.constant 0 : i32
    %c0_i32_0 = arith.constant 0 : i32
    return %c0_i32, %arg1 : i32, i32
  }
  func.func @transform_3(%arg0: i32, %arg1: i32, %arg2: i32) -> (i32, i32) {
    %c0_i32 = arith.constant 0 : i32
    %c0_i32_0 = arith.constant 0 : i32
    return %c0_i32, %arg1 : i32, i32
  }
  func.func @transform_4(%arg0: i32, %arg1: i32, %arg2: i32) -> (i32, i32) {
    %c0_i32 = arith.constant 0 : i32
    return %arg0, %arg1 : i32, i32
  }
}

module attributes {stable_mosaic.version = 11 : i64} {
  func.func @_conv_fused_kernel(%arg0: i32, %arg1: i32, %arg2: i32, %arg3: memref<128x512xf32, #tpu.memory_space<vmem>>, %arg4: memref<512x128xf32, #tpu.memory_space<vmem>>, %arg5: memref<1x128xf32, #tpu.memory_space<vmem>>, %arg6: memref<1x128xf32, #tpu.memory_space<vmem>>, %arg7: memref<128x128xf32, #tpu.memory_space<vmem>>, %arg8: memref<128x128xf32, #tpu.memory_space<vmem>>) attributes {dimension_semantics = [#tpu.dimension_semantics<parallel>, #tpu.dimension_semantics<parallel>, #tpu.dimension_semantics<arbitrary>], iteration_bounds = array<i64: 2, 1, 8>, scalar_prefetch = 0 : i64, scratch_operands = 1 : i64, tpu.core_type = #tpu.core_type<tc>, window_params = [{transform_indices = @transform_0, window_bounds = array<i64: 128, 512>}, {transform_indices = @transform_1, window_bounds = array<i64: 512, 128>}, {transform_indices = @transform_2, window_bounds = array<i64: 1, 128>}, {transform_indices = @transform_3, window_bounds = array<i64: 1, 128>}, {transform_indices = @transform_4, window_bounds = array<i64: 128, 128>}]} {
    %c0_i32 = arith.constant 0 : i32
    %0 = arith.cmpi eq, %arg2, %c0_i32 : i32
    %1 = arith.extui %0 : i1 to i32
    %c0_i32_0 = arith.constant 0 : i32
    %2 = arith.cmpi ne, %1, %c0_i32_0 : i32
    scf.if %2 {
      %cst_9 = arith.constant 0.000000e+00 : f32
      %12 = vector.broadcast %cst_9 : f32 to vector<128x128xf32>
      %c0_10 = arith.constant 0 : index
      %c0_11 = arith.constant 0 : index
      %13 = vector.load %arg8[%c0_10, %c0_11] : memref<128x128xf32, #tpu.memory_space<vmem>>, vector<128x128xf32>
      tpu.vector_store %arg8[%c0_10, %c0_11], %12 {strides = array<i32>} : memref<128x128xf32, #tpu.memory_space<vmem>>, vector<128x128xf32>,
    } else {
    }
    %c0 = arith.constant 0 : index
    %c0_1 = arith.constant 0 : index
    %3 = vector.load %arg8[%c0, %c0_1] : memref<128x128xf32, #tpu.memory_space<vmem>>, vector<128x128xf32>
    %c0_2 = arith.constant 0 : index
    %c0_3 = arith.constant 0 : index
    %4 = vector.load %arg3[%c0_2, %c0_3] : memref<128x512xf32, #tpu.memory_space<vmem>>, vector<128x512xf32>
    %c0_4 = arith.constant 0 : index
    %c0_5 = arith.constant 0 : index
    %5 = vector.load %arg4[%c0_4, %c0_5] : memref<512x128xf32, #tpu.memory_space<vmem>>, vector<512x128xf32>
    %cst = arith.constant dense<0.000000e+00> : vector<128x128xf32>
    %6 = tpu.matmul %4, %5, %cst {dimension_numbers = #tpu.dot_dimension_numbers<[1], [0], [0], [1], [0, 0, 1, 1], [], []>} : vector<128x512xf32>, vector<512x128xf32>, vector<128x128xf32> -> vector<128x128xf32>
    %7 = arith.addf %3, %6 : vector<128x128xf32>
    %c0_6 = arith.constant 0 : index
    %c0_7 = arith.constant 0 : index
    %8 = vector.load %arg8[%c0_6, %c0_7] : memref<128x128xf32, #tpu.memory_space<vmem>>, vector<128x128xf32>
    tpu.vector_store %arg8[%c0_6, %c0_7], %7 {strides = array<i32>} : memref<128x128xf32, #tpu.memory_space<vmem>>, vector<128x128xf32>,
    %c7_i32 = arith.constant 7 : i32
    %9 = arith.cmpi eq, %arg2, %c7_i32 : i32
    %10 = arith.extui %9 : i1 to i32
    %c0_i32_8 = arith.constant 0 : i32
    %11 = arith.cmpi ne, %10, %c0_i32_8 : i32
    scf.if %11 {
      %c0_9 = arith.constant 0 : index
      %c0_10 = arith.constant 0 : index
      %12 = vector.load %arg8[%c0_9, %c0_10] : memref<128x128xf32, #tpu.memory_space<vmem>>, vector<128x128xf32>
      %c0_11 = arith.constant 0 : index
      %c0_12 = arith.constant 0 : index
      %13 = vector.load %arg5[%c0_11, %c0_12] : memref<1x128xf32, #tpu.memory_space<vmem>>, vector<1x128xf32>
      %14 = vector.broadcast %13 : vector<1x128xf32> to vector<128x128xf32>
      %15 = arith.mulf %12, %14 : vector<128x128xf32>
      %c0_13 = arith.constant 0 : index
      %c0_14 = arith.constant 0 : index
      %16 = vector.load %arg6[%c0_13, %c0_14] : memref<1x128xf32, #tpu.memory_space<vmem>>, vector<1x128xf32>
      %17 = vector.broadcast %16 : vector<1x128xf32> to vector<128x128xf32>
      %18 = arith.addf %15, %17 : vector<128x128xf32>
      %cst_15 = arith.constant 0.000000e+00 : f32
      %19 = vector.broadcast %cst_15 : f32 to vector<128x128xf32>
      %20 = arith.cmpf oge, %18, %19 : vector<128x128xf32>
      %cst_16 = arith.constant 1.000000e+00 : f32
      %21 = vector.broadcast %cst_16 : f32 to vector<128x128xf32>
      %22 = arith.mulf %21, %18 : vector<128x128xf32>
      %23 = arith.select %20, %18, %22 : vector<128x128xi1>, vector<128x128xf32>
      %c0_17 = arith.constant 0 : index
      %c0_18 = arith.constant 0 : index
      %24 = vector.load %arg7[%c0_17, %c0_18] : memref<128x128xf32, #tpu.memory_space<vmem>>, vector<128x128xf32>
      tpu.vector_store %arg7[%c0_17, %c0_18], %23 {strides = array<i32>} : memref<128x128xf32, #tpu.memory_space<vmem>>, vector<128x128xf32>,
    } else {
    }
    return
  }
  func.func @transform_0(%arg0: i32, %arg1: i32, %arg2: i32) -> (i32, i32) {
    %c0_i32 = arith.constant 0 : i32
    return %arg0, %arg2 : i32, i32
  }
  func.func @transform_1(%arg0: i32, %arg1: i32, %arg2: i32) -> (i32, i32) {
    %c0_i32 = arith.constant 0 : i32
    return %arg2, %arg1 : i32, i32
  }
  func.func @transform_2(%arg0: i32, %arg1: i32, %arg2: i32) -> (i32, i32) {
    %c0_i32 = arith.constant 0 : i32
    %c0_i32_0 = arith.constant 0 : i32
    return %c0_i32, %arg1 : i32, i32
  }
  func.func @transform_3(%arg0: i32, %arg1: i32, %arg2: i32) -> (i32, i32) {
    %c0_i32 = arith.constant 0 : i32
    %c0_i32_0 = arith.constant 0 : i32
    return %c0_i32, %arg1 : i32, i32
  }
  func.func @transform_4(%arg0: i32, %arg1: i32, %arg2: i32) -> (i32, i32) {
    %c0_i32 = arith.constant 0 : i32
    return %arg0, %arg1 : i32, i32
  }
}

</mosaic_0001>

<bundles_post_ra>
// kernel: forward.5
= control target key start
LH: loop header
LB: loop body
LE: loop exit
PB: predicated region body
PF: predicated region fallthrough
CT: control target
= control target key end

     0   :  { %s1059_s15 = smov 0   ;;  %s1061_s16 = smov 0   ;;  %s1286_s0 = inlined_call_operand.vmem [shape: f32[896,256], index: 0, kind: input, shape index: {}]   ;;  %s1287_s1 = inlined_call_operand.vmem [shape: f32[256,128], index: 1, kind: input, shape index: {}]   ;;  %s1288_s2 = inlined_call_operand.vmem [shape: f32[1,128], index: 2, kind: input, shape index: {}]   ;;  %s1289_s3 = inlined_call_operand.vmem [shape: f32[1,128], index: 3, kind: input, shape index: {}]   ;;  %s1290_s4 = inlined_call_operand.vmem [shape: f32[896,128], index: 4, kind: output, shape index: {}]  }
   0x1   :  { %s1063_s17 = smov 0  }
   0x2 LB: > { %s33_s18 = sadd.s32 1, %s1028_s16  ;;  %p847_p0 = scmp.ge.s32.totalorder %s1032_s17, 1  ;;  %s1032_s17 = sphi %s1063_s17, %s14_s17   ;;  %s1028_s16 = sphi %s1061_s16, %s1292_s16   ;;  %s1024_s15 = sphi %s1059_s15, %s1291_s15  }
   0x3   : > { %p35_p1 = scmp.ge.s32.totalorder %s33_s18, 7  ;;  %p224_p2 = scmp.lt.s32.totalorder %s1032_s17, 8 }
   0x5   : > { %s1294_s18 = smov (%p35_p1, %s33_s18), 0  ;;  %p225_p3 = pnand %p847_p0, %p224_p2 }
   0x6   : > { %v392_v0 = vld [vmem:[%s1287_s1 + $0x80] sm:$0xff] (!%p225_p3)  ;;  %v393_v1 = vld [vmem:[%s1287_s1 + $0x88] sm:$0xff] (!%p225_p3)  ;;  %s848_s25 = sshll.u32 (!%p225_p3), %s1024_s15, 4  ;;  %v394_v5 = vld [vmem:[%s1287_s1 + $0x90] sm:$0xff] (!%p225_p3) }
   0x7   : > { %228 = sbr.rel (%p225_p3) target bundleno = 293 (0x125), region = 36  ;;  %v376_v2 = vld [vmem:[%s1287_s1] sm:$0xff] (!%p225_p3)  ;;  %v938_v3 = vpack.c.bf16 (!%p225_p3), %v393_v1, %v392_v0  ;;  %v377_v4 = vld [vmem:[%s1287_s1 + $0x8] sm:$0xff] (!%p225_p3)  ;;  %v395_v6 = vld [vmem:[%s1287_s1 + $0x98] sm:$0xff] (!%p225_p3)  ;;  %p274_p4 = scmp.lt.s32.totalorder (!%p225_p3), %s848_s25, 111 }
   0x8   : > { %v940_v7 = vpack.c.bf16 (!%p225_p3), %v377_v4, %v376_v2  ;;  %v942_v8 = vpack.c.bf16 (!%p225_p3), %v395_v6, %v394_v5  ;;  %v378_v9 = vld [vmem:[%s1287_s1 + $0x10] sm:$0xff] (!%p225_p3)  ;;  %v379_v10 = vld [vmem:[%s1287_s1 + $0x18] sm:$0xff] (!%p225_p3)  ;;  %v396_v11 = vld [vmem:[%s1287_s1 + $0xa0] sm:$0xff] (!%p225_p3) }
   0x9   : > { %939 = vmatprep.subr.bf16.mxu0 (!%p225_p3), %v938_v3  ;;  %970 = vmatprep.subr.bf16.mxu1 (!%p225_p3), %v938_v3  ;;  %v397_v12 = vld [vmem:[%s1287_s1 + $0xa8] sm:$0xff] (!%p225_p3)  ;;  %v944_v13 = vpack.c.bf16 (!%p225_p3), %v379_v10, %v378_v9  ;;  %v380_v15 = vld [vmem:[%s1287_s1 + $0x20] sm:$0xff] (!%p225_p3)  ;;  %v398_v17 = vld [vmem:[%s1287_s1 + $0xb0] sm:$0xff] (!%p225_p3) }
   0xa   : > { %941 = vmatpush3.bf16.msra.mxu0 (!%p225_p3), %v940_v7  ;;  %978 = vmatpush3.bf16.msra.mxu1 (!%p225_p3), %v940_v7  ;;  %v946_v14 = vpack.c.bf16 (!%p225_p3), %v397_v12, %v396_v11  ;;  %v381_v16 = vld [vmem:[%s1287_s1 + $0x28] sm:$0xff] (!%p225_p3)  ;;  %v399_v18 = vld [vmem:[%s1287_s1 + $0xb8] sm:$0xff] (!%p225_p3)  ;;  %v382_v21 = vld [vmem:[%s1287_s1 + $0x30] sm:$0xff] (!%p225_p3) }
   0xb   : > { %943 = vmatprep.subr.bf16.mxu0 (!%p225_p3), %v942_v8  ;;  %971 = vmatprep.subr.bf16.mxu1 (!%p225_p3), %v942_v8  ;;  %v948_v19 = vpack.c.bf16 (!%p225_p3), %v381_v16, %v380_v15  ;;  %v950_v20 = vpack.c.bf16 (!%p225_p3), %v399_v18, %v398_v17  ;;  %v383_v22 = vld [vmem:[%s1287_s1 + $0x38] sm:$0xff] (!%p225_p3)  ;;  %v400_v23 = vld [vmem:[%s1287_s1 + $0xc0] sm:$0xff] (!%p225_p3)  ;;  %v401_v24 = vld [vmem:[%s1287_s1 + $0xc8] sm:$0xff] (!%p225_p3) }
   0xc   : > { %v952_v27 = vpack.c.bf16 (!%p225_p3), %v383_v22, %v382_v21  ;;  %v954_v28 = vpack.c.bf16 (!%p225_p3), %v401_v24, %v400_v23  ;;  %v384_v29 = vld [vmem:[%s1287_s1 + $0x40] sm:$0xff] (!%p225_p3)  ;;  %v385_v30 = vld [vmem:[%s1287_s1 + $0x48] sm:$0xff] (!%p225_p3)  ;;  %v402_v31 = vld [vmem:[%s1287_s1 + $0xd0] sm:$0xff] (!%p225_p3) }
   0xd   : > { %v403_v32 = vld [vmem:[%s1287_s1 + $0xd8] sm:$0xff] (!%p225_p3)  ;;  %v956_v33 = vpack.c.bf16 (!%p225_p3), %v385_v30, %v384_v29  ;;  %v386_v35 = vld [vmem:[%s1287_s1 + $0x50] sm:$0xff] (!%p225_p3)  ;;  %v404_v37 = vld [vmem:[%s1287_s1 + $0xe0] sm:$0xff] (!%p225_p3) }
   0xe   : > { %s1296_s25 = smov (!%p274_p4, %s848_s25), 111  ;;  %945 = vmatpush3.bf16.msra.mxu0 %v944_v13  ;;  %979 = vmatpush3.bf16.msra.mxu1 %v944_v13  ;;  %v958_v34 = vpack.c.bf16 %v403_v32, %v402_v31  ;;  %v387_v36 = vld [vmem:[%s1287_s1 + $0x58] sm:$0xff]  ;;  %v405_v38 = vld [vmem:[%s1287_s1 + $0xe8] sm:$0xff]  ;;  %v388_v41 = vld [vmem:[%s1287_s1 + $0x60] sm:$0xff] }
   0xf   : > { %s857_s21 = sshll.u32 %s1296_s25, 4  ;;  %947 = vmatprep.subr.bf16.mxu0 %v946_v14  ;;  %972 = vmatprep.subr.bf16.mxu1 %v946_v14  ;;  %v960_v39 = vpack.c.bf16 %v387_v36, %v386_v35  ;;  %v962_v40 = vpack.c.bf16 %v405_v38, %v404_v37  ;;  %v389_v42 = vld [vmem:[%s1287_s1 + $0x68] sm:$0xff]  ;;  %v406_v43 = vld [vmem:[%s1287_s1 + $0xf0] sm:$0xff]  ;;  %v407_v44 = vld [vmem:[%s1287_s1 + $0xf8] sm:$0xff] }
  0x10   : > { %s1125_s29 = scalar_lea.vmem %s1286_s0, %s857_s21  ;;  %v964_v45 = vpack.c.bf16 %v389_v42, %v388_v41  ;;  %v966_v46 = vpack.c.bf16 %v407_v44, %v406_v43  ;;  %v390_v47 = vld [vmem:[%s1287_s1 + $0x70] sm:$0xff]  ;;  %v391_v48 = vld [vmem:[%s1287_s1 + $0x78] sm:$0xff]  ;;  %v1221_v23 = vld [vmem:[%s1289_s3] ss:$0 sm:$0xff] }
  0x11   : > { %v345_v25 = vld [vmem:[%s1125_s29 + $0x8] sm:$0xff]  ;;  %v968_v49 = vpack.c.bf16 %v391_v48, %v390_v47  ;;  %v344_v50 = vld [vmem:[%s1125_s29] sm:$0xff]  ;;  %v347_v52 = vld [vmem:[%s1125_s29 + $0x18] sm:$0xff] }
  0x12   : > { %472 = vmatprep.mubr.f32.mxu0 %v345_v25  ;;  %v361_v26 = vld [vmem:[%s1125_s29 + $0x88] sm:$0xff]  ;;  %949 = vmatpush3.bf16.msra.mxu0 %v948_v19  ;;  %v360_v51 = vld [vmem:[%s1125_s29 + $0x80] sm:$0xff]  ;;  %v363_v53 = vld [vmem:[%s1125_s29 + $0x98] sm:$0xff] }
  0x13   : > { %980 = vmatpush3.bf16.msra.mxu1 %v948_v19  ;;  %951 = vmatprep.subr.bf16.mxu0 %v950_v20  ;;  %v346_v54 = vld [vmem:[%s1125_s29 + $0x10] sm:$0xff]  ;;  %v349_v56 = vld [vmem:[%s1125_s29 + $0x28] sm:$0xff]  ;;  %v348_v58 = vld [vmem:[%s1125_s29 + $0x20] sm:$0xff] }
  0x14   : > { %973 = vmatprep.subr.bf16.mxu1 %v950_v20  ;;  %512 = vmatprep.mubr.f32.mxu1 %v361_v26  ;;  %v362_v55 = vld [vmem:[%s1125_s29 + $0x90] sm:$0xff]  ;;  %v365_v57 = vld [vmem:[%s1125_s29 + $0xa8] sm:$0xff]  ;;  %v364_v59 = vld [vmem:[%s1125_s29 + $0xa0] sm:$0xff] }
  0x15   : > { %v351_v60 = vld [vmem:[%s1125_s29 + $0x38] sm:$0xff]  ;;  %v350_v62 = vld [vmem:[%s1125_s29 + $0x30] sm:$0xff]  ;;  %v353_v0 = vld [vmem:[%s1125_s29 + $0x48] sm:$0xff] }
  0x16   : > { %953 = vmatpush3.bf16.msra.mxu0 %v952_v27  ;;  %v367_v61 = vld [vmem:[%s1125_s29 + $0xb8] sm:$0xff]  ;;  %v366_v63 = vld [vmem:[%s1125_s29 + $0xb0] sm:$0xff]  ;;  %v369_v1 = vld [vmem:[%s1125_s29 + $0xc8] sm:$0xff] }
  0x17   : > { %981 = vmatpush3.bf16.msra.mxu1 %v952_v27  ;;  %955 = vmatprep.subr.bf16.mxu0 %v954_v28  ;;  %v352_v2 = vld [vmem:[%s1125_s29 + $0x40] sm:$0xff]  ;;  %v355_v4 = vld [vmem:[%s1125_s29 + $0x58] sm:$0xff]  ;;  %v354_v6 = vld [vmem:[%s1125_s29 + $0x50] sm:$0xff] }
  0x18   : > { %974 = vmatprep.subr.bf16.mxu1 %v954_v28  ;;  %v368_v3 = vld [vmem:[%s1125_s29 + $0xc0] sm:$0xff]  ;;  %v371_v5 = vld [vmem:[%s1125_s29 + $0xd8] sm:$0xff]  ;;  %v370_v7 = vld [vmem:[%s1125_s29 + $0xd0] sm:$0xff] }
  0x19   : > { %v357_v8 = vld [vmem:[%s1125_s29 + $0x68] sm:$0xff]  ;;  %v356_v10 = vld [vmem:[%s1125_s29 + $0x60] sm:$0xff]  ;;  %v359_v12 = vld [vmem:[%s1125_s29 + $0x78] sm:$0xff] }
  0x1a   : > { %957 = vmatpush3.bf16.msra.mxu0 %v956_v33  ;;  %v373_v9 = vld [vmem:[%s1125_s29 + $0xe8] sm:$0xff]  ;;  %v372_v11 = vld [vmem:[%s1125_s29 + $0xe0] sm:$0xff]  ;;  %v375_v13 = vld [vmem:[%s1125_s29 + $0xf8] sm:$0xff] }
  0x1b   : > { %982 = vmatpush3.bf16.msra.mxu1 %v956_v33  ;;  %959 = vmatprep.subr.bf16.mxu0 %v958_v34  ;;  %v358_v14 = vld [vmem:[%s1125_s29 + $0x70] sm:$0xff]  ;;  %v1216_v19 = vld [vmem:[%s1288_s2] ss:$0 sm:$0xff] }
  0x1c   : > { %975 = vmatprep.subr.bf16.mxu1 %v958_v34  ;;  %v374_v15 = vld [vmem:[%s1125_s29 + $0xf0] sm:$0xff]  ;;  %s852_s29 = sshll.u32 %s1296_s25, 3 }
  0x1d   : > { %s1231_s30 = scalar_lea.vmem %s1290_s4, %s852_s29 }
  0x1e   : > { %961 = vmatpush3.bf16.msra.mxu0 %v960_v39 }
  0x1f   : > { %983 = vmatpush3.bf16.msra.mxu1 %v960_v39  ;;  %963 = vmatprep.subr.bf16.mxu0 %v962_v40 }
  0x20   : > { %976 = vmatprep.subr.bf16.mxu1 %v962_v40 }
  0x22   : > { %965 = vmatpush3.bf16.msra.mxu0 %v964_v45 }
  0x23   : > { %984 = vmatpush3.bf16.msra.mxu1 %v964_v45  ;;  %967 = vmatprep.subr.bf16.mxu0 %v966_v46 }
  0x24   : > { %977 = vmatprep.subr.bf16.mxu1 %v966_v46 }
  0x26   : > { %969 = vmatpush3.bf16.msra.mxu0 %v968_v49 }
  0x27   : > { %985 = vmatpush3.bf16.msra.mxu1 %v968_v49 }
  0x29   : > { %473 = vmatmul.mubr.f32.vlgmr.msra.gmra.mrb[0].mxu0 %v344_v50 }
  0x2a   : > { %513 = vmatmul.mubr.f32.vlgmr.msra.gmra.mrb[0].mxu1 %v360_v51  ;;  %477 = vmatprep.mubr.f32.mxu0 %v347_v52 }
  0x2b   : > { %517 = vmatprep.mubr.f32.mxu1 %v363_v53 }
  0x2d   : > { %478 = vmatmul.mubr.f32.gmra.mrb[2].mxu0 %v346_v54 }
  0x2e   : > { %518 = vmatmul.mubr.f32.gmra.mrb[2].mxu1 %v362_v55  ;;  %482 = vmatprep.mubr.f32.mxu0 %v349_v56 }
  0x2f   : > { %522 = vmatprep.mubr.f32.mxu1 %v365_v57 }
  0x31   : > { %483 = vmatmul.mubr.f32.gmra.mrb[4].mxu0 %v348_v58 }
  0x32   : > { %523 = vmatmul.mubr.f32.gmra.mrb[4].mxu1 %v364_v59  ;;  %487 = vmatprep.mubr.f32.mxu0 %v351_v60 }
  0x33   : > { %527 = vmatprep.mubr.f32.mxu1 %v367_v61 }
  0x35   : > { %488 = vmatmul.mubr.f32.gmra.mrb[6].mxu0 %v350_v62 }
  0x36   : > { %528 = vmatmul.mubr.f32.gmra.mrb[6].mxu1 %v366_v63  ;;  %492 = vmatprep.mubr.f32.mxu0 %v353_v0 }
  0x37   : > { %532 = vmatprep.mubr.f32.mxu1 %v369_v1 }
  0x39   : > { %493 = vmatmul.mubr.f32.gmra.mrb[8].mxu0 %v352_v2 }
  0x3a   : > { %533 = vmatmul.mubr.f32.gmra.mrb[8].mxu1 %v368_v3  ;;  %497 = vmatprep.mubr.f32.mxu0 %v355_v4 }
  0x3b   : > { %537 = vmatprep.mubr.f32.mxu1 %v371_v5 }
  0x3d   : > { %498 = vmatmul.mubr.f32.gmra.mrb[10].mxu0 %v354_v6 }
  0x3e   : > { %538 = vmatmul.mubr.f32.gmra.mrb[10].mxu1 %v370_v7  ;;  %502 = vmatprep.mubr.f32.mxu0 %v357_v8 }
  0x3f   : > { %542 = vmatprep.mubr.f32.mxu1 %v373_v9 }
  0x41   : > { %503 = vmatmul.mubr.f32.gmra.mrb[12].mxu0 %v356_v10 }
  0x42   : > { %543 = vmatmul.mubr.f32.gmra.mrb[12].mxu1 %v372_v11  ;;  %507 = vmatprep.mubr.f32.mxu0 %v359_v12 }
  0x43   : > { %547 = vmatprep.mubr.f32.mxu1 %v375_v13 }
  0x45   : > { %508 = vmatmul.mubr.f32.gmra.mrb[14].mxu0 %v358_v14 }
  0x46   : > { %548 = vmatmul.mubr.f32.gmra.mrb[14].mxu1 %v374_v15 }
  0xfc   : > { %v890_v16 = vpop.f32.mrb[0].mxu0 }
  0xfd   : > { %v914_v17 = vpop.f32.mrb[0].mxu1  ;;  %v891_v18 = vpop.f32.mrb[1].mxu0 }
  0xfe   : > { %v915_v20 = vpop.f32.mrb[1].mxu1  ;;  %v892_v21 = vadd.f32 %v891_v18, %v890_v16 }
  0xff   : > { %v916_v22 = vadd.f32 %v915_v20, %v914_v17 }
 0x100   : > { %v611_v24 = vmul.f32 %v892_v21, %v1216_v19  ;;  %v893_v26 = vpop.f32.mrb[2].mxu0 }
 0x101   : > { %v619_v25 = vmul.f32 %v916_v22, %v1216_v19  ;;  %v917_v27 = vpop.f32.mrb[2].mxu1  ;;  %v894_v28 = vpop.f32.mrb[3].mxu0 }
 0x102   : > { %v918_v29 = vpop.f32.mrb[3].mxu1  ;;  %v634_v30 = vadd.f32 %v1221_v23, %v611_v24  ;;  %v895_v32 = vadd.f32 %v894_v28, %v893_v26 }
 0x103   : > { %v642_v31 = vadd.f32 %v1221_v23, %v619_v25  ;;  %v919_v33 = vadd.f32 %v918_v29, %v917_v27 }
 0x104   : > { %vm650_vm0 = vcmp.ge.f32.partialorder %v634_v30, 0.0  ;;  %v666_v34 = vmul.f32 0.2, %v634_v30  ;;  %v612_v36 = vmul.f32 %v895_v32, %v1216_v19  ;;  %v896_v38 = vpop.f32.mrb[4].mxu0 }
 0x105   : > { %vm658_vm1 = vcmp.ge.f32.partialorder %v642_v31, 0.0  ;;  %v674_v35 = vmul.f32 0.2, %v642_v31  ;;  %v620_v37 = vmul.f32 %v919_v33, %v1216_v19  ;;  %v920_v39 = vpop.f32.mrb[4].mxu1  ;;  %v897_v42 = vpop.f32.mrb[5].mxu0 }
 0x106   : > { %v682_v40 = vsel %vm650_vm0, %v634_v30, %v666_v34  ;;  %v921_v43 = vpop.f32.mrb[5].mxu1  ;;  %v635_v44 = vadd.f32 %v1221_v23, %v612_v36  ;;  %v898_v46 = vadd.f32 %v897_v42, %v896_v38 }
 0x107   : > { %v690_v41 = vsel %vm658_vm1, %v642_v31, %v674_v35  ;;  %698 = vst [vmem:[%s1231_s30] sm:$0xff] %v682_v40  ;;  %v643_v45 = vadd.f32 %v1221_v23, %v620_v37  ;;  %v922_v47 = vadd.f32 %v921_v43, %v920_v39 }
 0x108   : > { %706 = vst [vmem:[%s1231_s30 + $0x40] sm:$0xff] %v690_v41  ;;  %v899_v48 = vpop.f32.mrb[6].mxu0  ;;  %vm651_vm2 = vcmp.ge.f32.partialorder %v635_v44, 0.0  ;;  %v667_v50 = vmul.f32 0.2, %v635_v44  ;;  %v613_v52 = vmul.f32 %v898_v46, %v1216_v19 }
 0x109   : > { %v923_v49 = vpop.f32.mrb[6].mxu1  ;;  %vm659_vm3 = vcmp.ge.f32.partialorder %v643_v45, 0.0  ;;  %v675_v51 = vmul.f32 0.2, %v643_v45  ;;  %v621_v53 = vmul.f32 %v922_v47, %v1216_v19  ;;  %v900_v54 = vpop.f32.mrb[7].mxu0 }
 0x10a   : > { %v924_v55 = vpop.f32.mrb[7].mxu1  ;;  %v683_v56 = vsel %vm651_vm2, %v635_v44, %v667_v50  ;;  %v901_v58 = vadd.f32 %v900_v54, %v899_v48  ;;  %v636_v60 = vadd.f32 %v1221_v23, %v613_v52 }
 0x10b   : > { %v691_v57 = vsel %vm659_vm3, %v643_v45, %v675_v51  ;;  %v925_v59 = vadd.f32 %v924_v55, %v923_v49  ;;  %699 = vst [vmem:[%s1231_s30 + $0x8] sm:$0xff] %v683_v56  ;;  %v644_v61 = vadd.f32 %v1221_v23, %v621_v53 }
 0x10c   : > { %707 = vst [vmem:[%s1231_s30 + $0x48] sm:$0xff] %v691_v57  ;;  %v902_v62 = vpop.f32.mrb[8].mxu0  ;;  %v614_v0 = vmul.f32 %v901_v58, %v1216_v19  ;;  %vm652_vm4 = vcmp.ge.f32.partialorder %v636_v60, 0.0  ;;  %v668_v4 = vmul.f32 0.2, %v636_v60 }
 0x10d   : > { %v926_v63 = vpop.f32.mrb[8].mxu1  ;;  %v622_v1 = vmul.f32 %v925_v59, %v1216_v19  ;;  %v903_v2 = vpop.f32.mrb[9].mxu0  ;;  %vm660_vm5 = vcmp.ge.f32.partialorder %v644_v61, 0.0  ;;  %v676_v5 = vmul.f32 0.2, %v644_v61 }
 0x10e   : > { %v927_v3 = vpop.f32.mrb[9].mxu1  ;;  %v637_v6 = vadd.f32 %v1221_v23, %v614_v0  ;;  %v904_v8 = vadd.f32 %v903_v2, %v902_v62  ;;  %v684_v10 = vsel %vm652_vm4, %v636_v60, %v668_v4 }
 0x10f   : > { %v645_v7 = vadd.f32 %v1221_v23, %v622_v1  ;;  %v928_v9 = vadd.f32 %v927_v3, %v926_v63  ;;  %v692_v11 = vsel %vm660_vm5, %v644_v61, %v676_v5  ;;  %700 = vst [vmem:[%s1231_s30 + $0x10] sm:$0xff] %v684_v10 }
 0x110   : > { %v905_v12 = vpop.f32.mrb[10].mxu0  ;;  %708 = vst [vmem:[%s1231_s30 + $0x50] sm:$0xff] %v692_v11  ;;  %vm653_vm6 = vcmp.ge.f32.partialorder %v637_v6, 0.0  ;;  %v669_v14 = vmul.f32 0.2, %v637_v6  ;;  %v615_v16 = vmul.f32 %v904_v8, %v1216_v19 }
 0x111   : > { %v929_v13 = vpop.f32.mrb[10].mxu1  ;;  %vm661_vm7 = vcmp.ge.f32.partialorder %v645_v7, 0.0  ;;  %v677_v15 = vmul.f32 0.2, %v645_v7  ;;  %v623_v17 = vmul.f32 %v928_v9, %v1216_v19  ;;  %v906_v18 = vpop.f32.mrb[11].mxu0 }
 0x112   : > { %v930_v20 = vpop.f32.mrb[11].mxu1  ;;  %v685_v21 = vsel %vm653_vm6, %v637_v6, %v669_v14  ;;  %v907_v24 = vadd.f32 %v906_v18, %v905_v12  ;;  %v638_v26 = vadd.f32 %v1221_v23, %v615_v16 }
 0x113   : > { %v693_v22 = vsel %vm661_vm7, %v645_v7, %v677_v15  ;;  %v931_v25 = vadd.f32 %v930_v20, %v929_v13  ;;  %701 = vst [vmem:[%s1231_s30 + $0x18] sm:$0xff] %v685_v21  ;;  %v646_v27 = vadd.f32 %v1221_v23, %v623_v17 }
 0x114   : > { %709 = vst [vmem:[%s1231_s30 + $0x58] sm:$0xff] %v693_v22  ;;  %v908_v28 = vpop.f32.mrb[12].mxu0  ;;  %v616_v30 = vmul.f32 %v907_v24, %v1216_v19  ;;  %vm654_vm8 = vcmp.ge.f32.partialorder %v638_v26, 0.0  ;;  %v670_v34 = vmul.f32 0.2, %v638_v26 }
 0x115   : > { %v932_v29 = vpop.f32.mrb[12].mxu1  ;;  %v624_v31 = vmul.f32 %v931_v25, %v1216_v19  ;;  %v909_v32 = vpop.f32.mrb[13].mxu0  ;;  %vm662_vm9 = vcmp.ge.f32.partialorder %v646_v27, 0.0  ;;  %v678_v35 = vmul.f32 0.2, %v646_v27 }
 0x116   : > { %v933_v33 = vpop.f32.mrb[13].mxu1  ;;  %v639_v36 = vadd.f32 %v1221_v23, %v616_v30  ;;  %v910_v38 = vadd.f32 %v909_v32, %v908_v28  ;;  %v686_v40 = vsel %vm654_vm8, %v638_v26, %v670_v34 }
 0x117   : > { %v647_v37 = vadd.f32 %v1221_v23, %v624_v31  ;;  %v934_v39 = vadd.f32 %v933_v33, %v932_v29  ;;  %v694_v41 = vsel %vm662_vm9, %v646_v27, %v678_v35  ;;  %702 = vst [vmem:[%s1231_s30 + $0x20] sm:$0xff] %v686_v40 }
 0x118   : > { %v911_v42 = vpop.f32.mrb[14].mxu0  ;;  %710 = vst [vmem:[%s1231_s30 + $0x60] sm:$0xff] %v694_v41  ;;  %vm655_vm10 = vcmp.ge.f32.partialorder %v639_v36, 0.0  ;;  %v671_v44 = vmul.f32 0.2, %v639_v36  ;;  %v617_v46 = vmul.f32 %v910_v38, %v1216_v19 }
 0x119   : > { %v935_v43 = vpop.f32.mrb[14].mxu1  ;;  %vm663_vm11 = vcmp.ge.f32.partialorder %v647_v37, 0.0  ;;  %v679_v45 = vmul.f32 0.2, %v647_v37  ;;  %v625_v47 = vmul.f32 %v934_v39, %v1216_v19  ;;  %v912_v48 = vpop.f32.mrb[15].mxu0 }
 0x11a   : > { %v936_v49 = vpop.f32.mrb[15].mxu1  ;;  %v687_v50 = vsel %vm655_vm10, %v639_v36, %v671_v44  ;;  %v913_v52 = vadd.f32 %v912_v48, %v911_v42  ;;  %v640_v54 = vadd.f32 %v1221_v23, %v617_v46 }
 0x11b   : > { %v695_v51 = vsel %vm663_vm11, %v647_v37, %v679_v45  ;;  %v937_v53 = vadd.f32 %v936_v49, %v935_v43  ;;  %703 = vst [vmem:[%s1231_s30 + $0x28] sm:$0xff] %v687_v50  ;;  %v648_v55 = vadd.f32 %v1221_v23, %v625_v47 }
 0x11c   : > { %711 = vst [vmem:[%s1231_s30 + $0x68] sm:$0xff] %v695_v51  ;;  %v618_v56 = vmul.f32 %v913_v52, %v1216_v19  ;;  %vm656_vm12 = vcmp.ge.f32.partialorder %v640_v54, 0.0  ;;  %v672_v58 = vmul.f32 0.2, %v640_v54 }
 0x11d   : > { %v626_v57 = vmul.f32 %v937_v53, %v1216_v19  ;;  %vm664_vm13 = vcmp.ge.f32.partialorder %v648_v55, 0.0  ;;  %v680_v59 = vmul.f32 0.2, %v648_v55 }
 0x11e   : > { %v641_v60 = vadd.f32 %v1221_v23, %v618_v56  ;;  %v688_v62 = vsel %vm656_vm12, %v640_v54, %v672_v58 }
 0x11f   : > { %v649_v61 = vadd.f32 %v1221_v23, %v626_v57  ;;  %v696_v63 = vsel %vm664_vm13, %v648_v55, %v680_v59  ;;  %704 = vst [vmem:[%s1231_s30 + $0x30] sm:$0xff] %v688_v62 }
 0x120   : > { %712 = vst [vmem:[%s1231_s30 + $0x70] sm:$0xff] %v696_v63  ;;  %vm657_vm14 = vcmp.ge.f32.partialorder %v641_v60, 0.0  ;;  %v673_v0 = vmul.f32 0.2, %v641_v60 }
 0x121   : > { %vm665_vm15 = vcmp.ge.f32.partialorder %v649_v61, 0.0  ;;  %v681_v1 = vmul.f32 0.2, %v649_v61 }
 0x122   : > { %v689_v2 = vsel %vm657_vm14, %v641_v60, %v673_v0 }
 0x123   : > { %v697_v19 = vsel %vm665_vm15, %v649_v61, %v681_v1  ;;  %705 = vst [vmem:[%s1231_s30 + $0x38] sm:$0xff] %v689_v2 }
 0x124   : > { %713 = vst [vmem:[%s1231_s30 + $0x78] sm:$0xff] %v697_v19 }
 0x125 PF: > { %s14_s17 = sadd.s32 1, %s1032_s17   ;;  %s1291_s15 = smov %s1028_s16 }
 0x126   : > { %p11_p5 = scmp.ge.s32.totalorder %s14_s17, 9   ;;  %s1292_s16 = smov %s1294_s18 }
 0x128   :  { %13 = sbr.rel (!%p11_p5) target bundleno = 2 (0x2), region = 83 }

// kernel: forward.6
= control target key start
LH: loop header
LB: loop body
LE: loop exit
PB: predicated region body
PF: predicated region fallthrough
CT: control target
= control target key end

     0   :  { %s1364_s15 = smov 0   ;;  %s1366_s16 = smov 0   ;;  %s1732_s0 = inlined_call_operand.vmem [shape: f32[256,512], index: 0, kind: input, shape index: {}]   ;;  %s1733_s1 = inlined_call_operand.vmem [shape: f32[512,128], index: 1, kind: input, shape index: {}]   ;;  %s1734_s2 = inlined_call_operand.vmem [shape: f32[1,128], index: 2, kind: input, shape index: {}]   ;;  %s1735_s3 = inlined_call_operand.vmem [shape: f32[1,128], index: 3, kind: input, shape index: {}]   ;;  %s1736_s4 = inlined_call_operand.vmem [shape: f32[256,128], index: 4, kind: output, shape index: {}]  }
   0x1   :  { %s1368_s17 = smov 0  }
   0x2 LB: > { %s33_s18 = sadd.s32 1, %s1333_s16  ;;  %p1056_p0 = scmp.ge.s32.totalorder %s1337_s17, 1  ;;  %s1337_s17 = sphi %s1368_s17, %s14_s17   ;;  %s1333_s16 = sphi %s1366_s16, %s1739_s16   ;;  %s1329_s15 = sphi %s1364_s15, %s1738_s15  }
   0x3   : > { %p35_p1 = scmp.ge.s32.totalorder %s33_s18, 2  ;;  %p224_p2 = scmp.lt.s32.totalorder %s1337_s17, 3 }
   0x5   : > { %s1741_s18 = smov (%p35_p1, %s33_s18), 0  ;;  %p225_p3 = pnand %p1056_p0, %p224_p2 }
   0x6   : > { %v424_v0 = vld [vmem:[%s1733_s1 + $0x80] sm:$0xff] (!%p225_p3)  ;;  %v425_v1 = vld [vmem:[%s1733_s1 + $0x88] sm:$0xff] (!%p225_p3)  ;;  %v426_v11 = vld [vmem:[%s1733_s1 + $0x90] sm:$0xff] (!%p225_p3)  ;;  %s1057_s27 = sshll.u32 (!%p225_p3), %s1329_s15, 4 }
   0x7   : > { %228 = sbr.rel (%p225_p3) target bundleno = 328 (0x148), region = 36  ;;  %v456_v2 = vld [vmem:[%s1733_s1 + $0x180] sm:$0xff] (!%p225_p3)  ;;  %v1227_v3 = vpack.c.bf16 (!%p225_p3), %v425_v1, %v424_v0  ;;  %v457_v4 = vld [vmem:[%s1733_s1 + $0x188] sm:$0xff] (!%p225_p3)  ;;  %v427_v13 = vld [vmem:[%s1733_s1 + $0x98] sm:$0xff] (!%p225_p3)  ;;  %p1459_p4 = scmp.lt.s32.totalorder (!%p225_p3), %s1057_s27, 31 }
   0x8   : > { %v408_v5 = vld [vmem:[%s1733_s1] sm:$0xff] (!%p225_p3)  ;;  %v409_v6 = vld [vmem:[%s1733_s1 + $0x8] sm:$0xff] (!%p225_p3)  ;;  %v1259_v7 = vpack.c.bf16 (!%p225_p3), %v457_v4, %v456_v2  ;;  %v458_v14 = vld [vmem:[%s1733_s1 + $0x190] sm:$0xff] (!%p225_p3)  ;;  %v1231_v16 = vpack.c.bf16 (!%p225_p3), %v427_v13, %v426_v11 }
   0x9   : > { %v1229_v8 = vpack.c.bf16 (!%p225_p3), %v409_v6, %v408_v5  ;;  %v440_v9 = vld [vmem:[%s1733_s1 + $0x100] sm:$0xff] (!%p225_p3)  ;;  %v441_v10 = vld [vmem:[%s1733_s1 + $0x108] sm:$0xff] (!%p225_p3)  ;;  %1228 = vmatprep.subr.bf16.mxu0 (!%p225_p3), %v1227_v3  ;;  %v459_v15 = vld [vmem:[%s1733_s1 + $0x198] sm:$0xff] (!%p225_p3) }
   0xa   : > { %v1261_v12 = vpack.c.bf16 (!%p225_p3), %v441_v10, %v440_v9  ;;  %1260 = vmatprep.subr.bf16.mxu1 (!%p225_p3), %v1259_v7  ;;  %v1263_v17 = vpack.c.bf16 (!%p225_p3), %v459_v15, %v458_v14  ;;  %v410_v18 = vld [vmem:[%s1733_s1 + $0x10] sm:$0xff] (!%p225_p3)  ;;  %v411_v19 = vld [vmem:[%s1733_s1 + $0x18] sm:$0xff] (!%p225_p3)  ;;  %v428_v23 = vld [vmem:[%s1733_s1 + $0xa0] sm:$0xff] (!%p225_p3) }
   0xb   : > { %1230 = vmatpush3.bf16.msra.mxu0 (!%p225_p3), %v1229_v8  ;;  %v442_v20 = vld [vmem:[%s1733_s1 + $0x110] sm:$0xff] (!%p225_p3)  ;;  %v1233_v21 = vpack.c.bf16 (!%p225_p3), %v411_v19, %v410_v18  ;;  %v443_v22 = vld [vmem:[%s1733_s1 + $0x118] sm:$0xff] (!%p225_p3)  ;;  %v429_v24 = vld [vmem:[%s1733_s1 + $0xa8] sm:$0xff] (!%p225_p3) }
   0xc   : > { %1262 = vmatpush3.bf16.msra.mxu1 (!%p225_p3), %v1261_v12  ;;  %1232 = vmatprep.subr.bf16.mxu0 (!%p225_p3), %v1231_v16  ;;  %v1265_v25 = vpack.c.bf16 (!%p225_p3), %v443_v22, %v442_v20  ;;  %v1235_v26 = vpack.c.bf16 (!%p225_p3), %v429_v24, %v428_v23  ;;  %v460_v27 = vld [vmem:[%s1733_s1 + $0x1a0] sm:$0xff] (!%p225_p3)  ;;  %v461_v28 = vld [vmem:[%s1733_s1 + $0x1a8] sm:$0xff] (!%p225_p3)  ;;  %v430_v35 = vld [vmem:[%s1733_s1 + $0xb0] sm:$0xff] (!%p225_p3) }
   0xd   : > { %1264 = vmatprep.subr.bf16.mxu1 (!%p225_p3), %v1263_v17  ;;  %v412_v29 = vld [vmem:[%s1733_s1 + $0x20] sm:$0xff] (!%p225_p3)  ;;  %v1267_v30 = vpack.c.bf16 (!%p225_p3), %v461_v28, %v460_v27  ;;  %v413_v31 = vld [vmem:[%s1733_s1 + $0x28] sm:$0xff] (!%p225_p3)  ;;  %v431_v36 = vld [vmem:[%s1733_s1 + $0xb8] sm:$0xff] (!%p225_p3) }
   0xe   : > { %v444_v32 = vld [vmem:[%s1733_s1 + $0x120] sm:$0xff]  ;;  %v445_v33 = vld [vmem:[%s1733_s1 + $0x128] sm:$0xff]  ;;  %v1237_v34 = vpack.c.bf16 %v413_v31, %v412_v29  ;;  %v462_v37 = vld [vmem:[%s1733_s1 + $0x1b0] sm:$0xff]  ;;  %v1239_v39 = vpack.c.bf16 %v431_v36, %v430_v35  ;;  %s1743_s27 = smov (!%p1459_p4, %s1057_s27), 31 }
   0xf   : > { %1234 = vmatpush3.bf16.msra.mxu0 %v1233_v21  ;;  %v1269_v38 = vpack.c.bf16 %v445_v33, %v444_v32  ;;  %v463_v40 = vld [vmem:[%s1733_s1 + $0x1b8] sm:$0xff]  ;;  %v414_v41 = vld [vmem:[%s1733_s1 + $0x30] sm:$0xff]  ;;  %v432_v46 = vld [vmem:[%s1733_s1 + $0xc0] sm:$0xff]  ;;  %s1066_s22 = sshll.u32 %s1743_s27, 5  ;;  %s1061_s28 = sshll.u32 %s1743_s27, 3 }
  0x10   : > { %1266 = vmatpush3.bf16.msra.mxu1 %v1265_v25  ;;  %1236 = vmatprep.subr.bf16.mxu0 %v1235_v26  ;;  %v415_v42 = vld [vmem:[%s1733_s1 + $0x38] sm:$0xff]  ;;  %v1271_v43 = vpack.c.bf16 %v463_v40, %v462_v37  ;;  %v446_v44 = vld [vmem:[%s1733_s1 + $0x130] sm:$0xff]  ;;  %v433_v47 = vld [vmem:[%s1733_s1 + $0xc8] sm:$0xff]  ;;  %s1551_s11 = scalar_lea.vmem %s1732_s0, %s1066_s22  ;;  %s1675_s5 = scalar_lea.vmem %s1736_s4, %s1061_s28 }
  0x11   : > { %1268 = vmatprep.subr.bf16.mxu1 %v1267_v30  ;;  %v447_v45 = vld [vmem:[%s1733_s1 + $0x138] sm:$0xff]  ;;  %v464_v48 = vld [vmem:[%s1733_s1 + $0x1c0] sm:$0xff]  ;;  %v465_v49 = vld [vmem:[%s1733_s1 + $0x1c8] sm:$0xff]  ;;  %v1241_v50 = vpack.c.bf16 %v415_v42, %v414_v41  ;;  %v1243_v52 = vpack.c.bf16 %v433_v47, %v432_v46 }
  0x12   : > { %v1273_v51 = vpack.c.bf16 %v447_v45, %v446_v44  ;;  %v416_v53 = vld [vmem:[%s1733_s1 + $0x40] sm:$0xff]  ;;  %v417_v54 = vld [vmem:[%s1733_s1 + $0x48] sm:$0xff]  ;;  %v1275_v56 = vpack.c.bf16 %v465_v49, %v464_v48  ;;  %v434_v58 = vld [vmem:[%s1733_s1 + $0xd0] sm:$0xff] }
  0x13   : > { %1238 = vmatpush3.bf16.msra.mxu0 %v1237_v34  ;;  %v448_v55 = vld [vmem:[%s1733_s1 + $0x140] sm:$0xff]  ;;  %v449_v57 = vld [vmem:[%s1733_s1 + $0x148] sm:$0xff]  ;;  %v435_v59 = vld [vmem:[%s1733_s1 + $0xd8] sm:$0xff]  ;;  %v1245_v62 = vpack.c.bf16 %v417_v54, %v416_v53 }
  0x14   : > { %1270 = vmatpush3.bf16.msra.mxu1 %v1269_v38  ;;  %1240 = vmatprep.subr.bf16.mxu0 %v1239_v39  ;;  %v466_v60 = vld [vmem:[%s1733_s1 + $0x1d0] sm:$0xff]  ;;  %v467_v61 = vld [vmem:[%s1733_s1 + $0x1d8] sm:$0xff]  ;;  %v1277_v63 = vpack.c.bf16 %v449_v57, %v448_v55  ;;  %v1247_v0 = vpack.c.bf16 %v435_v59, %v434_v58  ;;  %v436_v6 = vld [vmem:[%s1733_s1 + $0xe0] sm:$0xff] }
  0x15   : > { %1272 = vmatprep.subr.bf16.mxu1 %v1271_v43  ;;  %v418_v1 = vld [vmem:[%s1733_s1 + $0x50] sm:$0xff]  ;;  %v419_v2 = vld [vmem:[%s1733_s1 + $0x58] sm:$0xff]  ;;  %v1279_v4 = vpack.c.bf16 %v467_v61, %v466_v60  ;;  %v437_v7 = vld [vmem:[%s1733_s1 + $0xe8] sm:$0xff] }
  0x16   : > { %v450_v3 = vld [vmem:[%s1733_s1 + $0x150] sm:$0xff]  ;;  %v451_v5 = vld [vmem:[%s1733_s1 + $0x158] sm:$0xff]  ;;  %v468_v8 = vld [vmem:[%s1733_s1 + $0x1e0] sm:$0xff]  ;;  %v1249_v10 = vpack.c.bf16 %v419_v2, %v418_v1  ;;  %v1251_v14 = vpack.c.bf16 %v437_v7, %v436_v6 }
  0x17   : > { %1242 = vmatpush3.bf16.msra.mxu0 %v1241_v50  ;;  %v469_v9 = vld [vmem:[%s1733_s1 + $0x1e8] sm:$0xff]  ;;  %v420_v11 = vld [vmem:[%s1733_s1 + $0x60] sm:$0xff]  ;;  %v1281_v13 = vpack.c.bf16 %v451_v5, %v450_v3  ;;  %v347_v17 = vld [vmem:[%s1551_s11 + $0x18] sm:$0xff] }
  0x18   : > { %1274 = vmatpush3.bf16.msra.mxu1 %v1273_v51  ;;  %1244 = vmatprep.subr.bf16.mxu0 %v1243_v52  ;;  %v421_v12 = vld [vmem:[%s1733_s1 + $0x68] sm:$0xff]  ;;  %v452_v15 = vld [vmem:[%s1733_s1 + $0x160] sm:$0xff]  ;;  %v1283_v18 = vpack.c.bf16 %v469_v9, %v468_v8  ;;  %v438_v20 = vld [vmem:[%s1733_s1 + $0xf0] sm:$0xff] }
  0x19   : > { %1276 = vmatprep.subr.bf16.mxu1 %v1275_v56  ;;  %v345_v16 = vld [vmem:[%s1551_s11 + $0x8] sm:$0xff]  ;;  %v439_v21 = vld [vmem:[%s1733_s1 + $0xf8] sm:$0xff]  ;;  %v470_v22 = vld [vmem:[%s1733_s1 + $0x1f0] sm:$0xff]  ;;  %681 = vmatprep.mubr.f32.mxu1 %v347_v17  ;;  %v1253_v24 = vpack.c.bf16 %v421_v12, %v420_v11 }
  0x1a   : > { %v453_v19 = vld [vmem:[%s1733_s1 + $0x168] sm:$0xff]  ;;  %536 = vmatprep.mubr.f32.mxu0 %v345_v16  ;;  %v471_v23 = vld [vmem:[%s1733_s1 + $0x1f8] sm:$0xff]  ;;  %v1255_v26 = vpack.c.bf16 %v439_v21, %v438_v20  ;;  %v422_v27 = vld [vmem:[%s1733_s1 + $0x70] sm:$0xff] }
  0x1b   : > { %1246 = vmatpush3.bf16.msra.mxu0 %v1245_v62  ;;  %v1285_v25 = vpack.c.bf16 %v453_v19, %v452_v15  ;;  %v423_v28 = vld [vmem:[%s1733_s1 + $0x78] sm:$0xff]  ;;  %v1287_v29 = vpack.c.bf16 %v471_v23, %v470_v22  ;;  %v454_v30 = vld [vmem:[%s1733_s1 + $0x170] sm:$0xff]  ;;  %v344_v34 = vld [vmem:[%s1551_s11] sm:$0xff] }
  0x1c   : > { %1278 = vmatpush3.bf16.msra.mxu1 %v1277_v63  ;;  %1248 = vmatprep.subr.bf16.mxu0 %v1247_v0  ;;  %v455_v31 = vld [vmem:[%s1733_s1 + $0x178] sm:$0xff]  ;;  %v1257_v32 = vpack.c.bf16 %v423_v28, %v422_v27  ;;  %v346_v35 = vld [vmem:[%s1551_s11 + $0x10] sm:$0xff]  ;;  %v349_v36 = vld [vmem:[%s1551_s11 + $0x28] sm:$0xff] }
  0x1d   : > { %1280 = vmatprep.subr.bf16.mxu1 %v1279_v4  ;;  %v1289_v33 = vpack.c.bf16 %v455_v31, %v454_v30  ;;  %v351_v37 = vld [vmem:[%s1551_s11 + $0x38] sm:$0xff]  ;;  %v348_v38 = vld [vmem:[%s1551_s11 + $0x20] sm:$0xff]  ;;  %v350_v39 = vld [vmem:[%s1551_s11 + $0x30] sm:$0xff] }
  0x1e   : > { %v353_v40 = vld [vmem:[%s1551_s11 + $0x48] sm:$0xff]  ;;  %v355_v41 = vld [vmem:[%s1551_s11 + $0x58] sm:$0xff]  ;;  %v352_v42 = vld [vmem:[%s1551_s11 + $0x40] sm:$0xff] }
  0x1f   : > { %1250 = vmatpush3.bf16.msra.mxu0 %v1249_v10  ;;  %v354_v43 = vld [vmem:[%s1551_s11 + $0x50] sm:$0xff]  ;;  %v357_v44 = vld [vmem:[%s1551_s11 + $0x68] sm:$0xff]  ;;  %v359_v45 = vld [vmem:[%s1551_s11 + $0x78] sm:$0xff] }
  0x20   : > { %1282 = vmatpush3.bf16.msra.mxu1 %v1281_v13  ;;  %1252 = vmatprep.subr.bf16.mxu0 %v1251_v14  ;;  %v356_v46 = vld [vmem:[%s1551_s11 + $0x60] sm:$0xff]  ;;  %v358_v47 = vld [vmem:[%s1551_s11 + $0x70] sm:$0xff]  ;;  %v361_v48 = vld [vmem:[%s1551_s11 + $0x88] sm:$0xff] }
  0x21   : > { %1284 = vmatprep.subr.bf16.mxu1 %v1283_v18  ;;  %v363_v49 = vld [vmem:[%s1551_s11 + $0x98] sm:$0xff]  ;;  %v360_v50 = vld [vmem:[%s1551_s11 + $0x80] sm:$0xff]  ;;  %v362_v51 = vld [vmem:[%s1551_s11 + $0x90] sm:$0xff] }
  0x22   : > { %v365_v52 = vld [vmem:[%s1551_s11 + $0xa8] sm:$0xff]  ;;  %v367_v53 = vld [vmem:[%s1551_s11 + $0xb8] sm:$0xff]  ;;  %v364_v54 = vld [vmem:[%s1551_s11 + $0xa0] sm:$0xff] }
  0x23   : > { %1254 = vmatpush3.bf16.msra.mxu0 %v1253_v24  ;;  %v366_v55 = vld [vmem:[%s1551_s11 + $0xb0] sm:$0xff]  ;;  %v369_v56 = vld [vmem:[%s1551_s11 + $0xc8] sm:$0xff]  ;;  %v371_v57 = vld [vmem:[%s1551_s11 + $0xd8] sm:$0xff] }
  0x24   : > { %1286 = vmatpush3.bf16.msra.mxu1 %v1285_v25  ;;  %1256 = vmatprep.subr.bf16.mxu0 %v1255_v26  ;;  %v368_v58 = vld [vmem:[%s1551_s11 + $0xc0] sm:$0xff]  ;;  %v370_v59 = vld [vmem:[%s1551_s11 + $0xd0] sm:$0xff]  ;;  %v373_v60 = vld [vmem:[%s1551_s11 + $0xe8] sm:$0xff] }
  0x25   : > { %1288 = vmatprep.subr.bf16.mxu1 %v1287_v29  ;;  %v375_v61 = vld [vmem:[%s1551_s11 + $0xf8] sm:$0xff]  ;;  %v372_v62 = vld [vmem:[%s1551_s11 + $0xe0] sm:$0xff]  ;;  %v374_v63 = vld [vmem:[%s1551_s11 + $0xf0] sm:$0xff] }
  0x26   : > { %v377_v0 = vld [vmem:[%s1551_s11 + $0x108] sm:$0xff]  ;;  %v379_v1 = vld [vmem:[%s1551_s11 + $0x118] sm:$0xff]  ;;  %v376_v2 = vld [vmem:[%s1551_s11 + $0x100] sm:$0xff] }
  0x27   : > { %1258 = vmatpush3.bf16.msra.mxu0 %v1257_v32  ;;  %v378_v3 = vld [vmem:[%s1551_s11 + $0x110] sm:$0xff]  ;;  %v381_v4 = vld [vmem:[%s1551_s11 + $0x128] sm:$0xff]  ;;  %v383_v5 = vld [vmem:[%s1551_s11 + $0x138] sm:$0xff] }
  0x28   : > { %1290 = vmatpush3.bf16.msra.mxu1 %v1289_v33  ;;  %v380_v6 = vld [vmem:[%s1551_s11 + $0x120] sm:$0xff]  ;;  %v382_v7 = vld [vmem:[%s1551_s11 + $0x130] sm:$0xff]  ;;  %v385_v8 = vld [vmem:[%s1551_s11 + $0x148] sm:$0xff] }
  0x29   : > { %v387_v9 = vld [vmem:[%s1551_s11 + $0x158] sm:$0xff]  ;;  %v384_v10 = vld [vmem:[%s1551_s11 + $0x140] sm:$0xff]  ;;  %v386_v11 = vld [vmem:[%s1551_s11 + $0x150] sm:$0xff] }
  0x2a   : > { %537 = vmatmul.mubr.f32.vlgmr.msra.gmra.mrb[0].mxu0 %v344_v34  ;;  %v389_v12 = vld [vmem:[%s1551_s11 + $0x168] sm:$0xff]  ;;  %v391_v13 = vld [vmem:[%s1551_s11 + $0x178] sm:$0xff]  ;;  %v388_v14 = vld [vmem:[%s1551_s11 + $0x160] sm:$0xff] }
  0x2b   : > { %682 = vmatmul.mubr.f32.vlgmr.msra.gmra.mrb[0].mxu1 %v346_v35  ;;  %541 = vmatprep.mubr.f32.mxu0 %v349_v36  ;;  %v390_v15 = vld [vmem:[%s1551_s11 + $0x170] sm:$0xff]  ;;  %v393_v16 = vld [vmem:[%s1551_s11 + $0x188] sm:$0xff]  ;;  %v395_v17 = vld [vmem:[%s1551_s11 + $0x198] sm:$0xff] }
  0x2c   : > { %686 = vmatprep.mubr.f32.mxu1 %v351_v37  ;;  %v392_v18 = vld [vmem:[%s1551_s11 + $0x180] sm:$0xff]  ;;  %v394_v19 = vld [vmem:[%s1551_s11 + $0x190] sm:$0xff]  ;;  %v397_v20 = vld [vmem:[%s1551_s11 + $0x1a8] sm:$0xff] }
  0x2d   : > { %v399_v21 = vld [vmem:[%s1551_s11 + $0x1b8] sm:$0xff]  ;;  %v396_v22 = vld [vmem:[%s1551_s11 + $0x1a0] sm:$0xff]  ;;  %v398_v23 = vld [vmem:[%s1551_s11 + $0x1b0] sm:$0xff] }
  0x2e   : > { %542 = vmatmul.mubr.f32.gmra.mrb[2].mxu0 %v348_v38  ;;  %v401_v24 = vld [vmem:[%s1551_s11 + $0x1c8] sm:$0xff]  ;;  %v403_v25 = vld [vmem:[%s1551_s11 + $0x1d8] sm:$0xff]  ;;  %v400_v26 = vld [vmem:[%s1551_s11 + $0x1c0] sm:$0xff] }
  0x2f   : > { %687 = vmatmul.mubr.f32.gmra.mrb[2].mxu1 %v350_v39  ;;  %546 = vmatprep.mubr.f32.mxu0 %v353_v40  ;;  %v402_v27 = vld [vmem:[%s1551_s11 + $0x1d0] sm:$0xff]  ;;  %v405_v28 = vld [vmem:[%s1551_s11 + $0x1e8] sm:$0xff]  ;;  %v407_v29 = vld [vmem:[%s1551_s11 + $0x1f8] sm:$0xff] }
  0x30   : > { %691 = vmatprep.mubr.f32.mxu1 %v355_v41  ;;  %v404_v30 = vld [vmem:[%s1551_s11 + $0x1e0] sm:$0xff]  ;;  %v406_v31 = vld [vmem:[%s1551_s11 + $0x1f0] sm:$0xff] }
  0x31   : > { %v1662_v38 = vld [vmem:[%s1734_s2] ss:$0 sm:$0xff] }
  0x32   : > { %547 = vmatmul.mubr.f32.gmra.mrb[4].mxu0 %v352_v42 }
  0x33   : > { %692 = vmatmul.mubr.f32.gmra.mrb[4].mxu1 %v354_v43  ;;  %551 = vmatprep.mubr.f32.mxu0 %v357_v44  ;;  %v1667_v43 = vld [vmem:[%s1735_s3] ss:$0 sm:$0xff] }
  0x34   : > { %696 = vmatprep.mubr.f32.mxu1 %v359_v45 }
  0x36   : > { %552 = vmatmul.mubr.f32.gmra.mrb[6].mxu0 %v356_v46 }
  0x37   : > { %697 = vmatmul.mubr.f32.gmra.mrb[6].mxu1 %v358_v47  ;;  %556 = vmatprep.mubr.f32.mxu0 %v361_v48 }
  0x38   : > { %701 = vmatprep.mubr.f32.mxu1 %v363_v49 }
  0x3a   : > { %557 = vmatmul.mubr.f32.gmra.mrb[8].mxu0 %v360_v50 }
  0x3b   : > { %702 = vmatmul.mubr.f32.gmra.mrb[8].mxu1 %v362_v51  ;;  %561 = vmatprep.mubr.f32.mxu0 %v365_v52 }
  0x3c   : > { %706 = vmatprep.mubr.f32.mxu1 %v367_v53 }
  0x3e   : > { %562 = vmatmul.mubr.f32.gmra.mrb[10].mxu0 %v364_v54 }
  0x3f   : > { %707 = vmatmul.mubr.f32.gmra.mrb[10].mxu1 %v366_v55  ;;  %566 = vmatprep.mubr.f32.mxu0 %v369_v56 }
  0x40   : > { %711 = vmatprep.mubr.f32.mxu1 %v371_v57 }
  0x42   : > { %567 = vmatmul.mubr.f32.gmra.mrb[12].mxu0 %v368_v58 }
  0x43   : > { %712 = vmatmul.mubr.f32.gmra.mrb[12].mxu1 %v370_v59  ;;  %571 = vmatprep.mubr.f32.mxu0 %v373_v60 }
  0x44   : > { %716 = vmatprep.mubr.f32.mxu1 %v375_v61 }
  0x46   : > { %572 = vmatmul.mubr.f32.gmra.mrb[14].mxu0 %v372_v62 }
  0x47   : > { %717 = vmatmul.mubr.f32.gmra.mrb[14].mxu1 %v374_v63  ;;  %576 = vmatprep.mubr.f32.mxu0 %v377_v0 }
  0x48   : > { %721 = vmatprep.mubr.f32.mxu1 %v379_v1 }
  0x4a   : > { %577 = vmatmul.mubr.f32.gmra.mrb[16].mxu0 %v376_v2 }
  0x4b   : > { %722 = vmatmul.mubr.f32.gmra.mrb[16].mxu1 %v378_v3  ;;  %581 = vmatprep.mubr.f32.mxu0 %v381_v4 }
  0x4c   : > { %726 = vmatprep.mubr.f32.mxu1 %v383_v5 }
  0x4e   : > { %582 = vmatmul.mubr.f32.gmra.mrb[18].mxu0 %v380_v6 }
  0x4f   : > { %727 = vmatmul.mubr.f32.gmra.mrb[18].mxu1 %v382_v7  ;;  %586 = vmatprep.mubr.f32.mxu0 %v385_v8 }
  0x50   : > { %731 = vmatprep.mubr.f32.mxu1 %v387_v9 }
  0x52   : > { %587 = vmatmul.mubr.f32.gmra.mrb[20].mxu0 %v384_v10 }
  0x53   : > { %732 = vmatmul.mubr.f32.gmra.mrb[20].mxu1 %v386_v11  ;;  %591 = vmatprep.mubr.f32.mxu0 %v389_v12 }
  0x54   : > { %736 = vmatprep.mubr.f32.mxu1 %v391_v13 }
  0x56   : > { %592 = vmatmul.mubr.f32.gmra.mrb[22].mxu0 %v388_v14 }
  0x57   : > { %737 = vmatmul.mubr.f32.gmra.mrb[22].mxu1 %v390_v15  ;;  %596 = vmatprep.mubr.f32.mxu0 %v393_v16 }
  0x58   : > { %741 = vmatprep.mubr.f32.mxu1 %v395_v17 }
  0x5a   : > { %597 = vmatmul.mubr.f32.gmra.mrb[24].mxu0 %v392_v18 }
  0x5b   : > { %742 = vmatmul.mubr.f32.gmra.mrb[24].mxu1 %v394_v19  ;;  %601 = vmatprep.mubr.f32.mxu0 %v397_v20 }
  0x5c   : > { %746 = vmatprep.mubr.f32.mxu1 %v399_v21 }
  0x5e   : > { %602 = vmatmul.mubr.f32.gmra.mrb[26].mxu0 %v396_v22 }
  0x5f   : > { %747 = vmatmul.mubr.f32.gmra.mrb[26].mxu1 %v398_v23  ;;  %606 = vmatprep.mubr.f32.mxu0 %v401_v24 }
  0x60   : > { %751 = vmatprep.mubr.f32.mxu1 %v403_v25 }
  0x62   : > { %607 = vmatmul.mubr.f32.gmra.mrb[28].mxu0 %v400_v26 }
  0x63   : > { %752 = vmatmul.mubr.f32.gmra.mrb[28].mxu1 %v402_v27  ;;  %611 = vmatprep.mubr.f32.mxu0 %v405_v28 }
  0x64   : > { %756 = vmatprep.mubr.f32.mxu1 %v407_v29 }
  0x66   : > { %612 = vmatmul.mubr.f32.gmra.mrb[30].mxu0 %v404_v30 }
  0x67   : > { %757 = vmatmul.mubr.f32.gmra.mrb[30].mxu1 %v406_v31 }
  0xfd   : > { %v1099_v32 = vpop.f32.mrb[0].mxu0 }
  0xfe   : > { %v1179_v33 = vpop.f32.mrb[0].mxu1  ;;  %v1100_v34 = vpop.f32.mrb[1].mxu0 }
  0xff   : > { %v1101_v35 = vadd.f32 %v1100_v34, %v1099_v32  ;;  %v1180_v36 = vpop.f32.mrb[1].mxu1 }
 0x100   : > { %v1181_v37 = vadd.f32 %v1180_v36, %v1179_v33 }
 0x101   : > { %v1102_v39 = vpop.f32.mrb[2].mxu0 }
 0x102   : > { %v684_v40 = vadd.f32 %v1181_v37, %v1101_v35  ;;  %v1182_v41 = vpop.f32.mrb[2].mxu1  ;;  %v1103_v42 = vpop.f32.mrb[3].mxu0 }
 0x103   : > { %v1104_v44 = vadd.f32 %v1103_v42, %v1102_v39  ;;  %v1183_v45 = vpop.f32.mrb[3].mxu1 }
 0x104   : > { %v820_v46 = vmul.f32 %v1662_v38, %v684_v40  ;;  %v1184_v47 = vadd.f32 %v1183_v45, %v1182_v41 }
 0x105   : > { %v1105_v48 = vpop.f32.mrb[4].mxu0 }
 0x106   : > { %v843_v49 = vadd.f32 %v1667_v43, %v820_v46  ;;  %v689_v50 = vadd.f32 %v1184_v47, %v1104_v44  ;;  %v1185_v51 = vpop.f32.mrb[4].mxu1  ;;  %v1106_v52 = vpop.f32.mrb[5].mxu0 }
 0x107   : > { %v1107_v53 = vadd.f32 %v1106_v52, %v1105_v48  ;;  %v1186_v54 = vpop.f32.mrb[5].mxu1 }
 0x108   : > { %vm859_vm0 = vcmp.ge.f32.partialorder %v843_v49, 0.0  ;;  %v875_v55 = vmul.f32 0.2, %v843_v49  ;;  %v821_v56 = vmul.f32 %v1662_v38, %v689_v50  ;;  %v1187_v57 = vadd.f32 %v1186_v54, %v1185_v51 }
 0x109   : > { %v1108_v58 = vpop.f32.mrb[6].mxu0 }
 0x10a   : > { %v891_v59 = vsel %vm859_vm0, %v843_v49, %v875_v55  ;;  %v844_v60 = vadd.f32 %v1667_v43, %v821_v56  ;;  %v694_v61 = vadd.f32 %v1187_v57, %v1107_v53  ;;  %v1188_v62 = vpop.f32.mrb[6].mxu1  ;;  %v1109_v63 = vpop.f32.mrb[7].mxu0 }
 0x10b   : > { %907 = vst [vmem:[%s1675_s5] sm:$0xff] %v891_v59  ;;  %v1110_v0 = vadd.f32 %v1109_v63, %v1108_v58  ;;  %v1189_v1 = vpop.f32.mrb[7].mxu1 }
 0x10c   : > { %vm860_vm1 = vcmp.ge.f32.partialorder %v844_v60, 0.0  ;;  %v876_v2 = vmul.f32 0.2, %v844_v60  ;;  %v822_v3 = vmul.f32 %v1662_v38, %v694_v61  ;;  %v1190_v4 = vadd.f32 %v1189_v1, %v1188_v62 }
 0x10d   : > { %v1111_v5 = vpop.f32.mrb[8].mxu0 }
 0x10e   : > { %v892_v6 = vsel %vm860_vm1, %v844_v60, %v876_v2  ;;  %v845_v7 = vadd.f32 %v1667_v43, %v822_v3  ;;  %v699_v8 = vadd.f32 %v1190_v4, %v1110_v0  ;;  %v1191_v9 = vpop.f32.mrb[8].mxu1  ;;  %v1112_v10 = vpop.f32.mrb[9].mxu0 }
 0x10f   : > { %908 = vst [vmem:[%s1675_s5 + $0x8] sm:$0xff] %v892_v6  ;;  %v1113_v11 = vadd.f32 %v1112_v10, %v1111_v5  ;;  %v1192_v12 = vpop.f32.mrb[9].mxu1 }
 0x110   : > { %vm861_vm2 = vcmp.ge.f32.partialorder %v845_v7, 0.0  ;;  %v877_v13 = vmul.f32 0.2, %v845_v7  ;;  %v823_v14 = vmul.f32 %v1662_v38, %v699_v8  ;;  %v1193_v15 = vadd.f32 %v1192_v12, %v1191_v9 }
 0x111   : > { %v1114_v16 = vpop.f32.mrb[10].mxu0 }
 0x112   : > { %v893_v17 = vsel %vm861_vm2, %v845_v7, %v877_v13  ;;  %v846_v18 = vadd.f32 %v1667_v43, %v823_v14  ;;  %v704_v19 = vadd.f32 %v1193_v15, %v1113_v11  ;;  %v1194_v20 = vpop.f32.mrb[10].mxu1  ;;  %v1115_v21 = vpop.f32.mrb[11].mxu0 }
 0x113   : > { %909 = vst [vmem:[%s1675_s5 + $0x10] sm:$0xff] %v893_v17  ;;  %v1116_v22 = vadd.f32 %v1115_v21, %v1114_v16  ;;  %v1195_v23 = vpop.f32.mrb[11].mxu1 }
 0x114   : > { %vm862_vm3 = vcmp.ge.f32.partialorder %v846_v18, 0.0  ;;  %v878_v24 = vmul.f32 0.2, %v846_v18  ;;  %v824_v25 = vmul.f32 %v1662_v38, %v704_v19  ;;  %v1196_v26 = vadd.f32 %v1195_v23, %v1194_v20 }
 0x115   : > { %v1117_v27 = vpop.f32.mrb[12].mxu0 }
 0x116   : > { %v894_v28 = vsel %vm862_vm3, %v846_v18, %v878_v24  ;;  %v847_v29 = vadd.f32 %v1667_v43, %v824_v25  ;;  %v709_v30 = vadd.f32 %v1196_v26, %v1116_v22  ;;  %v1197_v31 = vpop.f32.mrb[12].mxu1  ;;  %v1118_v32 = vpop.f32.mrb[13].mxu0 }
 0x117   : > { %910 = vst [vmem:[%s1675_s5 + $0x18] sm:$0xff] %v894_v28  ;;  %v1119_v33 = vadd.f32 %v1118_v32, %v1117_v27  ;;  %v1198_v34 = vpop.f32.mrb[13].mxu1 }
 0x118   : > { %vm863_vm4 = vcmp.ge.f32.partialorder %v847_v29, 0.0  ;;  %v879_v35 = vmul.f32 0.2, %v847_v29  ;;  %v825_v36 = vmul.f32 %v1662_v38, %v709_v30  ;;  %v1199_v37 = vadd.f32 %v1198_v34, %v1197_v31 }
 0x119   : > { %v1120_v39 = vpop.f32.mrb[14].mxu0 }
 0x11a   : > { %v895_v40 = vsel %vm863_vm4, %v847_v29, %v879_v35  ;;  %v848_v41 = vadd.f32 %v1667_v43, %v825_v36  ;;  %v714_v42 = vadd.f32 %v1199_v37, %v1119_v33  ;;  %v1200_v44 = vpop.f32.mrb[14].mxu1  ;;  %v1121_v45 = vpop.f32.mrb[15].mxu0 }
 0x11b   : > { %911 = vst [vmem:[%s1675_s5 + $0x20] sm:$0xff] %v895_v40  ;;  %v1122_v46 = vadd.f32 %v1121_v45, %v1120_v39  ;;  %v1201_v47 = vpop.f32.mrb[15].mxu1 }
 0x11c   : > { %vm864_vm5 = vcmp.ge.f32.partialorder %v848_v41, 0.0  ;;  %v880_v48 = vmul.f32 0.2, %v848_v41  ;;  %v826_v49 = vmul.f32 %v1662_v38, %v714_v42  ;;  %v1202_v50 = vadd.f32 %v1201_v47, %v1200_v44 }
 0x11d   : > { %v1123_v51 = vpop.f32.mrb[16].mxu0 }
 0x11e   : > { %v896_v52 = vsel %vm864_vm5, %v848_v41, %v880_v48  ;;  %v849_v53 = vadd.f32 %v1667_v43, %v826_v49  ;;  %v719_v54 = vadd.f32 %v1202_v50, %v1122_v46  ;;  %v1203_v55 = vpop.f32.mrb[16].mxu1  ;;  %v1124_v56 = vpop.f32.mrb[17].mxu0 }
 0x11f   : > { %912 = vst [vmem:[%s1675_s5 + $0x28] sm:$0xff] %v896_v52  ;;  %v1125_v57 = vadd.f32 %v1124_v56, %v1123_v51  ;;  %v1204_v58 = vpop.f32.mrb[17].mxu1 }
 0x120   : > { %vm865_vm6 = vcmp.ge.f32.partialorder %v849_v53, 0.0  ;;  %v881_v59 = vmul.f32 0.2, %v849_v53  ;;  %v827_v60 = vmul.f32 %v1662_v38, %v719_v54  ;;  %v1205_v61 = vadd.f32 %v1204_v58, %v1203_v55 }
 0x121   : > { %v1126_v62 = vpop.f32.mrb[18].mxu0 }
 0x122   : > { %v897_v63 = vsel %vm865_vm6, %v849_v53, %v881_v59  ;;  %v850_v0 = vadd.f32 %v1667_v43, %v827_v60  ;;  %v724_v1 = vadd.f32 %v1205_v61, %v1125_v57  ;;  %v1206_v2 = vpop.f32.mrb[18].mxu1  ;;  %v1127_v3 = vpop.f32.mrb[19].mxu0 }
 0x123   : > { %913 = vst [vmem:[%s1675_s5 + $0x30] sm:$0xff] %v897_v63  ;;  %v1128_v4 = vadd.f32 %v1127_v3, %v1126_v62  ;;  %v1207_v5 = vpop.f32.mrb[19].mxu1 }
 0x124   : > { %vm866_vm7 = vcmp.ge.f32.partialorder %v850_v0, 0.0  ;;  %v882_v6 = vmul.f32 0.2, %v850_v0  ;;  %v828_v7 = vmul.f32 %v1662_v38, %v724_v1  ;;  %v1208_v8 = vadd.f32 %v1207_v5, %v1206_v2 }
 0x125   : > { %v1129_v9 = vpop.f32.mrb[20].mxu0 }
 0x126   : > { %v898_v10 = vsel %vm866_vm7, %v850_v0, %v882_v6  ;;  %v851_v11 = vadd.f32 %v1667_v43, %v828_v7  ;;  %v729_v12 = vadd.f32 %v1208_v8, %v1128_v4  ;;  %v1209_v13 = vpop.f32.mrb[20].mxu1  ;;  %v1130_v14 = vpop.f32.mrb[21].mxu0 }
 0x127   : > { %914 = vst [vmem:[%s1675_s5 + $0x38] sm:$0xff] %v898_v10  ;;  %v1131_v15 = vadd.f32 %v1130_v14, %v1129_v9  ;;  %v1210_v16 = vpop.f32.mrb[21].mxu1 }
 0x128   : > { %vm867_vm8 = vcmp.ge.f32.partialorder %v851_v11, 0.0  ;;  %v883_v17 = vmul.f32 0.2, %v851_v11  ;;  %v829_v18 = vmul.f32 %v1662_v38, %v729_v12  ;;  %v1211_v19 = vadd.f32 %v1210_v16, %v1209_v13 }
 0x129   : > { %v1132_v20 = vpop.f32.mrb[22].mxu0 }
 0x12a   : > { %v899_v21 = vsel %vm867_vm8, %v851_v11, %v883_v17  ;;  %v852_v22 = vadd.f32 %v1667_v43, %v829_v18  ;;  %v734_v23 = vadd.f32 %v1211_v19, %v1131_v15  ;;  %v1212_v24 = vpop.f32.mrb[22].mxu1  ;;  %v1133_v25 = vpop.f32.mrb[23].mxu0 }
 0x12b   : > { %915 = vst [vmem:[%s1675_s5 + $0x40] sm:$0xff] %v899_v21  ;;  %v1134_v26 = vadd.f32 %v1133_v25, %v1132_v20  ;;  %v1213_v27 = vpop.f32.mrb[23].mxu1 }
 0x12c   : > { %vm868_vm9 = vcmp.ge.f32.partialorder %v852_v22, 0.0  ;;  %v884_v28 = vmul.f32 0.2, %v852_v22  ;;  %v830_v29 = vmul.f32 %v1662_v38, %v734_v23  ;;  %v1214_v30 = vadd.f32 %v1213_v27, %v1212_v24 }
 0x12d   : > { %v1135_v31 = vpop.f32.mrb[24].mxu0 }
 0x12e   : > { %v900_v32 = vsel %vm868_vm9, %v852_v22, %v884_v28  ;;  %v853_v33 = vadd.f32 %v1667_v43, %v830_v29  ;;  %v739_v34 = vadd.f32 %v1214_v30, %v1134_v26  ;;  %v1215_v35 = vpop.f32.mrb[24].mxu1  ;;  %v1136_v36 = vpop.f32.mrb[25].mxu0 }
 0x12f   : > { %916 = vst [vmem:[%s1675_s5 + $0x48] sm:$0xff] %v900_v32  ;;  %v1137_v37 = vadd.f32 %v1136_v36, %v1135_v31  ;;  %v1216_v39 = vpop.f32.mrb[25].mxu1 }
 0x130   : > { %vm869_vm10 = vcmp.ge.f32.partialorder %v853_v33, 0.0  ;;  %v885_v40 = vmul.f32 0.2, %v853_v33  ;;  %v831_v41 = vmul.f32 %v1662_v38, %v739_v34  ;;  %v1217_v42 = vadd.f32 %v1216_v39, %v1215_v35 }
 0x131   : > { %v1138_v44 = vpop.f32.mrb[26].mxu0 }
 0x132   : > { %v901_v45 = vsel %vm869_vm10, %v853_v33, %v885_v40  ;;  %v854_v46 = vadd.f32 %v1667_v43, %v831_v41  ;;  %v744_v47 = vadd.f32 %v1217_v42, %v1137_v37  ;;  %v1218_v48 = vpop.f32.mrb[26].mxu1  ;;  %v1139_v49 = vpop.f32.mrb[27].mxu0 }
 0x133   : > { %917 = vst [vmem:[%s1675_s5 + $0x50] sm:$0xff] %v901_v45  ;;  %v1140_v50 = vadd.f32 %v1139_v49, %v1138_v44  ;;  %v1219_v51 = vpop.f32.mrb[27].mxu1 }
 0x134   : > { %vm870_vm11 = vcmp.ge.f32.partialorder %v854_v46, 0.0  ;;  %v886_v52 = vmul.f32 0.2, %v854_v46  ;;  %v832_v53 = vmul.f32 %v1662_v38, %v744_v47  ;;  %v1220_v54 = vadd.f32 %v1219_v51, %v1218_v48 }
 0x135   : > { %v1141_v55 = vpop.f32.mrb[28].mxu0 }
 0x136   : > { %v902_v56 = vsel %vm870_vm11, %v854_v46, %v886_v52  ;;  %v855_v57 = vadd.f32 %v1667_v43, %v832_v53  ;;  %v749_v58 = vadd.f32 %v1220_v54, %v1140_v50  ;;  %v1221_v59 = vpop.f32.mrb[28].mxu1  ;;  %v1142_v60 = vpop.f32.mrb[29].mxu0 }
 0x137   : > { %918 = vst [vmem:[%s1675_s5 + $0x58] sm:$0xff] %v902_v56  ;;  %v1143_v61 = vadd.f32 %v1142_v60, %v1141_v55  ;;  %v1222_v62 = vpop.f32.mrb[29].mxu1 }
 0x138   : > { %vm871_vm12 = vcmp.ge.f32.partialorder %v855_v57, 0.0  ;;  %v887_v63 = vmul.f32 0.2, %v855_v57  ;;  %v833_v0 = vmul.f32 %v1662_v38, %v749_v58  ;;  %v1223_v1 = vadd.f32 %v1222_v62, %v1221_v59 }
 0x139   : > { %v1144_v2 = vpop.f32.mrb[30].mxu0 }
 0x13a   : > { %v903_v3 = vsel %vm871_vm12, %v855_v57, %v887_v63  ;;  %v856_v4 = vadd.f32 %v1667_v43, %v833_v0  ;;  %v754_v5 = vadd.f32 %v1223_v1, %v1143_v61  ;;  %v1224_v6 = vpop.f32.mrb[30].mxu1  ;;  %v1145_v7 = vpop.f32.mrb[31].mxu0 }
 0x13b   : > { %919 = vst [vmem:[%s1675_s5 + $0x60] sm:$0xff] %v903_v3  ;;  %v1146_v8 = vadd.f32 %v1145_v7, %v1144_v2  ;;  %v1225_v9 = vpop.f32.mrb[31].mxu1 }
 0x13c   : > { %vm872_vm13 = vcmp.ge.f32.partialorder %v856_v4, 0.0  ;;  %v888_v10 = vmul.f32 0.2, %v856_v4  ;;  %v834_v11 = vmul.f32 %v1662_v38, %v754_v5  ;;  %v1226_v12 = vadd.f32 %v1225_v9, %v1224_v6 }
 0x13e   : > { %v904_v13 = vsel %vm872_vm13, %v856_v4, %v888_v10  ;;  %v857_v14 = vadd.f32 %v1667_v43, %v834_v11  ;;  %v759_v15 = vadd.f32 %v1226_v12, %v1146_v8 }
 0x13f   : > { %920 = vst [vmem:[%s1675_s5 + $0x68] sm:$0xff] %v904_v13 }
 0x140   : > { %vm873_vm14 = vcmp.ge.f32.partialorder %v857_v14, 0.0  ;;  %v889_v16 = vmul.f32 0.2, %v857_v14  ;;  %v835_v17 = vmul.f32 %v1662_v38, %v759_v15 }
 0x142   : > { %v905_v18 = vsel %vm873_vm14, %v857_v14, %v889_v16  ;;  %v858_v19 = vadd.f32 %v1667_v43, %v835_v17 }
 0x143   : > { %921 = vst [vmem:[%s1675_s5 + $0x70] sm:$0xff] %v905_v18 }
 0x144   : > { %vm874_vm15 = vcmp.ge.f32.partialorder %v858_v19, 0.0  ;;  %v890_v20 = vmul.f32 0.2, %v858_v19 }
 0x146   : > { %v906_v21 = vsel %vm874_vm15, %v858_v19, %v890_v20 }
 0x147   : > { %922 = vst [vmem:[%s1675_s5 + $0x78] sm:$0xff] %v906_v21 }
 0x148 PF: > { %s14_s17 = sadd.s32 1, %s1337_s17   ;;  %s1738_s15 = smov %s1333_s16 }
 0x149   : > { %p11_p5 = scmp.ge.s32.totalorder %s14_s17, 4   ;;  %s1739_s16 = smov %s1741_s18 }
 0x14b   :  { %13 = sbr.rel (!%p11_p5) target bundleno = 2 (0x2), region = 83 }

// kernel: forward.7
= control target key start
LH: loop header
LB: loop body
LE: loop exit
PB: predicated region body
PF: predicated region fallthrough
CT: control target
= control target key end

     0   :  { %s1102_s15 = smov 0   ;;  %s1104_s16 = smov 0   ;;  %s1322_s0 = inlined_call_operand.vmem [shape: f32[40,1024], index: 0, kind: input, shape index: {}]   ;;  %s1323_s1 = inlined_call_operand.vmem [shape: f32[1024,128], index: 1, kind: input, shape index: {}]   ;;  %s1324_s2 = inlined_call_operand.vmem [shape: f32[1,128], index: 2, kind: input, shape index: {}]   ;;  %s1325_s3 = inlined_call_operand.vmem [shape: f32[1,128], index: 3, kind: input, shape index: {}]   ;;  %s1326_s4 = inlined_call_operand.vmem [shape: f32[40,128], index: 4, kind: output, shape index: {}]  }
   0x1   :  { %s1106_s17 = smov 0   ;;  %s1108_s18 = smov 0  }
   0x2   :  { %s1110_s19 = smov 0  }
   0x3 LB: > { %s26_s20 = sadd.s32 1, %s1070_s18  ;;  %p49_p1 = scmp.ne.s32.totalorder %s1062_s16, %s1058_s15  ;;  %s1074_s19 = sphi %s1110_s19, %s14_s19   ;;  %s1070_s18 = sphi %s1108_s18, %s1330_s18   ;;  %s1066_s17 = sphi %s1106_s17, %s1329_s17   ;;  %s1062_s16 = sphi %s1104_s16, %s1328_s16   ;;  %s1058_s15 = sphi %s1102_s15, %s1327_s15  }
   0x4   : > { %p27_p0 = scmp.ge.s32.totalorder %s26_s20, 2  ;;  %p50_p2 = scmp.eq.s32.totalorder %s1074_s19, 0 }
   0x5   : > { %s42_s22 = sadd.s32 1, %s1062_s16  ;;  %p820_p5 = scmp.ge.s32.totalorder %s1074_s19, 2 }
   0x6   : > { %s1332_s20 = smov (%p27_p0, %s26_s20), 0  ;;  %p51_p3 = por %p50_p2, %p49_p1 }
   0x7   : > { %s38_s21 = ssub.s32 %s1070_s18, %s1332_s20  ;;  %195 = sbr.rel (%p820_p5) target bundleno = 29 (0x1d), region = 24 }
   0x8   : > { %p40_p4 = scmp.eq.s32.totalorder %s38_s21, 0 }
   0xa   : > { %s1137_s23 = scalar_select %p40_p4, %s1062_s16, %s42_s22  }
   0xe   : > { %198 = sbr.rel (!%p51_p3) target bundleno = 29 (0x1d), region = 28  ;;  %s200_s24 = sand.u32 (%p51_p3), 1, %s1062_s16  }
   0xf   : > { %s834_s25 = sshll.u32 (%p51_p3), %s1070_s18, 5  ;;  %s993_s26 = smul.u32 (%p51_p3), 160, %s200_s24 }
  0x10   : > { %s1145_s29 = scalar_lea.vmem (%p51_p3), %s1322_s0, %s834_s25 }
  0x11   : > { %v221_v0 = vld [vmem:[%s1145_s29] sm:$0xff] (%p51_p3)  ;;  %v223_v1 = vld [vmem:[%s1145_s29 + $0x8] sm:$0xff] (%p51_p3)  ;;  %v225_v2 = vld [vmem:[%s1145_s29 + $0x10] sm:$0xff] (%p51_p3)  ;;  %s1153_s30 = scalar_lea.vmem (%p51_p3), [#allocation3], %s993_s26 }
  0x12   : > { %v227_v3 = vld [vmem:[%s1145_s29 + $0x18] sm:$0xff] (%p51_p3)  ;;  %v229_v4 = vld [vmem:[%s1145_s29 + $0x40] sm:$0xff] (%p51_p3)  ;;  %v231_v5 = vld [vmem:[%s1145_s29 + $0x48] sm:$0xff] (%p51_p3)  ;;  %222 = vst [vmem:[%s1153_s30] sm:$0xff] (%p51_p3), %v221_v0 }
  0x13   : > { %224 = vst [vmem:[%s1153_s30 + $0x8] sm:$0xff] (%p51_p3), %v223_v1  ;;  %226 = vst [vmem:[%s1153_s30 + $0x10] sm:$0xff] (%p51_p3), %v225_v2  ;;  %v233_v6 = vld [vmem:[%s1145_s29 + $0x50] sm:$0xff] (%p51_p3)  ;;  %v235_v7 = vld [vmem:[%s1145_s29 + $0x58] sm:$0xff] (%p51_p3) }
  0x14   : > { %228 = vst [vmem:[%s1153_s30 + $0x18] sm:$0xff] (%p51_p3), %v227_v3  ;;  %230 = vst [vmem:[%s1153_s30 + $0x20] sm:$0xff] (%p51_p3), %v229_v4  ;;  %v237_v8 = vld [vmem:[%s1145_s29 + $0x80] sm:$0xff] (%p51_p3)  ;;  %v239_v9 = vld [vmem:[%s1145_s29 + $0x88] sm:$0xff] (%p51_p3) }
  0x15   : > { %232 = vst [vmem:[%s1153_s30 + $0x28] sm:$0xff] %v231_v5  ;;  %234 = vst [vmem:[%s1153_s30 + $0x30] sm:$0xff] %v233_v6  ;;  %v241_v10 = vld [vmem:[%s1145_s29 + $0x90] sm:$0xff]  ;;  %v243_v11 = vld [vmem:[%s1145_s29 + $0x98] sm:$0xff] }
  0x16   : > { %236 = vst [vmem:[%s1153_s30 + $0x38] sm:$0xff] %v235_v7  ;;  %238 = vst [vmem:[%s1153_s30 + $0x40] sm:$0xff] %v237_v8  ;;  %v245_v12 = vld [vmem:[%s1145_s29 + $0xc0] sm:$0xff]  ;;  %v247_v13 = vld [vmem:[%s1145_s29 + $0xc8] sm:$0xff] }
  0x17   : > { %240 = vst [vmem:[%s1153_s30 + $0x48] sm:$0xff] %v239_v9  ;;  %242 = vst [vmem:[%s1153_s30 + $0x50] sm:$0xff] %v241_v10  ;;  %v249_v14 = vld [vmem:[%s1145_s29 + $0xd0] sm:$0xff]  ;;  %v251_v15 = vld [vmem:[%s1145_s29 + $0xd8] sm:$0xff] }
  0x18   : > { %244 = vst [vmem:[%s1153_s30 + $0x58] sm:$0xff] %v243_v11  ;;  %246 = vst [vmem:[%s1153_s30 + $0x60] sm:$0xff] %v245_v12  ;;  %v253_v16 = vld [vmem:[%s1145_s29 + $0x100] sm:$0xff]  ;;  %v255_v17 = vld [vmem:[%s1145_s29 + $0x108] sm:$0xff] }
  0x19   : > { %248 = vst [vmem:[%s1153_s30 + $0x68] sm:$0xff] %v247_v13  ;;  %250 = vst [vmem:[%s1153_s30 + $0x70] sm:$0xff] %v249_v14  ;;  %v257_v18 = vld [vmem:[%s1145_s29 + $0x110] sm:$0xff]  ;;  %v259_v19 = vld [vmem:[%s1145_s29 + $0x118] sm:$0xff] }
  0x1a   : > { %252 = vst [vmem:[%s1153_s30 + $0x78] sm:$0xff] %v251_v15  ;;  %254 = vst [vmem:[%s1153_s30 + $0x80] sm:$0xff] %v253_v16 }
  0x1b   : > { %256 = vst [vmem:[%s1153_s30 + $0x88] sm:$0xff] %v255_v17  ;;  %258 = vst [vmem:[%s1153_s30 + $0x90] sm:$0xff] %v257_v18 }
  0x1c   : > { %260 = vst [vmem:[%s1153_s30 + $0x98] sm:$0xff] %v259_v19 }
  0x1d PF: > { %p823_p6 = scmp.ge.s32.totalorder %s1074_s19, 1  ;;  %p277_p7 = scmp.lt.s32.totalorder %s1074_s19, 3 }
  0x1f   : > { %p278_p8 = pnand %p823_p6, %p277_p7 }
  0x20   : > { %s284_s5 = sand.u32 (!%p278_p8), 1, %s1058_s15   ;;  %s824_s6 = sshll.u32 (!%p278_p8), %s1066_s17, 6 }
  0x21   : > { %281 = sbr.rel (%p278_p8) target bundleno = 335 (0x14f), region = 55  ;;  %p329_p9 = scmp.lt.s32.totalorder (!%p278_p8), %s824_s6, 127 }
  0x22   : > { %s994_s7 = smul.u32 (!%p278_p8), 160, %s284_s5  ;;  %p826_p10 = scmp.ne.s32.totalorder (!%p278_p8), %s1066_s17, 0 }
  0x24   : > { %s1198_s12 = scalar_lea.vmem (!%p278_p8), [#allocation3], %s994_s7 }
  0x28   : > { %s1334_s6 = smov (!%p329_p9, %s824_s6), 127  ;;  %355 = sbr.rel (%p826_p10) target bundleno = 47 (0x2f), region = 63 }
  0x29   : > { %s825_s8 = sshll.u32 %s1334_s6, 3  ;;  %v1076_v20 = vmov (!%p826_p10), 0.0  }
  0x2a   : > { %s1196_s11 = scalar_lea.vmem %s1323_s1, %s825_s8  ;;  %356 = vst [vmem:[#allocation2] sm:$0xff] (!%p826_p10), %v1076_v20  ;;  %357 = vst [vmem:[#allocation2 + $0x8] sm:$0xff] (!%p826_p10), %v1076_v20 }
  0x2b   : > { %358 = vst [vmem:[#allocation2 + $0x10] sm:$0xff] (!%p826_p10), %v1076_v20  ;;  %359 = vst [vmem:[#allocation2 + $0x18] sm:$0xff] (!%p826_p10), %v1076_v20 }
  0x2c   : > { %360 = vst [vmem:[#allocation2 + $0x20] sm:$0xff] (!%p826_p10), %v1076_v20 }
  0x2f PF: > { %v402_v21 = vld [vmem:[%s1196_s11 + $0x80] sm:$0xff]  ;;  %v403_v22 = vld [vmem:[%s1196_s11 + $0x88] sm:$0xff]  ;;  %v404_v32 = vld [vmem:[%s1196_s11 + $0x90] sm:$0xff]  ;;  %p827_p11 = scmp.ne.s32.totalorder %s1066_s17, 1 }
  0x30   : > { %v434_v23 = vld [vmem:[%s1196_s11 + $0x180] sm:$0xff]  ;;  %v929_v24 = vpack.c.bf16 %v403_v22, %v402_v21  ;;  %v435_v25 = vld [vmem:[%s1196_s11 + $0x188] sm:$0xff]  ;;  %v405_v34 = vld [vmem:[%s1196_s11 + $0x98] sm:$0xff] }
  0x31   : > { %v386_v26 = vld [vmem:[%s1196_s11] sm:$0xff]  ;;  %v387_v27 = vld [vmem:[%s1196_s11 + $0x8] sm:$0xff]  ;;  %v961_v28 = vpack.c.bf16 %v435_v25, %v434_v23  ;;  %v436_v35 = vld [vmem:[%s1196_s11 + $0x190] sm:$0xff]  ;;  %v933_v37 = vpack.c.bf16 %v405_v34, %v404_v32 }
  0x32   : > { %v931_v29 = vpack.c.bf16 %v387_v27, %v386_v26  ;;  %v418_v30 = vld [vmem:[%s1196_s11 + $0x100] sm:$0xff]  ;;  %v419_v31 = vld [vmem:[%s1196_s11 + $0x108] sm:$0xff]  ;;  %930 = vmatprep.subr.bf16.mxu0 %v929_v24  ;;  %v437_v36 = vld [vmem:[%s1196_s11 + $0x198] sm:$0xff] }
  0x33   : > { %v963_v33 = vpack.c.bf16 %v419_v31, %v418_v30  ;;  %962 = vmatprep.subr.bf16.mxu1 %v961_v28  ;;  %v965_v38 = vpack.c.bf16 %v437_v36, %v436_v35  ;;  %v388_v39 = vld [vmem:[%s1196_s11 + $0x10] sm:$0xff]  ;;  %v389_v40 = vld [vmem:[%s1196_s11 + $0x18] sm:$0xff]  ;;  %v406_v44 = vld [vmem:[%s1196_s11 + $0xa0] sm:$0xff] }
  0x34   : > { %932 = vmatpush3.bf16.msra.mxu0 %v931_v29  ;;  %v420_v41 = vld [vmem:[%s1196_s11 + $0x110] sm:$0xff]  ;;  %v935_v42 = vpack.c.bf16 %v389_v40, %v388_v39  ;;  %v421_v43 = vld [vmem:[%s1196_s11 + $0x118] sm:$0xff]  ;;  %v407_v45 = vld [vmem:[%s1196_s11 + $0xa8] sm:$0xff] }
  0x35   : > { %964 = vmatpush3.bf16.msra.mxu1 %v963_v33  ;;  %934 = vmatprep.subr.bf16.mxu0 %v933_v37  ;;  %v967_v46 = vpack.c.bf16 %v421_v43, %v420_v41  ;;  %v937_v47 = vpack.c.bf16 %v407_v45, %v406_v44  ;;  %v438_v48 = vld [vmem:[%s1196_s11 + $0x1a0] sm:$0xff]  ;;  %v439_v49 = vld [vmem:[%s1196_s11 + $0x1a8] sm:$0xff]  ;;  %v408_v56 = vld [vmem:[%s1196_s11 + $0xb0] sm:$0xff] }
  0x36   : > { %966 = vmatprep.subr.bf16.mxu1 %v965_v38  ;;  %v390_v50 = vld [vmem:[%s1196_s11 + $0x20] sm:$0xff]  ;;  %v969_v51 = vpack.c.bf16 %v439_v49, %v438_v48  ;;  %v391_v52 = vld [vmem:[%s1196_s11 + $0x28] sm:$0xff]  ;;  %v409_v57 = vld [vmem:[%s1196_s11 + $0xb8] sm:$0xff] }
  0x37   : > { %v422_v53 = vld [vmem:[%s1196_s11 + $0x120] sm:$0xff]  ;;  %v423_v54 = vld [vmem:[%s1196_s11 + $0x128] sm:$0xff]  ;;  %v939_v55 = vpack.c.bf16 %v391_v52, %v390_v50  ;;  %v440_v58 = vld [vmem:[%s1196_s11 + $0x1b0] sm:$0xff]  ;;  %v941_v60 = vpack.c.bf16 %v409_v57, %v408_v56 }
  0x38   : > { %936 = vmatpush3.bf16.msra.mxu0 %v935_v42  ;;  %v971_v59 = vpack.c.bf16 %v423_v54, %v422_v53  ;;  %v441_v61 = vld [vmem:[%s1196_s11 + $0x1b8] sm:$0xff]  ;;  %v392_v62 = vld [vmem:[%s1196_s11 + $0x30] sm:$0xff]  ;;  %v410_v3 = vld [vmem:[%s1196_s11 + $0xc0] sm:$0xff] }
  0x39   : > { %968 = vmatpush3.bf16.msra.mxu1 %v967_v46  ;;  %938 = vmatprep.subr.bf16.mxu0 %v937_v47  ;;  %v393_v63 = vld [vmem:[%s1196_s11 + $0x38] sm:$0xff]  ;;  %v973_v0 = vpack.c.bf16 %v441_v61, %v440_v58  ;;  %v424_v1 = vld [vmem:[%s1196_s11 + $0x130] sm:$0xff]  ;;  %v411_v4 = vld [vmem:[%s1196_s11 + $0xc8] sm:$0xff] }
  0x3a   : > { %970 = vmatprep.subr.bf16.mxu1 %v969_v51  ;;  %v425_v2 = vld [vmem:[%s1196_s11 + $0x138] sm:$0xff]  ;;  %v442_v5 = vld [vmem:[%s1196_s11 + $0x1c0] sm:$0xff]  ;;  %v443_v6 = vld [vmem:[%s1196_s11 + $0x1c8] sm:$0xff]  ;;  %v943_v7 = vpack.c.bf16 %v393_v63, %v392_v62  ;;  %v945_v9 = vpack.c.bf16 %v411_v4, %v410_v3 }
  0x3b   : > { %v975_v8 = vpack.c.bf16 %v425_v2, %v424_v1  ;;  %v394_v10 = vld [vmem:[%s1196_s11 + $0x40] sm:$0xff]  ;;  %v395_v11 = vld [vmem:[%s1196_s11 + $0x48] sm:$0xff]  ;;  %v977_v13 = vpack.c.bf16 %v443_v6, %v442_v5  ;;  %v412_v15 = vld [vmem:[%s1196_s11 + $0xd0] sm:$0xff] }
  0x3c   : > { %940 = vmatpush3.bf16.msra.mxu0 %v939_v55  ;;  %v426_v12 = vld [vmem:[%s1196_s11 + $0x140] sm:$0xff]  ;;  %v427_v14 = vld [vmem:[%s1196_s11 + $0x148] sm:$0xff]  ;;  %v413_v16 = vld [vmem:[%s1196_s11 + $0xd8] sm:$0xff]  ;;  %v947_v19 = vpack.c.bf16 %v395_v11, %v394_v10 }
  0x3d   : > { %972 = vmatpush3.bf16.msra.mxu1 %v971_v59  ;;  %942 = vmatprep.subr.bf16.mxu0 %v941_v60  ;;  %v444_v17 = vld [vmem:[%s1196_s11 + $0x1d0] sm:$0xff]  ;;  %v445_v18 = vld [vmem:[%s1196_s11 + $0x1d8] sm:$0xff]  ;;  %v979_v20 = vpack.c.bf16 %v427_v14, %v426_v12  ;;  %v949_v21 = vpack.c.bf16 %v413_v16, %v412_v15  ;;  %v414_v27 = vld [vmem:[%s1196_s11 + $0xe0] sm:$0xff] }
  0x3e   : > { %974 = vmatprep.subr.bf16.mxu1 %v973_v0  ;;  %v396_v22 = vld [vmem:[%s1196_s11 + $0x50] sm:$0xff]  ;;  %v397_v23 = vld [vmem:[%s1196_s11 + $0x58] sm:$0xff]  ;;  %v981_v25 = vpack.c.bf16 %v445_v18, %v444_v17  ;;  %v415_v28 = vld [vmem:[%s1196_s11 + $0xe8] sm:$0xff] }
  0x3f   : > { %v428_v24 = vld [vmem:[%s1196_s11 + $0x150] sm:$0xff]  ;;  %v429_v26 = vld [vmem:[%s1196_s11 + $0x158] sm:$0xff]  ;;  %v446_v29 = vld [vmem:[%s1196_s11 + $0x1e0] sm:$0xff]  ;;  %v951_v31 = vpack.c.bf16 %v397_v23, %v396_v22  ;;  %v953_v35 = vpack.c.bf16 %v415_v28, %v414_v27 }
  0x40   : > { %944 = vmatpush3.bf16.msra.mxu0 %v943_v7  ;;  %v447_v30 = vld [vmem:[%s1196_s11 + $0x1e8] sm:$0xff]  ;;  %v398_v32 = vld [vmem:[%s1196_s11 + $0x60] sm:$0xff]  ;;  %v983_v34 = vpack.c.bf16 %v429_v26, %v428_v24  ;;  %v367_v37 = vld [vmem:[%s1198_s12 + $0x8] sm:$0xff] }
  0x41   : > { %976 = vmatpush3.bf16.msra.mxu1 %v975_v8  ;;  %946 = vmatprep.subr.bf16.mxu0 %v945_v9  ;;  %v399_v33 = vld [vmem:[%s1196_s11 + $0x68] sm:$0xff]  ;;  %v430_v36 = vld [vmem:[%s1196_s11 + $0x160] sm:$0xff]  ;;  %v985_v39 = vpack.c.bf16 %v447_v30, %v446_v29  ;;  %v416_v41 = vld [vmem:[%s1196_s11 + $0xf0] sm:$0xff] }
  0x42   : > { %978 = vmatprep.subr.bf16.mxu1 %v977_v13  ;;  %v369_v38 = vld [vmem:[%s1198_s12 + $0x18] sm:$0xff]  ;;  %v431_v40 = vld [vmem:[%s1196_s11 + $0x168] sm:$0xff]  ;;  %v417_v42 = vld [vmem:[%s1196_s11 + $0xf8] sm:$0xff]  ;;  %514 = vmatprep.mubr.f32.mxu0 %v367_v37  ;;  %v955_v45 = vpack.c.bf16 %v399_v33, %v398_v32 }
  0x43   : > { %v448_v43 = vld [vmem:[%s1196_s11 + $0x1f0] sm:$0xff]  ;;  %v449_v44 = vld [vmem:[%s1196_s11 + $0x1f8] sm:$0xff]  ;;  %604 = vmatprep.mubr.f32.mxu1 %v369_v38  ;;  %v987_v46 = vpack.c.bf16 %v431_v40, %v430_v36  ;;  %v957_v47 = vpack.c.bf16 %v417_v42, %v416_v41  ;;  %v366_v55 = vld [vmem:[%s1198_s12] sm:$0xff] }
  0x44   : > { %948 = vmatpush3.bf16.msra.mxu0 %v947_v19  ;;  %v400_v48 = vld [vmem:[%s1196_s11 + $0x70] sm:$0xff]  ;;  %v401_v49 = vld [vmem:[%s1196_s11 + $0x78] sm:$0xff]  ;;  %v989_v50 = vpack.c.bf16 %v449_v44, %v448_v43  ;;  %v373_v58 = vld [vmem:[%s1198_s12 + $0x38] sm:$0xff] }
  0x45   : > { %980 = vmatpush3.bf16.msra.mxu1 %v979_v20  ;;  %950 = vmatprep.subr.bf16.mxu0 %v949_v21  ;;  %v432_v51 = vld [vmem:[%s1196_s11 + $0x170] sm:$0xff]  ;;  %v433_v52 = vld [vmem:[%s1196_s11 + $0x178] sm:$0xff]  ;;  %v959_v53 = vpack.c.bf16 %v401_v49, %v400_v48  ;;  %v370_v59 = vld [vmem:[%s1198_s12 + $0x20] sm:$0xff] }
  0x46   : > { %982 = vmatprep.subr.bf16.mxu1 %v981_v25  ;;  %v991_v54 = vpack.c.bf16 %v433_v52, %v432_v51  ;;  %v368_v56 = vld [vmem:[%s1198_s12 + $0x10] sm:$0xff]  ;;  %v371_v57 = vld [vmem:[%s1198_s12 + $0x28] sm:$0xff]  ;;  %v377_v62 = vld [vmem:[%s1198_s12 + $0x58] sm:$0xff] }
  0x47   : > { %v372_v60 = vld [vmem:[%s1198_s12 + $0x30] sm:$0xff]  ;;  %v375_v61 = vld [vmem:[%s1198_s12 + $0x48] sm:$0xff]  ;;  %v374_v63 = vld [vmem:[%s1198_s12 + $0x40] sm:$0xff] }
  0x48   : > { %952 = vmatpush3.bf16.msra.mxu0 %v951_v31  ;;  %v376_v0 = vld [vmem:[%s1198_s12 + $0x50] sm:$0xff]  ;;  %v379_v1 = vld [vmem:[%s1198_s12 + $0x68] sm:$0xff]  ;;  %v381_v2 = vld [vmem:[%s1198_s12 + $0x78] sm:$0xff] }
  0x49   : > { %984 = vmatpush3.bf16.msra.mxu1 %v983_v34  ;;  %954 = vmatprep.subr.bf16.mxu0 %v953_v35  ;;  %v378_v3 = vld [vmem:[%s1198_s12 + $0x60] sm:$0xff]  ;;  %v380_v4 = vld [vmem:[%s1198_s12 + $0x70] sm:$0xff]  ;;  %v383_v5 = vld [vmem:[%s1198_s12 + $0x88] sm:$0xff] }
  0x4a   : > { %986 = vmatprep.subr.bf16.mxu1 %v985_v39  ;;  %v385_v6 = vld [vmem:[%s1198_s12 + $0x98] sm:$0xff]  ;;  %v382_v7 = vld [vmem:[%s1198_s12 + $0x80] sm:$0xff]  ;;  %v384_v8 = vld [vmem:[%s1198_s12 + $0x90] sm:$0xff] }
  0x4b   : > { %v361_v15 = vld [vmem:[#allocation2] sm:$0xff]  ;;  %v362_v24 = vld [vmem:[#allocation2 + $0x8] sm:$0xff]  ;;  %v363_v33 = vld [vmem:[#allocation2 + $0x10] sm:$0xff] }
  0x4c   : > { %956 = vmatpush3.bf16.msra.mxu0 %v955_v45  ;;  %v364_v42 = vld [vmem:[#allocation2 + $0x18] sm:$0xff]  ;;  %v365_v51 = vld [vmem:[#allocation2 + $0x20] sm:$0xff] }
  0x4d   : > { %988 = vmatpush3.bf16.msra.mxu1 %v987_v46  ;;  %958 = vmatprep.subr.bf16.mxu0 %v957_v47 }
  0x4e   : > { %990 = vmatprep.subr.bf16.mxu1 %v989_v50 }
  0x50   : > { %960 = vmatpush3.bf16.msra.mxu0 %v959_v53 }
  0x51   : > { %992 = vmatpush3.bf16.msra.mxu1 %v991_v54 }
  0x53   : > { %515 = vmatmul.mubr.f32.vlgmr.msra.gmra.mrb[0].mxu0 %v366_v55  ;;  %v828_v55 = vld [vmem:[%s1324_s2] ss:$0 sm:$0xff] (!%p827_p11) }
  0x54   : > { %605 = vmatmul.mubr.f32.vlgmr.msra.gmra.mrb[0].mxu1 %v368_v56  ;;  %519 = vmatprep.mubr.f32.mxu0 %v371_v57  ;;  %v829_v56 = vld [vmem:[%s1325_s3] ss:$0 sm:$0xff] (!%p827_p11) }
  0x55   : > { %609 = vmatprep.mubr.f32.mxu1 %v373_v58 }
  0x57   : > { %520 = vmatmul.mubr.f32.gmra.mrb[2].mxu0 %v370_v59 }
  0x58   : > { %610 = vmatmul.mubr.f32.gmra.mrb[2].mxu1 %v372_v60  ;;  %524 = vmatprep.mubr.f32.mxu0 %v375_v61 }
  0x59   : > { %614 = vmatprep.mubr.f32.mxu1 %v377_v62 }
  0x5b   : > { %525 = vmatmul.mubr.f32.gmra.mrb[4].mxu0 %v374_v63 }
  0x5c   : > { %615 = vmatmul.mubr.f32.gmra.mrb[4].mxu1 %v376_v0  ;;  %529 = vmatprep.mubr.f32.mxu0 %v379_v1 }
  0x5d   : > { %619 = vmatprep.mubr.f32.mxu1 %v381_v2 }
  0x5f   : > { %530 = vmatmul.mubr.f32.gmra.mrb[6].mxu0 %v378_v3 }
  0x60   : > { %620 = vmatmul.mubr.f32.gmra.mrb[6].mxu1 %v380_v4  ;;  %534 = vmatprep.mubr.f32.mxu0 %v383_v5 }
  0x61   : > { %624 = vmatprep.mubr.f32.mxu1 %v385_v6 }
  0x63   : > { %535 = vmatmul.mubr.f32.gmra.mrb[8].mxu0 %v382_v7 }
  0x64   : > { %625 = vmatmul.mubr.f32.gmra.mrb[8].mxu1 %v384_v8 }
 0x126   : > { %v867_v9 = vpop.f32.mrb[0].mxu0 }
 0x127   : > { %v914_v10 = vpop.f32.mrb[0].mxu1  ;;  %v868_v11 = vpop.f32.mrb[1].mxu0 }
 0x128   : > { %v869_v12 = vadd.f32 %v868_v11, %v867_v9  ;;  %v915_v13 = vpop.f32.mrb[1].mxu1 }
 0x129   : > { %v916_v14 = vadd.f32 %v915_v13, %v914_v10 }
 0x12a   : > { %v870_v16 = vpop.f32.mrb[2].mxu0 }
 0x12b   : > { %v607_v17 = vadd.f32 %v916_v14, %v869_v12  ;;  %v917_v18 = vpop.f32.mrb[2].mxu1  ;;  %v871_v19 = vpop.f32.mrb[3].mxu0 }
 0x12c   : > { %v872_v20 = vadd.f32 %v871_v19, %v870_v16  ;;  %v918_v21 = vpop.f32.mrb[3].mxu1 }
 0x12d   : > { %v630_v22 = vadd.f32 %v607_v17, %v361_v15  ;;  %v919_v23 = vadd.f32 %v918_v21, %v917_v18 }
 0x12e   : > { %v873_v25 = vpop.f32.mrb[4].mxu0 }
 0x12f   : > { %635 = vst [vmem:[#allocation2] sm:$0xff] %v630_v22  ;;  %v612_v26 = vadd.f32 %v919_v23, %v872_v20  ;;  %v920_v27 = vpop.f32.mrb[4].mxu1  ;;  %v874_v28 = vpop.f32.mrb[5].mxu0 }
 0x130   : > { %v875_v29 = vadd.f32 %v874_v28, %v873_v25  ;;  %v921_v30 = vpop.f32.mrb[5].mxu1 }
 0x131   : > { %v631_v31 = vadd.f32 %v612_v26, %v362_v24  ;;  %v922_v32 = vadd.f32 %v921_v30, %v920_v27 }
 0x132   : > { %v876_v34 = vpop.f32.mrb[6].mxu0 }
 0x133   : > { %636 = vst [vmem:[#allocation2 + $0x8] sm:$0xff] %v631_v31  ;;  %v617_v35 = vadd.f32 %v922_v32, %v875_v29  ;;  %v923_v36 = vpop.f32.mrb[6].mxu1  ;;  %v877_v37 = vpop.f32.mrb[7].mxu0 }
 0x134   : > { %v878_v38 = vadd.f32 %v877_v37, %v876_v34  ;;  %v924_v39 = vpop.f32.mrb[7].mxu1 }
 0x135   : > { %v632_v40 = vadd.f32 %v617_v35, %v363_v33  ;;  %v925_v41 = vadd.f32 %v924_v39, %v923_v36 }
 0x136   : > { %v879_v43 = vpop.f32.mrb[8].mxu0  ;;  %v644_v54 = vld [vmem:[#allocation2] sm:$0xff] (!%p827_p11) }
 0x137   : > { %637 = vst [vmem:[#allocation2 + $0x10] sm:$0xff] %v632_v40  ;;  %v622_v44 = vadd.f32 %v925_v41, %v878_v38  ;;  %v926_v45 = vpop.f32.mrb[8].mxu1  ;;  %v880_v46 = vpop.f32.mrb[9].mxu0  ;;  %v656_v57 = vmul.f32 (!%p827_p11), %v828_v55, %v644_v54 }
 0x138   : > { %v881_v47 = vadd.f32 %v880_v46, %v879_v43  ;;  %v927_v48 = vpop.f32.mrb[9].mxu1 }
 0x139   : > { %v633_v49 = vadd.f32 %v622_v44, %v364_v42  ;;  %v928_v50 = vadd.f32 %v927_v48, %v926_v45  ;;  %643 = sbr.rel (%p827_p11) target bundleno = 335 (0x14f), region = 67  ;;  %v668_v1 = vadd.f32 (!%p827_p11), %v829_v56, %v656_v57 }
 0x13a   : > { %v645_v58 = vld [vmem:[#allocation2 + $0x8] sm:$0xff] (!%p827_p11) }
 0x13b   : > { %638 = vst [vmem:[#allocation2 + $0x18] sm:$0xff] %v633_v49  ;;  %v627_v52 = vadd.f32 %v928_v50, %v881_v47  ;;  %v657_v61 = vmul.f32 (!%p827_p11), %v828_v55, %v645_v58  ;;  %vm673_vm0 = vcmp.ge.f32.partialorder (!%p827_p11), %v668_v1, 0.0  ;;  %v678_v6 = vmul.f32 (!%p827_p11), 0.2, %v668_v1 }
 0x13d   : > { %v634_v53 = vadd.f32 %v627_v52, %v365_v51  ;;  %v669_v3 = vadd.f32 (!%p827_p11), %v829_v56, %v657_v61  ;;  %v683_v10 = vsel (!%p827_p11), %vm673_vm0, %v668_v1, %v678_v6 }
 0x13e   : > { %v646_v59 = vld [vmem:[#allocation2 + $0x10] sm:$0xff] (!%p827_p11)  ;;  %688 = vst [vmem:[%s1326_s4] sm:$0xff] (!%p827_p11), %v683_v10 }
 0x13f   : > { %639 = vst [vmem:[#allocation2 + $0x20] sm:$0xff] %v634_v53  ;;  %v658_v62 = vmul.f32 (!%p827_p11), %v828_v55, %v646_v59  ;;  %vm674_vm1 = vcmp.ge.f32.partialorder (!%p827_p11), %v669_v3, 0.0  ;;  %v679_v8 = vmul.f32 (!%p827_p11), 0.2, %v669_v3 }
 0x141   : > { %v670_v4 = vadd.f32 %v829_v56, %v658_v62  ;;  %v684_v12 = vsel %vm674_vm1, %v669_v3, %v679_v8 }
 0x142   : > { %v647_v60 = vld [vmem:[#allocation2 + $0x18] sm:$0xff]  ;;  %689 = vst [vmem:[%s1326_s4 + $0x8] sm:$0xff] %v684_v12 }
 0x143   : > { %v659_v63 = vmul.f32 %v828_v55, %v647_v60  ;;  %vm675_vm2 = vcmp.ge.f32.partialorder %v670_v4, 0.0  ;;  %v680_v9 = vmul.f32 0.2, %v670_v4 }
 0x145   : > { %v671_v5 = vadd.f32 %v829_v56, %v659_v63  ;;  %v685_v13 = vsel %vm675_vm2, %v670_v4, %v680_v9 }
 0x146   : > { %v648_v0 = vld [vmem:[#allocation2 + $0x20] sm:$0xff]  ;;  %690 = vst [vmem:[%s1326_s4 + $0x10] sm:$0xff] %v685_v13 }
 0x147   : > { %v660_v2 = vmul.f32 %v828_v55, %v648_v0  ;;  %vm676_vm3 = vcmp.ge.f32.partialorder %v671_v5, 0.0  ;;  %v681_v11 = vmul.f32 0.2, %v671_v5 }
 0x149   : > { %v672_v7 = vadd.f32 %v829_v56, %v660_v2  ;;  %v686_v15 = vsel %vm676_vm3, %v671_v5, %v681_v11 }
 0x14a   : > { %691 = vst [vmem:[%s1326_s4 + $0x18] sm:$0xff] %v686_v15 }
 0x14b   : > { %vm677_vm4 = vcmp.ge.f32.partialorder %v672_v7, 0.0  ;;  %v682_v14 = vmul.f32 0.2, %v672_v7 }
 0x14d   : > { %v687_v16 = vsel %vm677_vm4, %v672_v7, %v682_v14 }
 0x14e   : > { %692 = vst [vmem:[%s1326_s4 + $0x20] sm:$0xff] %v687_v16 }
 0x14f PF: > { %s14_s19 = sadd.s32 1, %s1074_s19   ;;  %s1327_s15 = smov %s1062_s16 }
 0x150   : > { %p11_p12 = scmp.ge.s32.totalorder %s14_s19, 4   ;;  %s1328_s16 = smov %s1137_s23 }
 0x151   : > { %s1329_s17 = smov %s1070_s18  ;;  %s1330_s18 = smov %s1332_s20 }
 0x152   :  { %13 = sbr.rel (!%p11_p12) target bundleno = 3 (0x3), region = 111 }

// kernel: forward.8
= control target key start
LH: loop header
LB: loop body
LE: loop exit
PB: predicated region body
PF: predicated region fallthrough
CT: control target
= control target key end

     0   :  { %s1375_s15 = smov 0   ;;  %s1377_s16 = smov 0   ;;  %s1728_s0 = inlined_call_operand.vmem [shape: f32[96,2048], index: 0, kind: input, shape index: {}]   ;;  %s1729_s1 = inlined_call_operand.vmem [shape: f32[2048,128], index: 1, kind: input, shape index: {}]   ;;  %s1730_s2 = inlined_call_operand.vmem [shape: f32[1,128], index: 2, kind: input, shape index: {}]   ;;  %s1731_s3 = inlined_call_operand.vmem [shape: f32[1,128], index: 3, kind: input, shape index: {}]   ;;  %s1732_s4 = inlined_call_operand.vmem [shape: f32[96,128], index: 4, kind: output, shape index: {}]  }
   0x1   :  { %s1379_s17 = smov 0   ;;  %s1381_s18 = smov 0  }
   0x2   :  { %s1383_s19 = smov 0  }
   0x3 LB: > { %s26_s20 = sadd.s32 1, %s1343_s18  ;;  %p49_p1 = scmp.ne.s32.totalorder %s1335_s16, %s1331_s15  ;;  %s1347_s19 = sphi %s1383_s19, %s14_s19   ;;  %s1343_s18 = sphi %s1381_s18, %s1736_s18   ;;  %s1339_s17 = sphi %s1379_s17, %s1735_s17   ;;  %s1335_s16 = sphi %s1377_s16, %s1734_s16   ;;  %s1331_s15 = sphi %s1375_s15, %s1733_s15  }
   0x4   : > { %p27_p0 = scmp.ge.s32.totalorder %s26_s20, 4  ;;  %p50_p2 = scmp.eq.s32.totalorder %s1347_s19, 0 }
   0x5   : > { %s42_s22 = sadd.s32 1, %s1335_s16  ;;  %p1051_p5 = scmp.ge.s32.totalorder %s1347_s19, 4 }
   0x6   : > { %s1738_s20 = smov (%p27_p0, %s26_s20), 0  ;;  %p51_p3 = por %p50_p2, %p49_p1 }
   0x7   : > { %s38_s21 = ssub.s32 %s1343_s18, %s1738_s20  ;;  %195 = sbr.rel (%p1051_p5) target bundleno = 43 (0x2b), region = 24 }
   0x8   : > { %p40_p4 = scmp.eq.s32.totalorder %s38_s21, 0 }
   0xa   : > { %s1410_s23 = scalar_select %p40_p4, %s1335_s16, %s42_s22  }
   0xe   : > { %198 = sbr.rel (!%p51_p3) target bundleno = 43 (0x2b), region = 28  ;;  %s200_s24 = sand.u32 (%p51_p3), 1, %s1335_s16  }
   0xf   : > { %s1065_s25 = sshll.u32 (%p51_p3), %s1343_s18, 5  ;;  %s1266_s26 = smul.u32 (%p51_p3), 384, %s200_s24 }
  0x10   : > { %s1418_s29 = scalar_lea.vmem (%p51_p3), %s1728_s0, %s1065_s25 }
  0x11   : > { %v221_v0 = vld [vmem:[%s1418_s29] sm:$0xff] (%p51_p3)  ;;  %v223_v1 = vld [vmem:[%s1418_s29 + $0x8] sm:$0xff] (%p51_p3)  ;;  %v225_v2 = vld [vmem:[%s1418_s29 + $0x10] sm:$0xff] (%p51_p3)  ;;  %s1426_s30 = scalar_lea.vmem (%p51_p3), [#allocation3], %s1266_s26 }
  0x12   : > { %v227_v3 = vld [vmem:[%s1418_s29 + $0x18] sm:$0xff] (%p51_p3)  ;;  %v229_v4 = vld [vmem:[%s1418_s29 + $0x80] sm:$0xff] (%p51_p3)  ;;  %v231_v5 = vld [vmem:[%s1418_s29 + $0x88] sm:$0xff] (%p51_p3)  ;;  %222 = vst [vmem:[%s1426_s30] sm:$0xff] (%p51_p3), %v221_v0 }
  0x13   : > { %224 = vst [vmem:[%s1426_s30 + $0x8] sm:$0xff] (%p51_p3), %v223_v1  ;;  %226 = vst [vmem:[%s1426_s30 + $0x10] sm:$0xff] (%p51_p3), %v225_v2  ;;  %v233_v6 = vld [vmem:[%s1418_s29 + $0x90] sm:$0xff] (%p51_p3)  ;;  %v235_v7 = vld [vmem:[%s1418_s29 + $0x98] sm:$0xff] (%p51_p3) }
  0x14   : > { %228 = vst [vmem:[%s1426_s30 + $0x18] sm:$0xff] (%p51_p3), %v227_v3  ;;  %230 = vst [vmem:[%s1426_s30 + $0x20] sm:$0xff] (%p51_p3), %v229_v4  ;;  %v237_v8 = vld [vmem:[%s1418_s29 + $0x100] sm:$0xff] (%p51_p3)  ;;  %v239_v9 = vld [vmem:[%s1418_s29 + $0x108] sm:$0xff] (%p51_p3) }
  0x15   : > { %232 = vst [vmem:[%s1426_s30 + $0x28] sm:$0xff] %v231_v5  ;;  %234 = vst [vmem:[%s1426_s30 + $0x30] sm:$0xff] %v233_v6  ;;  %v241_v10 = vld [vmem:[%s1418_s29 + $0x110] sm:$0xff]  ;;  %v243_v11 = vld [vmem:[%s1418_s29 + $0x118] sm:$0xff] }
  0x16   : > { %236 = vst [vmem:[%s1426_s30 + $0x38] sm:$0xff] %v235_v7  ;;  %238 = vst [vmem:[%s1426_s30 + $0x40] sm:$0xff] %v237_v8  ;;  %v245_v12 = vld [vmem:[%s1418_s29 + $0x180] sm:$0xff]  ;;  %v247_v13 = vld [vmem:[%s1418_s29 + $0x188] sm:$0xff] }
  0x17   : > { %240 = vst [vmem:[%s1426_s30 + $0x48] sm:$0xff] %v239_v9  ;;  %242 = vst [vmem:[%s1426_s30 + $0x50] sm:$0xff] %v241_v10  ;;  %v249_v14 = vld [vmem:[%s1418_s29 + $0x190] sm:$0xff]  ;;  %v251_v15 = vld [vmem:[%s1418_s29 + $0x198] sm:$0xff] }
  0x18   : > { %244 = vst [vmem:[%s1426_s30 + $0x58] sm:$0xff] %v243_v11  ;;  %246 = vst [vmem:[%s1426_s30 + $0x60] sm:$0xff] %v245_v12  ;;  %v253_v16 = vld [vmem:[%s1418_s29 + $0x200] sm:$0xff]  ;;  %v255_v17 = vld [vmem:[%s1418_s29 + $0x208] sm:$0xff] }
  0x19   : > { %248 = vst [vmem:[%s1426_s30 + $0x68] sm:$0xff] %v247_v13  ;;  %250 = vst [vmem:[%s1426_s30 + $0x70] sm:$0xff] %v249_v14  ;;  %v257_v18 = vld [vmem:[%s1418_s29 + $0x210] sm:$0xff]  ;;  %v259_v19 = vld [vmem:[%s1418_s29 + $0x218] sm:$0xff] }
  0x1a   : > { %252 = vst [vmem:[%s1426_s30 + $0x78] sm:$0xff] %v251_v15  ;;  %254 = vst [vmem:[%s1426_s30 + $0x80] sm:$0xff] %v253_v16  ;;  %v261_v20 = vld [vmem:[%s1418_s29 + $0x280] sm:$0xff]  ;;  %v263_v21 = vld [vmem:[%s1418_s29 + $0x288] sm:$0xff] }
  0x1b   : > { %256 = vst [vmem:[%s1426_s30 + $0x88] sm:$0xff] %v255_v17  ;;  %258 = vst [vmem:[%s1426_s30 + $0x90] sm:$0xff] %v257_v18  ;;  %v265_v22 = vld [vmem:[%s1418_s29 + $0x290] sm:$0xff]  ;;  %v267_v23 = vld [vmem:[%s1418_s29 + $0x298] sm:$0xff] }
  0x1c   : > { %260 = vst [vmem:[%s1426_s30 + $0x98] sm:$0xff] %v259_v19  ;;  %262 = vst [vmem:[%s1426_s30 + $0xa0] sm:$0xff] %v261_v20  ;;  %v269_v24 = vld [vmem:[%s1418_s29 + $0x300] sm:$0xff]  ;;  %v271_v25 = vld [vmem:[%s1418_s29 + $0x308] sm:$0xff] }
  0x1d   : > { %264 = vst [vmem:[%s1426_s30 + $0xa8] sm:$0xff] %v263_v21  ;;  %266 = vst [vmem:[%s1426_s30 + $0xb0] sm:$0xff] %v265_v22  ;;  %v273_v26 = vld [vmem:[%s1418_s29 + $0x310] sm:$0xff]  ;;  %v275_v27 = vld [vmem:[%s1418_s29 + $0x318] sm:$0xff] }
  0x1e   : > { %268 = vst [vmem:[%s1426_s30 + $0xb8] sm:$0xff] %v267_v23  ;;  %270 = vst [vmem:[%s1426_s30 + $0xc0] sm:$0xff] %v269_v24  ;;  %v277_v28 = vld [vmem:[%s1418_s29 + $0x380] sm:$0xff]  ;;  %v279_v29 = vld [vmem:[%s1418_s29 + $0x388] sm:$0xff] }
  0x1f   : > { %272 = vst [vmem:[%s1426_s30 + $0xc8] sm:$0xff] %v271_v25  ;;  %274 = vst [vmem:[%s1426_s30 + $0xd0] sm:$0xff] %v273_v26  ;;  %v281_v30 = vld [vmem:[%s1418_s29 + $0x390] sm:$0xff]  ;;  %v283_v31 = vld [vmem:[%s1418_s29 + $0x398] sm:$0xff] }
  0x20   : > { %276 = vst [vmem:[%s1426_s30 + $0xd8] sm:$0xff] %v275_v27  ;;  %278 = vst [vmem:[%s1426_s30 + $0xe0] sm:$0xff] %v277_v28  ;;  %v285_v32 = vld [vmem:[%s1418_s29 + $0x400] sm:$0xff]  ;;  %v287_v33 = vld [vmem:[%s1418_s29 + $0x408] sm:$0xff] }
  0x21   : > { %280 = vst [vmem:[%s1426_s30 + $0xe8] sm:$0xff] %v279_v29  ;;  %282 = vst [vmem:[%s1426_s30 + $0xf0] sm:$0xff] %v281_v30  ;;  %v289_v34 = vld [vmem:[%s1418_s29 + $0x410] sm:$0xff]  ;;  %v291_v35 = vld [vmem:[%s1418_s29 + $0x418] sm:$0xff] }
  0x22   : > { %284 = vst [vmem:[%s1426_s30 + $0xf8] sm:$0xff] %v283_v31  ;;  %286 = vst [vmem:[%s1426_s30 + $0x100] sm:$0xff] %v285_v32  ;;  %v293_v36 = vld [vmem:[%s1418_s29 + $0x480] sm:$0xff]  ;;  %v295_v37 = vld [vmem:[%s1418_s29 + $0x488] sm:$0xff] }
  0x23   : > { %288 = vst [vmem:[%s1426_s30 + $0x108] sm:$0xff] %v287_v33  ;;  %290 = vst [vmem:[%s1426_s30 + $0x110] sm:$0xff] %v289_v34  ;;  %v297_v38 = vld [vmem:[%s1418_s29 + $0x490] sm:$0xff]  ;;  %v299_v39 = vld [vmem:[%s1418_s29 + $0x498] sm:$0xff] }
  0x24   : > { %292 = vst [vmem:[%s1426_s30 + $0x118] sm:$0xff] %v291_v35  ;;  %294 = vst [vmem:[%s1426_s30 + $0x120] sm:$0xff] %v293_v36  ;;  %v301_v40 = vld [vmem:[%s1418_s29 + $0x500] sm:$0xff]  ;;  %v303_v41 = vld [vmem:[%s1418_s29 + $0x508] sm:$0xff] }
  0x25   : > { %296 = vst [vmem:[%s1426_s30 + $0x128] sm:$0xff] %v295_v37  ;;  %298 = vst [vmem:[%s1426_s30 + $0x130] sm:$0xff] %v297_v38  ;;  %v305_v42 = vld [vmem:[%s1418_s29 + $0x510] sm:$0xff]  ;;  %v307_v43 = vld [vmem:[%s1418_s29 + $0x518] sm:$0xff] }
  0x26   : > { %300 = vst [vmem:[%s1426_s30 + $0x138] sm:$0xff] %v299_v39  ;;  %302 = vst [vmem:[%s1426_s30 + $0x140] sm:$0xff] %v301_v40  ;;  %v309_v44 = vld [vmem:[%s1418_s29 + $0x580] sm:$0xff]  ;;  %v311_v45 = vld [vmem:[%s1418_s29 + $0x588] sm:$0xff] }
  0x27   : > { %304 = vst [vmem:[%s1426_s30 + $0x148] sm:$0xff] %v303_v41  ;;  %306 = vst [vmem:[%s1426_s30 + $0x150] sm:$0xff] %v305_v42  ;;  %v313_v46 = vld [vmem:[%s1418_s29 + $0x590] sm:$0xff]  ;;  %v315_v47 = vld [vmem:[%s1418_s29 + $0x598] sm:$0xff] }
  0x28   : > { %308 = vst [vmem:[%s1426_s30 + $0x158] sm:$0xff] %v307_v43  ;;  %310 = vst [vmem:[%s1426_s30 + $0x160] sm:$0xff] %v309_v44 }
  0x29   : > { %312 = vst [vmem:[%s1426_s30 + $0x168] sm:$0xff] %v311_v45  ;;  %314 = vst [vmem:[%s1426_s30 + $0x170] sm:$0xff] %v313_v46 }
  0x2a   : > { %316 = vst [vmem:[%s1426_s30 + $0x178] sm:$0xff] %v315_v47 }
  0x2b PF: > { %p1054_p6 = scmp.ge.s32.totalorder %s1347_s19, 1  ;;  %p333_p7 = scmp.lt.s32.totalorder %s1347_s19, 5 }
  0x2d   : > { %p334_p8 = pnand %p1054_p6, %p333_p7 }
  0x2e   : > { %s340_s5 = sand.u32 (!%p334_p8), 1, %s1331_s15   ;;  %s1055_s6 = sshll.u32 (!%p334_p8), %s1339_s17, 6 }
  0x2f   : > { %337 = sbr.rel (%p334_p8) target bundleno = 378 (0x17a), region = 55  ;;  %p385_p9 = scmp.lt.s32.totalorder (!%p334_p8), %s1055_s6, 255 }
  0x30   : > { %s1267_s7 = smul.u32 (!%p334_p8), 384, %s340_s5  ;;  %p1057_p10 = scmp.ne.s32.totalorder (!%p334_p8), %s1339_s17, 0 }
  0x32   : > { %s1527_s12 = scalar_lea.vmem (!%p334_p8), [#allocation3], %s1267_s7 }
  0x36   : > { %s1740_s6 = smov (!%p385_p9, %s1055_s6), 255  ;;  %411 = sbr.rel (%p1057_p10) target bundleno = 62 (0x3e), region = 63 }
  0x37   : > { %s1056_s8 = sshll.u32 %s1740_s6, 3  ;;  %v1349_v48 = vmov (!%p1057_p10), 0.0  }
  0x38   : > { %s1525_s11 = scalar_lea.vmem %s1729_s1, %s1056_s8  ;;  %412 = vst [vmem:[#allocation2] sm:$0xff] (!%p1057_p10), %v1349_v48  ;;  %413 = vst [vmem:[#allocation2 + $0x8] sm:$0xff] (!%p1057_p10), %v1349_v48 }
  0x39   : > { %414 = vst [vmem:[#allocation2 + $0x10] sm:$0xff] (!%p1057_p10), %v1349_v48  ;;  %415 = vst [vmem:[#allocation2 + $0x18] sm:$0xff] (!%p1057_p10), %v1349_v48 }
  0x3a   : > { %416 = vst [vmem:[#allocation2 + $0x20] sm:$0xff] (!%p1057_p10), %v1349_v48  ;;  %417 = vst [vmem:[#allocation2 + $0x28] sm:$0xff] (!%p1057_p10), %v1349_v48 }
  0x3b   : > { %418 = vst [vmem:[#allocation2 + $0x30] sm:$0xff] (!%p1057_p10), %v1349_v48  ;;  %419 = vst [vmem:[#allocation2 + $0x38] sm:$0xff] (!%p1057_p10), %v1349_v48 }
  0x3c   : > { %420 = vst [vmem:[#allocation2 + $0x40] sm:$0xff] (!%p1057_p10), %v1349_v48  ;;  %421 = vst [vmem:[#allocation2 + $0x48] sm:$0xff] (!%p1057_p10), %v1349_v48 }
  0x3d   : > { %422 = vst [vmem:[#allocation2 + $0x50] sm:$0xff] %v1349_v48  ;;  %423 = vst [vmem:[#allocation2 + $0x58] sm:$0xff] %v1349_v48 }
  0x3e PF: > { %v500_v49 = vld [vmem:[%s1525_s11 + $0x80] sm:$0xff]  ;;  %v501_v50 = vld [vmem:[%s1525_s11 + $0x88] sm:$0xff]  ;;  %v502_v60 = vld [vmem:[%s1525_s11 + $0x90] sm:$0xff]  ;;  %p1058_p11 = scmp.ne.s32.totalorder %s1339_s17, 3 }
  0x3f   : > { %v532_v51 = vld [vmem:[%s1525_s11 + $0x180] sm:$0xff]  ;;  %v1202_v52 = vpack.c.bf16 %v501_v50, %v500_v49  ;;  %v533_v53 = vld [vmem:[%s1525_s11 + $0x188] sm:$0xff]  ;;  %v503_v62 = vld [vmem:[%s1525_s11 + $0x98] sm:$0xff] }
  0x40   : > { %v484_v54 = vld [vmem:[%s1525_s11] sm:$0xff]  ;;  %v485_v55 = vld [vmem:[%s1525_s11 + $0x8] sm:$0xff]  ;;  %v1234_v56 = vpack.c.bf16 %v533_v53, %v532_v51  ;;  %v534_v63 = vld [vmem:[%s1525_s11 + $0x190] sm:$0xff]  ;;  %v1206_v1 = vpack.c.bf16 %v503_v62, %v502_v60 }
  0x41   : > { %v1204_v57 = vpack.c.bf16 %v485_v55, %v484_v54  ;;  %v516_v58 = vld [vmem:[%s1525_s11 + $0x100] sm:$0xff]  ;;  %v517_v59 = vld [vmem:[%s1525_s11 + $0x108] sm:$0xff]  ;;  %1203 = vmatprep.subr.bf16.mxu0 %v1202_v52  ;;  %v535_v0 = vld [vmem:[%s1525_s11 + $0x198] sm:$0xff] }
  0x42   : > { %v1236_v61 = vpack.c.bf16 %v517_v59, %v516_v58  ;;  %1235 = vmatprep.subr.bf16.mxu1 %v1234_v56  ;;  %v1238_v2 = vpack.c.bf16 %v535_v0, %v534_v63  ;;  %v486_v3 = vld [vmem:[%s1525_s11 + $0x10] sm:$0xff]  ;;  %v487_v4 = vld [vmem:[%s1525_s11 + $0x18] sm:$0xff]  ;;  %v504_v8 = vld [vmem:[%s1525_s11 + $0xa0] sm:$0xff] }
  0x43   : > { %1205 = vmatpush3.bf16.msra.mxu0 %v1204_v57  ;;  %v518_v5 = vld [vmem:[%s1525_s11 + $0x110] sm:$0xff]  ;;  %v1208_v6 = vpack.c.bf16 %v487_v4, %v486_v3  ;;  %v519_v7 = vld [vmem:[%s1525_s11 + $0x118] sm:$0xff]  ;;  %v505_v9 = vld [vmem:[%s1525_s11 + $0xa8] sm:$0xff] }
  0x44   : > { %1237 = vmatpush3.bf16.msra.mxu1 %v1236_v61  ;;  %1207 = vmatprep.subr.bf16.mxu0 %v1206_v1  ;;  %v1240_v10 = vpack.c.bf16 %v519_v7, %v518_v5  ;;  %v1210_v11 = vpack.c.bf16 %v505_v9, %v504_v8  ;;  %v536_v12 = vld [vmem:[%s1525_s11 + $0x1a0] sm:$0xff]  ;;  %v537_v13 = vld [vmem:[%s1525_s11 + $0x1a8] sm:$0xff]  ;;  %v506_v20 = vld [vmem:[%s1525_s11 + $0xb0] sm:$0xff] }
  0x45   : > { %1239 = vmatprep.subr.bf16.mxu1 %v1238_v2  ;;  %v488_v14 = vld [vmem:[%s1525_s11 + $0x20] sm:$0xff]  ;;  %v1242_v15 = vpack.c.bf16 %v537_v13, %v536_v12  ;;  %v489_v16 = vld [vmem:[%s1525_s11 + $0x28] sm:$0xff]  ;;  %v507_v21 = vld [vmem:[%s1525_s11 + $0xb8] sm:$0xff] }
  0x46   : > { %v520_v17 = vld [vmem:[%s1525_s11 + $0x120] sm:$0xff]  ;;  %v521_v18 = vld [vmem:[%s1525_s11 + $0x128] sm:$0xff]  ;;  %v1212_v19 = vpack.c.bf16 %v489_v16, %v488_v14  ;;  %v538_v22 = vld [vmem:[%s1525_s11 + $0x1b0] sm:$0xff]  ;;  %v1214_v24 = vpack.c.bf16 %v507_v21, %v506_v20 }
  0x47   : > { %1209 = vmatpush3.bf16.msra.mxu0 %v1208_v6  ;;  %v1244_v23 = vpack.c.bf16 %v521_v18, %v520_v17  ;;  %v539_v25 = vld [vmem:[%s1525_s11 + $0x1b8] sm:$0xff]  ;;  %v490_v26 = vld [vmem:[%s1525_s11 + $0x30] sm:$0xff]  ;;  %v508_v31 = vld [vmem:[%s1525_s11 + $0xc0] sm:$0xff] }
  0x48   : > { %1241 = vmatpush3.bf16.msra.mxu1 %v1240_v10  ;;  %1211 = vmatprep.subr.bf16.mxu0 %v1210_v11  ;;  %v491_v27 = vld [vmem:[%s1525_s11 + $0x38] sm:$0xff]  ;;  %v1246_v28 = vpack.c.bf16 %v539_v25, %v538_v22  ;;  %v522_v29 = vld [vmem:[%s1525_s11 + $0x130] sm:$0xff]  ;;  %v509_v32 = vld [vmem:[%s1525_s11 + $0xc8] sm:$0xff] }
  0x49   : > { %1243 = vmatprep.subr.bf16.mxu1 %v1242_v15  ;;  %v523_v30 = vld [vmem:[%s1525_s11 + $0x138] sm:$0xff]  ;;  %v540_v33 = vld [vmem:[%s1525_s11 + $0x1c0] sm:$0xff]  ;;  %v541_v34 = vld [vmem:[%s1525_s11 + $0x1c8] sm:$0xff]  ;;  %v1216_v35 = vpack.c.bf16 %v491_v27, %v490_v26  ;;  %v1218_v37 = vpack.c.bf16 %v509_v32, %v508_v31 }
  0x4a   : > { %v1248_v36 = vpack.c.bf16 %v523_v30, %v522_v29  ;;  %v492_v38 = vld [vmem:[%s1525_s11 + $0x40] sm:$0xff]  ;;  %v493_v39 = vld [vmem:[%s1525_s11 + $0x48] sm:$0xff]  ;;  %v1250_v41 = vpack.c.bf16 %v541_v34, %v540_v33  ;;  %v510_v43 = vld [vmem:[%s1525_s11 + $0xd0] sm:$0xff] }
  0x4b   : > { %1213 = vmatpush3.bf16.msra.mxu0 %v1212_v19  ;;  %v524_v40 = vld [vmem:[%s1525_s11 + $0x140] sm:$0xff]  ;;  %v525_v42 = vld [vmem:[%s1525_s11 + $0x148] sm:$0xff]  ;;  %v511_v44 = vld [vmem:[%s1525_s11 + $0xd8] sm:$0xff]  ;;  %v1220_v47 = vpack.c.bf16 %v493_v39, %v492_v38 }
  0x4c   : > { %1245 = vmatpush3.bf16.msra.mxu1 %v1244_v23  ;;  %1215 = vmatprep.subr.bf16.mxu0 %v1214_v24  ;;  %v542_v45 = vld [vmem:[%s1525_s11 + $0x1d0] sm:$0xff]  ;;  %v543_v46 = vld [vmem:[%s1525_s11 + $0x1d8] sm:$0xff]  ;;  %v1252_v48 = vpack.c.bf16 %v525_v42, %v524_v40  ;;  %v1222_v49 = vpack.c.bf16 %v511_v44, %v510_v43  ;;  %v512_v55 = vld [vmem:[%s1525_s11 + $0xe0] sm:$0xff] }
  0x4d   : > { %1247 = vmatprep.subr.bf16.mxu1 %v1246_v28  ;;  %v494_v50 = vld [vmem:[%s1525_s11 + $0x50] sm:$0xff]  ;;  %v495_v51 = vld [vmem:[%s1525_s11 + $0x58] sm:$0xff]  ;;  %v1254_v53 = vpack.c.bf16 %v543_v46, %v542_v45  ;;  %v513_v56 = vld [vmem:[%s1525_s11 + $0xe8] sm:$0xff] }
  0x4e   : > { %v526_v52 = vld [vmem:[%s1525_s11 + $0x150] sm:$0xff]  ;;  %v527_v54 = vld [vmem:[%s1525_s11 + $0x158] sm:$0xff]  ;;  %v544_v57 = vld [vmem:[%s1525_s11 + $0x1e0] sm:$0xff]  ;;  %v1224_v59 = vpack.c.bf16 %v495_v51, %v494_v50  ;;  %v1226_v63 = vpack.c.bf16 %v513_v56, %v512_v55 }
  0x4f   : > { %1217 = vmatpush3.bf16.msra.mxu0 %v1216_v35  ;;  %v545_v58 = vld [vmem:[%s1525_s11 + $0x1e8] sm:$0xff]  ;;  %v496_v60 = vld [vmem:[%s1525_s11 + $0x60] sm:$0xff]  ;;  %v1256_v62 = vpack.c.bf16 %v527_v54, %v526_v52  ;;  %v439_v2 = vld [vmem:[%s1527_s12 + $0x18] sm:$0xff] }
  0x50   : > { %1249 = vmatpush3.bf16.msra.mxu1 %v1248_v36  ;;  %1219 = vmatprep.subr.bf16.mxu0 %v1218_v37  ;;  %v497_v61 = vld [vmem:[%s1525_s11 + $0x68] sm:$0xff]  ;;  %v528_v0 = vld [vmem:[%s1525_s11 + $0x160] sm:$0xff]  ;;  %v1258_v3 = vpack.c.bf16 %v545_v58, %v544_v57  ;;  %v514_v5 = vld [vmem:[%s1525_s11 + $0xf0] sm:$0xff] }
  0x51   : > { %1251 = vmatprep.subr.bf16.mxu1 %v1250_v41  ;;  %v437_v1 = vld [vmem:[%s1527_s12 + $0x8] sm:$0xff]  ;;  %v515_v6 = vld [vmem:[%s1525_s11 + $0xf8] sm:$0xff]  ;;  %v546_v7 = vld [vmem:[%s1525_s11 + $0x1f0] sm:$0xff]  ;;  %737 = vmatprep.mubr.f32.mxu1 %v439_v2  ;;  %v1228_v9 = vpack.c.bf16 %v497_v61, %v496_v60 }
  0x52   : > { %v529_v4 = vld [vmem:[%s1525_s11 + $0x168] sm:$0xff]  ;;  %612 = vmatprep.mubr.f32.mxu0 %v437_v1  ;;  %v547_v8 = vld [vmem:[%s1525_s11 + $0x1f8] sm:$0xff]  ;;  %v1230_v11 = vpack.c.bf16 %v515_v6, %v514_v5  ;;  %v498_v12 = vld [vmem:[%s1525_s11 + $0x70] sm:$0xff] }
  0x53   : > { %1221 = vmatpush3.bf16.msra.mxu0 %v1220_v47  ;;  %v1260_v10 = vpack.c.bf16 %v529_v4, %v528_v0  ;;  %v499_v13 = vld [vmem:[%s1525_s11 + $0x78] sm:$0xff]  ;;  %v1262_v14 = vpack.c.bf16 %v547_v8, %v546_v7  ;;  %v530_v15 = vld [vmem:[%s1525_s11 + $0x170] sm:$0xff]  ;;  %v436_v19 = vld [vmem:[%s1527_s12] sm:$0xff] }
  0x54   : > { %1253 = vmatpush3.bf16.msra.mxu1 %v1252_v48  ;;  %1223 = vmatprep.subr.bf16.mxu0 %v1222_v49  ;;  %v531_v16 = vld [vmem:[%s1525_s11 + $0x178] sm:$0xff]  ;;  %v1232_v17 = vpack.c.bf16 %v499_v13, %v498_v12  ;;  %v438_v20 = vld [vmem:[%s1527_s12 + $0x10] sm:$0xff]  ;;  %v441_v21 = vld [vmem:[%s1527_s12 + $0x28] sm:$0xff] }
  0x55   : > { %1255 = vmatprep.subr.bf16.mxu1 %v1254_v53  ;;  %v1264_v18 = vpack.c.bf16 %v531_v16, %v530_v15  ;;  %v443_v22 = vld [vmem:[%s1527_s12 + $0x38] sm:$0xff]  ;;  %v440_v23 = vld [vmem:[%s1527_s12 + $0x20] sm:$0xff]  ;;  %v442_v24 = vld [vmem:[%s1527_s12 + $0x30] sm:$0xff] }
  0x56   : > { %v445_v25 = vld [vmem:[%s1527_s12 + $0x48] sm:$0xff]  ;;  %v447_v26 = vld [vmem:[%s1527_s12 + $0x58] sm:$0xff]  ;;  %v444_v27 = vld [vmem:[%s1527_s12 + $0x40] sm:$0xff] }
  0x57   : > { %1225 = vmatpush3.bf16.msra.mxu0 %v1224_v59  ;;  %v446_v28 = vld [vmem:[%s1527_s12 + $0x50] sm:$0xff]  ;;  %v449_v29 = vld [vmem:[%s1527_s12 + $0x68] sm:$0xff]  ;;  %v451_v30 = vld [vmem:[%s1527_s12 + $0x78] sm:$0xff] }
  0x58   : > { %1257 = vmatpush3.bf16.msra.mxu1 %v1256_v62  ;;  %1227 = vmatprep.subr.bf16.mxu0 %v1226_v63  ;;  %v448_v31 = vld [vmem:[%s1527_s12 + $0x60] sm:$0xff]  ;;  %v450_v32 = vld [vmem:[%s1527_s12 + $0x70] sm:$0xff]  ;;  %v453_v33 = vld [vmem:[%s1527_s12 + $0x88] sm:$0xff] }
  0x59   : > { %1259 = vmatprep.subr.bf16.mxu1 %v1258_v3  ;;  %v455_v34 = vld [vmem:[%s1527_s12 + $0x98] sm:$0xff]  ;;  %v452_v35 = vld [vmem:[%s1527_s12 + $0x80] sm:$0xff]  ;;  %v454_v36 = vld [vmem:[%s1527_s12 + $0x90] sm:$0xff] }
  0x5a   : > { %v457_v37 = vld [vmem:[%s1527_s12 + $0xa8] sm:$0xff]  ;;  %v459_v38 = vld [vmem:[%s1527_s12 + $0xb8] sm:$0xff]  ;;  %v456_v39 = vld [vmem:[%s1527_s12 + $0xa0] sm:$0xff] }
  0x5b   : > { %1229 = vmatpush3.bf16.msra.mxu0 %v1228_v9  ;;  %v458_v40 = vld [vmem:[%s1527_s12 + $0xb0] sm:$0xff]  ;;  %v461_v41 = vld [vmem:[%s1527_s12 + $0xc8] sm:$0xff]  ;;  %v463_v42 = vld [vmem:[%s1527_s12 + $0xd8] sm:$0xff] }
  0x5c   : > { %1261 = vmatpush3.bf16.msra.mxu1 %v1260_v10  ;;  %1231 = vmatprep.subr.bf16.mxu0 %v1230_v11  ;;  %v460_v43 = vld [vmem:[%s1527_s12 + $0xc0] sm:$0xff]  ;;  %v462_v44 = vld [vmem:[%s1527_s12 + $0xd0] sm:$0xff]  ;;  %v465_v45 = vld [vmem:[%s1527_s12 + $0xe8] sm:$0xff] }
  0x5d   : > { %1263 = vmatprep.subr.bf16.mxu1 %v1262_v14  ;;  %v467_v46 = vld [vmem:[%s1527_s12 + $0xf8] sm:$0xff]  ;;  %v464_v47 = vld [vmem:[%s1527_s12 + $0xe0] sm:$0xff]  ;;  %v466_v48 = vld [vmem:[%s1527_s12 + $0xf0] sm:$0xff] }
  0x5e   : > { %v469_v49 = vld [vmem:[%s1527_s12 + $0x108] sm:$0xff]  ;;  %v471_v50 = vld [vmem:[%s1527_s12 + $0x118] sm:$0xff]  ;;  %v468_v51 = vld [vmem:[%s1527_s12 + $0x100] sm:$0xff] }
  0x5f   : > { %1233 = vmatpush3.bf16.msra.mxu0 %v1232_v17  ;;  %v470_v52 = vld [vmem:[%s1527_s12 + $0x110] sm:$0xff]  ;;  %v473_v53 = vld [vmem:[%s1527_s12 + $0x128] sm:$0xff]  ;;  %v475_v54 = vld [vmem:[%s1527_s12 + $0x138] sm:$0xff] }
  0x60   : > { %1265 = vmatpush3.bf16.msra.mxu1 %v1264_v18  ;;  %v472_v55 = vld [vmem:[%s1527_s12 + $0x120] sm:$0xff]  ;;  %v474_v56 = vld [vmem:[%s1527_s12 + $0x130] sm:$0xff]  ;;  %v477_v57 = vld [vmem:[%s1527_s12 + $0x148] sm:$0xff] }
  0x61   : > { %v479_v58 = vld [vmem:[%s1527_s12 + $0x158] sm:$0xff]  ;;  %v476_v59 = vld [vmem:[%s1527_s12 + $0x140] sm:$0xff]  ;;  %v478_v60 = vld [vmem:[%s1527_s12 + $0x150] sm:$0xff] }
  0x62   : > { %613 = vmatmul.mubr.f32.vlgmr.msra.gmra.mrb[0].mxu0 %v436_v19  ;;  %v481_v61 = vld [vmem:[%s1527_s12 + $0x168] sm:$0xff]  ;;  %v483_v62 = vld [vmem:[%s1527_s12 + $0x178] sm:$0xff]  ;;  %v480_v63 = vld [vmem:[%s1527_s12 + $0x160] sm:$0xff] }
  0x63   : > { %738 = vmatmul.mubr.f32.vlgmr.msra.gmra.mrb[0].mxu1 %v438_v20  ;;  %617 = vmatprep.mubr.f32.mxu0 %v441_v21  ;;  %v482_v0 = vld [vmem:[%s1527_s12 + $0x170] sm:$0xff]  ;;  %v424_v7 = vld [vmem:[#allocation2] sm:$0xff]  ;;  %v425_v16 = vld [vmem:[#allocation2 + $0x8] sm:$0xff] }
  0x64   : > { %742 = vmatprep.mubr.f32.mxu1 %v443_v22 }
  0x66   : > { %618 = vmatmul.mubr.f32.gmra.mrb[2].mxu0 %v440_v23 }
  0x67   : > { %743 = vmatmul.mubr.f32.gmra.mrb[2].mxu1 %v442_v24  ;;  %622 = vmatprep.mubr.f32.mxu0 %v445_v25  ;;  %v426_v25 = vld [vmem:[#allocation2 + $0x10] sm:$0xff] }
  0x68   : > { %747 = vmatprep.mubr.f32.mxu1 %v447_v26 }
  0x6a   : > { %623 = vmatmul.mubr.f32.gmra.mrb[4].mxu0 %v444_v27 }
  0x6b   : > { %748 = vmatmul.mubr.f32.gmra.mrb[4].mxu1 %v446_v28  ;;  %627 = vmatprep.mubr.f32.mxu0 %v449_v29 }
  0x6c   : > { %752 = vmatprep.mubr.f32.mxu1 %v451_v30 }
  0x6e   : > { %628 = vmatmul.mubr.f32.gmra.mrb[6].mxu0 %v448_v31 }
  0x6f   : > { %753 = vmatmul.mubr.f32.gmra.mrb[6].mxu1 %v450_v32  ;;  %632 = vmatprep.mubr.f32.mxu0 %v453_v33 }
  0x70   : > { %757 = vmatprep.mubr.f32.mxu1 %v455_v34  ;;  %v427_v34 = vld [vmem:[#allocation2 + $0x18] sm:$0xff] }
  0x72   : > { %633 = vmatmul.mubr.f32.gmra.mrb[8].mxu0 %v452_v35 }
  0x73   : > { %758 = vmatmul.mubr.f32.gmra.mrb[8].mxu1 %v454_v36  ;;  %637 = vmatprep.mubr.f32.mxu0 %v457_v37 }
  0x74   : > { %762 = vmatprep.mubr.f32.mxu1 %v459_v38 }
  0x76   : > { %638 = vmatmul.mubr.f32.gmra.mrb[10].mxu0 %v456_v39 }
  0x77   : > { %763 = vmatmul.mubr.f32.gmra.mrb[10].mxu1 %v458_v40  ;;  %642 = vmatprep.mubr.f32.mxu0 %v461_v41 }
  0x78   : > { %767 = vmatprep.mubr.f32.mxu1 %v463_v42 }
  0x7a   : > { %643 = vmatmul.mubr.f32.gmra.mrb[12].mxu0 %v460_v43  ;;  %v428_v43 = vld [vmem:[#allocation2 + $0x20] sm:$0xff] }
  0x7b   : > { %768 = vmatmul.mubr.f32.gmra.mrb[12].mxu1 %v462_v44  ;;  %647 = vmatprep.mubr.f32.mxu0 %v465_v45 }
  0x7c   : > { %772 = vmatprep.mubr.f32.mxu1 %v467_v46 }
  0x7e   : > { %648 = vmatmul.mubr.f32.gmra.mrb[14].mxu0 %v464_v47 }
  0x7f   : > { %773 = vmatmul.mubr.f32.gmra.mrb[14].mxu1 %v466_v48  ;;  %652 = vmatprep.mubr.f32.mxu0 %v469_v49 }
  0x80   : > { %777 = vmatprep.mubr.f32.mxu1 %v471_v50 }
  0x82   : > { %653 = vmatmul.mubr.f32.gmra.mrb[16].mxu0 %v468_v51 }
  0x83   : > { %778 = vmatmul.mubr.f32.gmra.mrb[16].mxu1 %v470_v52  ;;  %657 = vmatprep.mubr.f32.mxu0 %v473_v53  ;;  %v429_v52 = vld [vmem:[#allocation2 + $0x28] sm:$0xff] }
  0x84   : > { %782 = vmatprep.mubr.f32.mxu1 %v475_v54 }
  0x86   : > { %658 = vmatmul.mubr.f32.gmra.mrb[18].mxu0 %v472_v55 }
  0x87   : > { %783 = vmatmul.mubr.f32.gmra.mrb[18].mxu1 %v474_v56  ;;  %662 = vmatprep.mubr.f32.mxu0 %v477_v57 }
  0x88   : > { %787 = vmatprep.mubr.f32.mxu1 %v479_v58 }
  0x8a   : > { %663 = vmatmul.mubr.f32.gmra.mrb[20].mxu0 %v476_v59 }
  0x8b   : > { %788 = vmatmul.mubr.f32.gmra.mrb[20].mxu1 %v478_v60  ;;  %667 = vmatprep.mubr.f32.mxu0 %v481_v61  ;;  %v430_v61 = vld [vmem:[#allocation2 + $0x30] sm:$0xff] }
  0x8c   : > { %792 = vmatprep.mubr.f32.mxu1 %v483_v62 }
  0x8e   : > { %668 = vmatmul.mubr.f32.gmra.mrb[22].mxu0 %v480_v63 }
  0x8f   : > { %793 = vmatmul.mubr.f32.gmra.mrb[22].mxu1 %v482_v0 }
 0x135   : > { %v1098_v1 = vpop.f32.mrb[0].mxu0 }
 0x136   : > { %v1166_v2 = vpop.f32.mrb[0].mxu1  ;;  %v1099_v3 = vpop.f32.mrb[1].mxu0 }
 0x137   : > { %v1100_v4 = vadd.f32 %v1099_v3, %v1098_v1  ;;  %v1167_v5 = vpop.f32.mrb[1].mxu1 }
 0x138   : > { %v1168_v6 = vadd.f32 %v1167_v5, %v1166_v2 }
 0x139   : > { %v1101_v8 = vpop.f32.mrb[2].mxu0 }
 0x13a   : > { %v740_v9 = vadd.f32 %v1168_v6, %v1100_v4  ;;  %v1169_v10 = vpop.f32.mrb[2].mxu1  ;;  %v1102_v11 = vpop.f32.mrb[3].mxu0  ;;  %v431_v6 = vld [vmem:[#allocation2 + $0x38] sm:$0xff] }
 0x13b   : > { %v1103_v12 = vadd.f32 %v1102_v11, %v1101_v8  ;;  %v1170_v13 = vpop.f32.mrb[3].mxu1 }
 0x13c   : > { %v798_v14 = vadd.f32 %v740_v9, %v424_v7  ;;  %v1171_v15 = vadd.f32 %v1170_v13, %v1169_v10 }
 0x13d   : > { %v1104_v17 = vpop.f32.mrb[4].mxu0 }
 0x13e   : > { %810 = vst [vmem:[#allocation2] sm:$0xff] %v798_v14  ;;  %v745_v18 = vadd.f32 %v1171_v15, %v1103_v12  ;;  %v1172_v19 = vpop.f32.mrb[4].mxu1  ;;  %v1105_v20 = vpop.f32.mrb[5].mxu0  ;;  %v432_v15 = vld [vmem:[#allocation2 + $0x40] sm:$0xff] }
 0x13f   : > { %v1106_v21 = vadd.f32 %v1105_v20, %v1104_v17  ;;  %v1173_v22 = vpop.f32.mrb[5].mxu1 }
 0x140   : > { %v799_v23 = vadd.f32 %v745_v18, %v425_v16  ;;  %v1174_v24 = vadd.f32 %v1173_v22, %v1172_v19 }
 0x141   : > { %v1107_v26 = vpop.f32.mrb[6].mxu0 }
 0x142   : > { %811 = vst [vmem:[#allocation2 + $0x8] sm:$0xff] %v799_v23  ;;  %v750_v27 = vadd.f32 %v1174_v24, %v1106_v21  ;;  %v1175_v28 = vpop.f32.mrb[6].mxu1  ;;  %v1108_v29 = vpop.f32.mrb[7].mxu0  ;;  %v433_v24 = vld [vmem:[#allocation2 + $0x48] sm:$0xff] }
 0x143   : > { %v1109_v30 = vadd.f32 %v1108_v29, %v1107_v26  ;;  %v1176_v31 = vpop.f32.mrb[7].mxu1 }
 0x144   : > { %v800_v32 = vadd.f32 %v750_v27, %v426_v25  ;;  %v1177_v33 = vadd.f32 %v1176_v31, %v1175_v28 }
 0x145   : > { %v1110_v35 = vpop.f32.mrb[8].mxu0 }
 0x146   : > { %812 = vst [vmem:[#allocation2 + $0x10] sm:$0xff] %v800_v32  ;;  %v755_v36 = vadd.f32 %v1177_v33, %v1109_v30  ;;  %v1178_v37 = vpop.f32.mrb[8].mxu1  ;;  %v1111_v38 = vpop.f32.mrb[9].mxu0  ;;  %v434_v33 = vld [vmem:[#allocation2 + $0x50] sm:$0xff] }
 0x147   : > { %v1112_v39 = vadd.f32 %v1111_v38, %v1110_v35  ;;  %v1179_v40 = vpop.f32.mrb[9].mxu1 }
 0x148   : > { %v801_v41 = vadd.f32 %v755_v36, %v427_v34  ;;  %v1180_v42 = vadd.f32 %v1179_v40, %v1178_v37 }
 0x149   : > { %v1113_v44 = vpop.f32.mrb[10].mxu0 }
 0x14a   : > { %813 = vst [vmem:[#allocation2 + $0x18] sm:$0xff] %v801_v41  ;;  %v760_v45 = vadd.f32 %v1180_v42, %v1112_v39  ;;  %v1181_v46 = vpop.f32.mrb[10].mxu1  ;;  %v1114_v47 = vpop.f32.mrb[11].mxu0  ;;  %v435_v42 = vld [vmem:[#allocation2 + $0x58] sm:$0xff] }
 0x14b   : > { %v1115_v48 = vadd.f32 %v1114_v47, %v1113_v44  ;;  %v1182_v49 = vpop.f32.mrb[11].mxu1  ;;  %v1651_v47 = vld [vmem:[%s1731_s3] ss:$0 sm:$0xff] (!%p1058_p11) }
 0x14c   : > { %v802_v50 = vadd.f32 %v760_v45, %v428_v43  ;;  %v1183_v51 = vadd.f32 %v1182_v49, %v1181_v46  ;;  %v826_v45 = vld [vmem:[#allocation2] sm:$0xff] (!%p1058_p11)  ;;  %v827_v49 = vld [vmem:[#allocation2 + $0x8] sm:$0xff] (!%p1058_p11) }
 0x14d   : > { %v1116_v53 = vpop.f32.mrb[12].mxu0  ;;  %v1646_v46 = vld [vmem:[%s1730_s2] ss:$0 sm:$0xff] (!%p1058_p11) }
 0x14e   : > { %814 = vst [vmem:[#allocation2 + $0x20] sm:$0xff] %v802_v50  ;;  %v765_v54 = vadd.f32 %v1183_v51, %v1115_v48  ;;  %v1184_v55 = vpop.f32.mrb[12].mxu1  ;;  %v1117_v56 = vpop.f32.mrb[13].mxu0  ;;  %v845_v48 = vmul.f32 (!%p1058_p11), %v1646_v46, %v826_v45  ;;  %v828_v50 = vld [vmem:[#allocation2 + $0x10] sm:$0xff] (!%p1058_p11) }
 0x14f   : > { %v1118_v57 = vadd.f32 %v1117_v56, %v1116_v53  ;;  %v1185_v58 = vpop.f32.mrb[13].mxu1  ;;  %v847_v53 = vmul.f32 (!%p1058_p11), %v1646_v46, %v828_v50 }
 0x150   : > { %v803_v59 = vadd.f32 %v765_v54, %v429_v52  ;;  %v1186_v60 = vadd.f32 %v1185_v58, %v1184_v55  ;;  %v846_v52 = vmul.f32 (!%p1058_p11), %v1646_v46, %v827_v49  ;;  %v864_v58 = vadd.f32 (!%p1058_p11), %v1651_v47, %v845_v48 }
 0x151   : > { %v1119_v62 = vpop.f32.mrb[14].mxu0  ;;  %v829_v51 = vld [vmem:[#allocation2 + $0x18] sm:$0xff] (!%p1058_p11) }
 0x152   : > { %815 = vst [vmem:[#allocation2 + $0x28] sm:$0xff] %v803_v59  ;;  %v770_v63 = vadd.f32 %v1186_v60, %v1118_v57  ;;  %v1187_v0 = vpop.f32.mrb[14].mxu1  ;;  %v1120_v1 = vpop.f32.mrb[15].mxu0  ;;  %v848_v54 = vmul.f32 (!%p1058_p11), %v1646_v46, %v829_v51  ;;  %vm876_vm0 = vcmp.ge.f32.partialorder (!%p1058_p11), %v864_v58, 0.0 }
 0x153   : > { %v1121_v2 = vadd.f32 %v1120_v1, %v1119_v62  ;;  %v1188_v3 = vpop.f32.mrb[15].mxu1 }
 0x154   : > { %v804_v4 = vadd.f32 %v770_v63, %v430_v61  ;;  %v1189_v5 = vadd.f32 %v1188_v3, %v1187_v0  ;;  %v865_v63 = vadd.f32 (!%p1058_p11), %v1651_v47, %v846_v52  ;;  %v866_v0 = vadd.f32 (!%p1058_p11), %v1651_v47, %v847_v53 }
 0x155   : > { %v1122_v7 = vpop.f32.mrb[16].mxu0  ;;  %v830_v55 = vld [vmem:[#allocation2 + $0x20] sm:$0xff] (!%p1058_p11)  ;;  %v867_v1 = vadd.f32 (!%p1058_p11), %v1651_v47, %v848_v54  ;;  %v888_v3 = vmul.f32 (!%p1058_p11), 0.2, %v864_v58 }
 0x156   : > { %816 = vst [vmem:[#allocation2 + $0x30] sm:$0xff] %v804_v4  ;;  %v775_v8 = vadd.f32 %v1189_v5, %v1121_v2  ;;  %v1190_v9 = vpop.f32.mrb[16].mxu1  ;;  %v1123_v10 = vpop.f32.mrb[17].mxu0  ;;  %v849_v59 = vmul.f32 (!%p1058_p11), %v1646_v46, %v830_v55  ;;  %vm877_vm1 = vcmp.ge.f32.partialorder (!%p1058_p11), %v865_v63, 0.0  ;;  %vm878_vm2 = vcmp.ge.f32.partialorder (!%p1058_p11), %v866_v0, 0.0 }
 0x157   : > { %v1124_v11 = vadd.f32 %v1123_v10, %v1122_v7  ;;  %v1191_v12 = vpop.f32.mrb[17].mxu1  ;;  %v889_v7 = vmul.f32 (!%p1058_p11), 0.2, %v865_v63  ;;  %vm879_vm3 = vcmp.ge.f32.partialorder (!%p1058_p11), %v867_v1, 0.0  ;;  %v891_v10 = vmul.f32 (!%p1058_p11), 0.2, %v867_v1 }
 0x158   : > { %v805_v13 = vadd.f32 %v775_v8, %v431_v6  ;;  %v1192_v14 = vadd.f32 %v1191_v12, %v1190_v9  ;;  %v868_v4 = vadd.f32 (!%p1058_p11), %v1651_v47, %v849_v59  ;;  %v890_v8 = vmul.f32 (!%p1058_p11), 0.2, %v866_v0 }
 0x159   : > { %v1125_v16 = vpop.f32.mrb[18].mxu0  ;;  %v831_v56 = vld [vmem:[#allocation2 + $0x28] sm:$0xff] (!%p1058_p11)  ;;  %v900_v9 = vsel (!%p1058_p11), %vm876_vm0, %v864_v58, %v888_v3 }
 0x15a   : > { %817 = vst [vmem:[#allocation2 + $0x38] sm:$0xff] %v805_v13  ;;  %v780_v17 = vadd.f32 %v1192_v14, %v1124_v11  ;;  %v1193_v18 = vpop.f32.mrb[18].mxu1  ;;  %v1126_v19 = vpop.f32.mrb[19].mxu0  ;;  %v850_v60 = vmul.f32 (!%p1058_p11), %v1646_v46, %v831_v56  ;;  %vm880_vm4 = vcmp.ge.f32.partialorder (!%p1058_p11), %v868_v4, 0.0  ;;  %912 = vst [vmem:[%s1732_s4] sm:$0xff] (!%p1058_p11), %v900_v9  ;;  %v901_v13 = vsel (!%p1058_p11), %vm877_vm1, %v865_v63, %v889_v7 }
 0x15b   : > { %v1127_v20 = vadd.f32 %v1126_v19, %v1125_v16  ;;  %v1194_v21 = vpop.f32.mrb[19].mxu1  ;;  %v902_v14 = vsel (!%p1058_p11), %vm878_vm2, %v866_v0, %v890_v8  ;;  %913 = vst [vmem:[%s1732_s4 + $0x8] sm:$0xff] (!%p1058_p11), %v901_v13  ;;  %v903_v16 = vsel (!%p1058_p11), %vm879_vm3, %v867_v1, %v891_v10 }
 0x15c   : > { %v806_v22 = vadd.f32 %v780_v17, %v432_v15  ;;  %v1195_v23 = vadd.f32 %v1194_v21, %v1193_v18  ;;  %v869_v5 = vadd.f32 (!%p1058_p11), %v1651_v47, %v850_v60  ;;  %v892_v15 = vmul.f32 (!%p1058_p11), 0.2, %v868_v4  ;;  %914 = vst [vmem:[%s1732_s4 + $0x10] sm:$0xff] (!%p1058_p11), %v902_v14  ;;  %915 = vst [vmem:[%s1732_s4 + $0x18] sm:$0xff] (!%p1058_p11), %v903_v16 }
 0x15d   : > { %v1128_v25 = vpop.f32.mrb[20].mxu0  ;;  %v832_v57 = vld [vmem:[#allocation2 + $0x30] sm:$0xff] (!%p1058_p11) }
 0x15e   : > { %818 = vst [vmem:[#allocation2 + $0x40] sm:$0xff] %v806_v22  ;;  %v785_v26 = vadd.f32 %v1195_v23, %v1127_v20  ;;  %v1196_v27 = vpop.f32.mrb[20].mxu1  ;;  %v1129_v28 = vpop.f32.mrb[21].mxu0  ;;  %v851_v61 = vmul.f32 (!%p1058_p11), %v1646_v46, %v832_v57  ;;  %vm881_vm5 = vcmp.ge.f32.partialorder (!%p1058_p11), %v869_v5, 0.0  ;;  %v893_v17 = vmul.f32 (!%p1058_p11), 0.2, %v869_v5 }
 0x15f   : > { %v1130_v29 = vadd.f32 %v1129_v28, %v1128_v25  ;;  %v1197_v30 = vpop.f32.mrb[21].mxu1  ;;  %v904_v20 = vsel (!%p1058_p11), %vm880_vm4, %v868_v4, %v892_v15 }
 0x160   : > { %v807_v31 = vadd.f32 %v785_v26, %v433_v24  ;;  %v1198_v32 = vadd.f32 %v1197_v30, %v1196_v27  ;;  %v870_v18 = vadd.f32 (!%p1058_p11), %v1651_v47, %v851_v61  ;;  %916 = vst [vmem:[%s1732_s4 + $0x20] sm:$0xff] (!%p1058_p11), %v904_v20  ;;  %v905_v25 = vsel (!%p1058_p11), %vm881_vm5, %v869_v5, %v893_v17 }
 0x161   : > { %v1131_v34 = vpop.f32.mrb[22].mxu0  ;;  %v833_v62 = vld [vmem:[#allocation2 + $0x38] sm:$0xff] (!%p1058_p11)  ;;  %917 = vst [vmem:[%s1732_s4 + $0x28] sm:$0xff] (!%p1058_p11), %v905_v25 }
 0x162   : > { %819 = vst [vmem:[#allocation2 + $0x48] sm:$0xff] %v807_v31  ;;  %v790_v35 = vadd.f32 %v1198_v32, %v1130_v29  ;;  %v1199_v36 = vpop.f32.mrb[22].mxu1  ;;  %v1132_v37 = vpop.f32.mrb[23].mxu0  ;;  %v852_v2 = vmul.f32 (!%p1058_p11), %v1646_v46, %v833_v62  ;;  %vm882_vm6 = vcmp.ge.f32.partialorder (!%p1058_p11), %v870_v18, 0.0  ;;  %v894_v26 = vmul.f32 (!%p1058_p11), 0.2, %v870_v18 }
 0x163   : > { %v1133_v38 = vadd.f32 %v1132_v37, %v1131_v34  ;;  %v1200_v39 = vpop.f32.mrb[23].mxu1 }
 0x164   : > { %v808_v40 = vadd.f32 %v790_v35, %v434_v33  ;;  %v1201_v41 = vadd.f32 %v1200_v39, %v1199_v36  ;;  %825 = sbr.rel (%p1058_p11) target bundleno = 378 (0x17a), region = 67  ;;  %v871_v19 = vadd.f32 (!%p1058_p11), %v1651_v47, %v852_v2  ;;  %v906_v31 = vsel (!%p1058_p11), %vm882_vm6, %v870_v18, %v894_v26 }
 0x165   : > { %v834_v6 = vld [vmem:[#allocation2 + $0x40] sm:$0xff] (!%p1058_p11)  ;;  %918 = vst [vmem:[%s1732_s4 + $0x30] sm:$0xff] (!%p1058_p11), %v906_v31 }
 0x166   : > { %820 = vst [vmem:[#allocation2 + $0x50] sm:$0xff] %v808_v40  ;;  %v795_v43 = vadd.f32 %v1201_v41, %v1133_v38  ;;  %v853_v21 = vmul.f32 (!%p1058_p11), %v1646_v46, %v834_v6  ;;  %vm883_vm7 = vcmp.ge.f32.partialorder (!%p1058_p11), %v871_v19, 0.0  ;;  %v895_v27 = vmul.f32 (!%p1058_p11), 0.2, %v871_v19 }
 0x168   : > { %v809_v44 = vadd.f32 %v795_v43, %v435_v42  ;;  %v872_v28 = vadd.f32 (!%p1058_p11), %v1651_v47, %v853_v21  ;;  %v907_v33 = vsel (!%p1058_p11), %vm883_vm7, %v871_v19, %v895_v27 }
 0x169   : > { %v835_v11 = vld [vmem:[#allocation2 + $0x48] sm:$0xff] (!%p1058_p11)  ;;  %919 = vst [vmem:[%s1732_s4 + $0x38] sm:$0xff] (!%p1058_p11), %v907_v33 }
 0x16a   : > { %821 = vst [vmem:[#allocation2 + $0x58] sm:$0xff] %v809_v44  ;;  %v854_v22 = vmul.f32 (!%p1058_p11), %v1646_v46, %v835_v11  ;;  %vm884_vm8 = vcmp.ge.f32.partialorder (!%p1058_p11), %v872_v28, 0.0  ;;  %v896_v34 = vmul.f32 (!%p1058_p11), 0.2, %v872_v28 }
 0x16c   : > { %v873_v29 = vadd.f32 %v1651_v47, %v854_v22  ;;  %v908_v38 = vsel %vm884_vm8, %v872_v28, %v896_v34 }
 0x16d   : > { %v836_v12 = vld [vmem:[#allocation2 + $0x50] sm:$0xff]  ;;  %920 = vst [vmem:[%s1732_s4 + $0x40] sm:$0xff] %v908_v38 }
 0x16e   : > { %v855_v23 = vmul.f32 %v1646_v46, %v836_v12  ;;  %vm885_vm9 = vcmp.ge.f32.partialorder %v873_v29, 0.0  ;;  %v897_v35 = vmul.f32 0.2, %v873_v29 }
 0x170   : > { %v874_v30 = vadd.f32 %v1651_v47, %v855_v23  ;;  %v909_v39 = vsel %vm885_vm9, %v873_v29, %v897_v35 }
 0x171   : > { %v837_v24 = vld [vmem:[#allocation2 + $0x58] sm:$0xff]  ;;  %921 = vst [vmem:[%s1732_s4 + $0x48] sm:$0xff] %v909_v39 }
 0x172   : > { %v856_v32 = vmul.f32 %v1646_v46, %v837_v24  ;;  %vm886_vm10 = vcmp.ge.f32.partialorder %v874_v30, 0.0  ;;  %v898_v36 = vmul.f32 0.2, %v874_v30 }
 0x174   : > { %v875_v37 = vadd.f32 %v1651_v47, %v856_v32  ;;  %v910_v40 = vsel %vm886_vm10, %v874_v30, %v898_v36 }
 0x175   : > { %922 = vst [vmem:[%s1732_s4 + $0x50] sm:$0xff] %v910_v40 }
 0x176   : > { %vm887_vm11 = vcmp.ge.f32.partialorder %v875_v37, 0.0  ;;  %v899_v41 = vmul.f32 0.2, %v875_v37 }
 0x178   : > { %v911_v42 = vsel %vm887_vm11, %v875_v37, %v899_v41 }
 0x179   : > { %923 = vst [vmem:[%s1732_s4 + $0x58] sm:$0xff] %v911_v42 }
 0x17a PF: > { %s14_s19 = sadd.s32 1, %s1347_s19   ;;  %s1733_s15 = smov %s1335_s16 }
 0x17b   : > { %p11_p12 = scmp.ge.s32.totalorder %s14_s19, 6   ;;  %s1734_s16 = smov %s1410_s23 }
 0x17c   : > { %s1735_s17 = smov %s1343_s18  ;;  %s1736_s18 = smov %s1738_s20 }
 0x17d   :  { %13 = sbr.rel (!%p11_p12) target bundleno = 3 (0x3), region = 111 }

// kernel: forward.9
= control target key start
LH: loop header
LB: loop body
LE: loop exit
PB: predicated region body
PF: predicated region fallthrough
CT: control target
= control target key end

     0   :  { %s1524_s15 = smov 0   ;;  %s1526_s16 = smov 0   ;;  %s1906_s0 = inlined_call_operand.vmem [shape: f32[256,4096], index: 0, kind: input, shape index: {}]   ;;  %s1907_s1 = inlined_call_operand.vmem [shape: f32[4096,128], index: 1, kind: input, shape index: {}]   ;;  %s1908_s2 = inlined_call_operand.vmem [shape: f32[1,128], index: 2, kind: input, shape index: {}]   ;;  %s1909_s3 = inlined_call_operand.vmem [shape: f32[1,128], index: 3, kind: input, shape index: {}]   ;;  %s1910_s4 = inlined_call_operand.vmem [shape: f32[256,128], index: 4, kind: output, shape index: {}]  }
   0x1   :  { %s1528_s17 = smov 0   ;;  %s1530_s18 = smov 0  }
   0x2   :  { %s1532_s19 = smov 0   ;;  %s1534_s20 = smov 0  }
   0x3   :  { %s1536_s21 = smov 0  }
   0x4 LB: > { %s26_s22 = sadd.s32 1, %s1488_s19  ;;  %s33_s23 = sadd.s32 1, %s1492_s20  ;;  %s1496_s21 = sphi %s1536_s21, %s14_s21   ;;  %s1492_s20 = sphi %s1534_s20, %s1916_s20   ;;  %s1488_s19 = sphi %s1532_s19, %s1915_s19   ;;  %s1484_s18 = sphi %s1530_s18, %s1914_s18   ;;  %s1480_s17 = sphi %s1528_s17, %s1913_s17   ;;  %s1476_s16 = sphi %s1526_s16, %s1912_s16   ;;  %s1472_s15 = sphi %s1524_s15, %s1911_s15  }
   0x5   : > { %p27_p0 = scmp.ge.s32.totalorder %s26_s22, 8  ;;  %p49_p1 = scmp.ne.s32.totalorder %s1476_s16, %s1472_s15 }
   0x6   : > { %p50_p2 = scmp.eq.s32.totalorder %s1496_s21, 0  ;;  %s42_s27 = sadd.s32 1, %s1476_s16 }
   0x7   : > { %s1918_s22 = smov (%p27_p0, %s26_s22), 0  ;;  %s1920_s23 = smov (!%p27_p0, %s33_s23), %s1492_s20 }
   0x8   : > { %p51_p3 = por %p50_p2, %p49_p1  ;;  %p35_p4 = scmp.ge.s32.totalorder %s1920_s23, 2 }
   0x9   : > { %s38_s24 = ssub.s32 %s1488_s19, %s1918_s22  ;;  %p1142_p6 = scmp.ge.s32.totalorder %s1496_s21, 16 }
   0xa   : > { %s1922_s23 = smov (%p35_p4, %s1920_s23), 0 }
   0xb   : > { %s37_s25 = ssub.s32 %s1492_s20, %s1922_s23  ;;  %195 = sbr.rel (%p1142_p6) target bundleno = 57 (0x39), region = 24 }
   0xc   : > { %s39_s26 = sor.u32 %s38_s24, %s37_s25 }
   0xd   : > { %p40_p5 = scmp.eq.s32.totalorder %s39_s26, 0 }
   0xf   : > { %s1575_s28 = scalar_select %p40_p5, %s1476_s16, %s42_s27  }
  0x12   : > { %198 = sbr.rel (!%p51_p3) target bundleno = 57 (0x39), region = 28  ;;  %s200_s29 = sand.u32 (%p51_p3), 1, %s1476_s16  }
  0x13   : > { %s1145_s30 = sshll.u32 (%p51_p3), %s1488_s19, 2  ;;  %s1143_s5 = sshll.u32 (%p51_p3), %s200_s29, 9 }
  0x14   : > { %s1160_s6 = sshll.u32 (%p51_p3), %s1492_s20, 9  ;;  %s1589_s12 = scalar_lea.vmem (%p51_p3), [#allocation3], %s1143_s5 }
  0x15   : > { %s206_s7 = sadd.s32 (%p51_p3), %s1160_s6, %s1145_s30 }
  0x16   : > { %s1147_s8 = sshll.u32 (%p51_p3), %s206_s7, 3 }
  0x17   : > { %s1584_s11 = scalar_lea.vmem (%p51_p3), %s1906_s0, %s1147_s8 }
  0x18   : > { %v221_v0 = vld [vmem:[%s1584_s11] sm:$0xff] (%p51_p3)  ;;  %v223_v1 = vld [vmem:[%s1584_s11 + $0x8] sm:$0xff] (%p51_p3)  ;;  %v225_v2 = vld [vmem:[%s1584_s11 + $0x10] sm:$0xff] (%p51_p3) }
  0x19   : > { %222 = vst [vmem:[%s1589_s12] sm:$0xff] %v221_v0  ;;  %224 = vst [vmem:[%s1589_s12 + $0x8] sm:$0xff] %v223_v1  ;;  %v227_v3 = vld [vmem:[%s1584_s11 + $0x18] sm:$0xff]  ;;  %v229_v4 = vld [vmem:[%s1584_s11 + $0x100] sm:$0xff] }
  0x1a   : > { %226 = vst [vmem:[%s1589_s12 + $0x10] sm:$0xff] %v225_v2  ;;  %v231_v5 = vld [vmem:[%s1584_s11 + $0x108] sm:$0xff]  ;;  %228 = vst [vmem:[%s1589_s12 + $0x18] sm:$0xff] %v227_v3  ;;  %v233_v6 = vld [vmem:[%s1584_s11 + $0x110] sm:$0xff] }
  0x1b   : > { %230 = vst [vmem:[%s1589_s12 + $0x20] sm:$0xff] %v229_v4  ;;  %232 = vst [vmem:[%s1589_s12 + $0x28] sm:$0xff] %v231_v5  ;;  %v235_v7 = vld [vmem:[%s1584_s11 + $0x118] sm:$0xff]  ;;  %v237_v8 = vld [vmem:[%s1584_s11 + $0x200] sm:$0xff] }
  0x1c   : > { %234 = vst [vmem:[%s1589_s12 + $0x30] sm:$0xff] %v233_v6  ;;  %236 = vst [vmem:[%s1589_s12 + $0x38] sm:$0xff] %v235_v7  ;;  %v239_v9 = vld [vmem:[%s1584_s11 + $0x208] sm:$0xff]  ;;  %v241_v10 = vld [vmem:[%s1584_s11 + $0x210] sm:$0xff] }
  0x1d   : > { %238 = vst [vmem:[%s1589_s12 + $0x40] sm:$0xff] %v237_v8  ;;  %v243_v11 = vld [vmem:[%s1584_s11 + $0x218] sm:$0xff]  ;;  %240 = vst [vmem:[%s1589_s12 + $0x48] sm:$0xff] %v239_v9  ;;  %v245_v12 = vld [vmem:[%s1584_s11 + $0x300] sm:$0xff] }
  0x1e   : > { %242 = vst [vmem:[%s1589_s12 + $0x50] sm:$0xff] %v241_v10  ;;  %244 = vst [vmem:[%s1589_s12 + $0x58] sm:$0xff] %v243_v11  ;;  %v247_v13 = vld [vmem:[%s1584_s11 + $0x308] sm:$0xff]  ;;  %v249_v14 = vld [vmem:[%s1584_s11 + $0x310] sm:$0xff] }
  0x1f   : > { %246 = vst [vmem:[%s1589_s12 + $0x60] sm:$0xff] %v245_v12  ;;  %248 = vst [vmem:[%s1589_s12 + $0x68] sm:$0xff] %v247_v13  ;;  %v251_v15 = vld [vmem:[%s1584_s11 + $0x318] sm:$0xff]  ;;  %v253_v16 = vld [vmem:[%s1584_s11 + $0x400] sm:$0xff] }
  0x20   : > { %250 = vst [vmem:[%s1589_s12 + $0x70] sm:$0xff] %v249_v14  ;;  %v255_v17 = vld [vmem:[%s1584_s11 + $0x408] sm:$0xff]  ;;  %252 = vst [vmem:[%s1589_s12 + $0x78] sm:$0xff] %v251_v15  ;;  %v257_v18 = vld [vmem:[%s1584_s11 + $0x410] sm:$0xff] }
  0x21   : > { %254 = vst [vmem:[%s1589_s12 + $0x80] sm:$0xff] %v253_v16  ;;  %256 = vst [vmem:[%s1589_s12 + $0x88] sm:$0xff] %v255_v17  ;;  %v259_v19 = vld [vmem:[%s1584_s11 + $0x418] sm:$0xff]  ;;  %v261_v20 = vld [vmem:[%s1584_s11 + $0x500] sm:$0xff] }
  0x22   : > { %258 = vst [vmem:[%s1589_s12 + $0x90] sm:$0xff] %v257_v18  ;;  %260 = vst [vmem:[%s1589_s12 + $0x98] sm:$0xff] %v259_v19  ;;  %v263_v21 = vld [vmem:[%s1584_s11 + $0x508] sm:$0xff]  ;;  %v265_v22 = vld [vmem:[%s1584_s11 + $0x510] sm:$0xff] }
  0x23   : > { %262 = vst [vmem:[%s1589_s12 + $0xa0] sm:$0xff] %v261_v20  ;;  %v267_v23 = vld [vmem:[%s1584_s11 + $0x518] sm:$0xff]  ;;  %264 = vst [vmem:[%s1589_s12 + $0xa8] sm:$0xff] %v263_v21  ;;  %v269_v24 = vld [vmem:[%s1584_s11 + $0x600] sm:$0xff] }
  0x24   : > { %266 = vst [vmem:[%s1589_s12 + $0xb0] sm:$0xff] %v265_v22  ;;  %268 = vst [vmem:[%s1589_s12 + $0xb8] sm:$0xff] %v267_v23  ;;  %v271_v25 = vld [vmem:[%s1584_s11 + $0x608] sm:$0xff]  ;;  %v273_v26 = vld [vmem:[%s1584_s11 + $0x610] sm:$0xff] }
  0x25   : > { %270 = vst [vmem:[%s1589_s12 + $0xc0] sm:$0xff] %v269_v24  ;;  %272 = vst [vmem:[%s1589_s12 + $0xc8] sm:$0xff] %v271_v25  ;;  %v275_v27 = vld [vmem:[%s1584_s11 + $0x618] sm:$0xff]  ;;  %v277_v28 = vld [vmem:[%s1584_s11 + $0x700] sm:$0xff] }
  0x26   : > { %274 = vst [vmem:[%s1589_s12 + $0xd0] sm:$0xff] %v273_v26  ;;  %v279_v29 = vld [vmem:[%s1584_s11 + $0x708] sm:$0xff]  ;;  %276 = vst [vmem:[%s1589_s12 + $0xd8] sm:$0xff] %v275_v27  ;;  %v281_v30 = vld [vmem:[%s1584_s11 + $0x710] sm:$0xff] }
  0x27   : > { %278 = vst [vmem:[%s1589_s12 + $0xe0] sm:$0xff] %v277_v28  ;;  %280 = vst [vmem:[%s1589_s12 + $0xe8] sm:$0xff] %v279_v29  ;;  %v283_v31 = vld [vmem:[%s1584_s11 + $0x718] sm:$0xff]  ;;  %v285_v32 = vld [vmem:[%s1584_s11 + $0x800] sm:$0xff] }
  0x28   : > { %282 = vst [vmem:[%s1589_s12 + $0xf0] sm:$0xff] %v281_v30  ;;  %284 = vst [vmem:[%s1589_s12 + $0xf8] sm:$0xff] %v283_v31  ;;  %v287_v33 = vld [vmem:[%s1584_s11 + $0x808] sm:$0xff]  ;;  %v289_v34 = vld [vmem:[%s1584_s11 + $0x810] sm:$0xff] }
  0x29   : > { %286 = vst [vmem:[%s1589_s12 + $0x100] sm:$0xff] %v285_v32  ;;  %v291_v35 = vld [vmem:[%s1584_s11 + $0x818] sm:$0xff]  ;;  %288 = vst [vmem:[%s1589_s12 + $0x108] sm:$0xff] %v287_v33  ;;  %v293_v36 = vld [vmem:[%s1584_s11 + $0x900] sm:$0xff] }
  0x2a   : > { %290 = vst [vmem:[%s1589_s12 + $0x110] sm:$0xff] %v289_v34  ;;  %292 = vst [vmem:[%s1589_s12 + $0x118] sm:$0xff] %v291_v35  ;;  %v295_v37 = vld [vmem:[%s1584_s11 + $0x908] sm:$0xff]  ;;  %v297_v38 = vld [vmem:[%s1584_s11 + $0x910] sm:$0xff] }
  0x2b   : > { %294 = vst [vmem:[%s1589_s12 + $0x120] sm:$0xff] %v293_v36  ;;  %296 = vst [vmem:[%s1589_s12 + $0x128] sm:$0xff] %v295_v37  ;;  %v299_v39 = vld [vmem:[%s1584_s11 + $0x918] sm:$0xff]  ;;  %v301_v40 = vld [vmem:[%s1584_s11 + $0xa00] sm:$0xff] }
  0x2c   : > { %298 = vst [vmem:[%s1589_s12 + $0x130] sm:$0xff] %v297_v38  ;;  %v303_v41 = vld [vmem:[%s1584_s11 + $0xa08] sm:$0xff]  ;;  %300 = vst [vmem:[%s1589_s12 + $0x138] sm:$0xff] %v299_v39  ;;  %v305_v42 = vld [vmem:[%s1584_s11 + $0xa10] sm:$0xff] }
  0x2d   : > { %302 = vst [vmem:[%s1589_s12 + $0x140] sm:$0xff] %v301_v40  ;;  %304 = vst [vmem:[%s1589_s12 + $0x148] sm:$0xff] %v303_v41  ;;  %v307_v43 = vld [vmem:[%s1584_s11 + $0xa18] sm:$0xff]  ;;  %v309_v44 = vld [vmem:[%s1584_s11 + $0xb00] sm:$0xff] }
  0x2e   : > { %306 = vst [vmem:[%s1589_s12 + $0x150] sm:$0xff] %v305_v42  ;;  %308 = vst [vmem:[%s1589_s12 + $0x158] sm:$0xff] %v307_v43  ;;  %v311_v45 = vld [vmem:[%s1584_s11 + $0xb08] sm:$0xff]  ;;  %v313_v46 = vld [vmem:[%s1584_s11 + $0xb10] sm:$0xff] }
  0x2f   : > { %310 = vst [vmem:[%s1589_s12 + $0x160] sm:$0xff] %v309_v44  ;;  %v315_v47 = vld [vmem:[%s1584_s11 + $0xb18] sm:$0xff]  ;;  %312 = vst [vmem:[%s1589_s12 + $0x168] sm:$0xff] %v311_v45  ;;  %v317_v48 = vld [vmem:[%s1584_s11 + $0xc00] sm:$0xff] }
  0x30   : > { %314 = vst [vmem:[%s1589_s12 + $0x170] sm:$0xff] %v313_v46  ;;  %316 = vst [vmem:[%s1589_s12 + $0x178] sm:$0xff] %v315_v47  ;;  %v319_v49 = vld [vmem:[%s1584_s11 + $0xc08] sm:$0xff]  ;;  %v321_v50 = vld [vmem:[%s1584_s11 + $0xc10] sm:$0xff] }
  0x31   : > { %318 = vst [vmem:[%s1589_s12 + $0x180] sm:$0xff] %v317_v48  ;;  %320 = vst [vmem:[%s1589_s12 + $0x188] sm:$0xff] %v319_v49  ;;  %v323_v51 = vld [vmem:[%s1584_s11 + $0xc18] sm:$0xff]  ;;  %v325_v52 = vld [vmem:[%s1584_s11 + $0xd00] sm:$0xff] }
  0x32   : > { %322 = vst [vmem:[%s1589_s12 + $0x190] sm:$0xff] %v321_v50  ;;  %v327_v53 = vld [vmem:[%s1584_s11 + $0xd08] sm:$0xff]  ;;  %324 = vst [vmem:[%s1589_s12 + $0x198] sm:$0xff] %v323_v51  ;;  %v329_v54 = vld [vmem:[%s1584_s11 + $0xd10] sm:$0xff] }
  0x33   : > { %326 = vst [vmem:[%s1589_s12 + $0x1a0] sm:$0xff] %v325_v52  ;;  %328 = vst [vmem:[%s1589_s12 + $0x1a8] sm:$0xff] %v327_v53  ;;  %v331_v55 = vld [vmem:[%s1584_s11 + $0xd18] sm:$0xff]  ;;  %v333_v56 = vld [vmem:[%s1584_s11 + $0xe00] sm:$0xff] }
  0x34   : > { %330 = vst [vmem:[%s1589_s12 + $0x1b0] sm:$0xff] %v329_v54  ;;  %332 = vst [vmem:[%s1589_s12 + $0x1b8] sm:$0xff] %v331_v55  ;;  %v335_v57 = vld [vmem:[%s1584_s11 + $0xe08] sm:$0xff]  ;;  %v337_v58 = vld [vmem:[%s1584_s11 + $0xe10] sm:$0xff] }
  0x35   : > { %334 = vst [vmem:[%s1589_s12 + $0x1c0] sm:$0xff] %v333_v56  ;;  %v339_v59 = vld [vmem:[%s1584_s11 + $0xe18] sm:$0xff]  ;;  %336 = vst [vmem:[%s1589_s12 + $0x1c8] sm:$0xff] %v335_v57  ;;  %v341_v60 = vld [vmem:[%s1584_s11 + $0xf00] sm:$0xff] }
  0x36   : > { %338 = vst [vmem:[%s1589_s12 + $0x1d0] sm:$0xff] %v337_v58  ;;  %340 = vst [vmem:[%s1589_s12 + $0x1d8] sm:$0xff] %v339_v59  ;;  %v343_v61 = vld [vmem:[%s1584_s11 + $0xf08] sm:$0xff]  ;;  %v345_v62 = vld [vmem:[%s1584_s11 + $0xf10] sm:$0xff] }
  0x37   : > { %342 = vst [vmem:[%s1589_s12 + $0x1e0] sm:$0xff] %v341_v60  ;;  %344 = vst [vmem:[%s1589_s12 + $0x1e8] sm:$0xff] %v343_v61  ;;  %v347_v63 = vld [vmem:[%s1584_s11 + $0xf18] sm:$0xff] }
  0x38   : > { %346 = vst [vmem:[%s1589_s12 + $0x1f0] sm:$0xff] %v345_v62  ;;  %348 = vst [vmem:[%s1589_s12 + $0x1f8] sm:$0xff] %v347_v63 }
  0x39 PF: > { %p1148_p7 = scmp.ge.s32.totalorder %s1496_s21, 1  ;;  %p365_p8 = scmp.lt.s32.totalorder %s1496_s21, 17 }
  0x3b   : > { %p366_p9 = pnand %p1148_p7, %p365_p8 }
  0x3c   : > { %s372_s13 = sand.u32 (!%p366_p9), 1, %s1472_s15   ;;  %s1150_s14 = sshll.u32 (!%p366_p9), %s1480_s17, 6 }
  0x3d   : > { %369 = sbr.rel (%p366_p9) target bundleno = 407 (0x197), region = 55  ;;  %s1149_s24 = sshll.u32 (!%p366_p9), %s372_s13, 9 }
  0x3e   : > { %p417_p10 = scmp.lt.s32.totalorder (!%p366_p9), %s1150_s14, 511  ;;  %s1152_s25 = sshll.u32 (!%p366_p9), %s1484_s18, 4 }
  0x3f   : > { %p432_p11 = scmp.lt.s32.totalorder (!%p366_p9), %s1152_s25, 31  ;;  %s1731_s15 = scalar_lea.vmem (!%p366_p9), [#allocation3], %s1149_s24 }
  0x40   : > { %p1154_p12 = scmp.ne.s32.totalorder (!%p366_p9), %s1480_s17, 0 }
  0x44   : > { %s1924_s14 = smov (!%p417_p10, %s1150_s14), 511  ;;  %s1926_s25 = smov (!%p432_p11, %s1152_s25), 31 }
  0x45   : > { %s1151_s26 = sshll.u32 %s1924_s14, 3  ;;  %s1153_s5 = sshll.u32 %s1926_s25, 3  ;;  %v1498_v0 = vmov (!%p1154_p12), 0.0  }
  0x46   : > { %s1724_s30 = scalar_lea.vmem %s1907_s1, %s1151_s26  ;;  %s1729_s8 = scalar_lea.vmem %s1910_s4, %s1153_s5  ;;  %444 = vst [vmem:[#allocation2] sm:$0xff] (!%p1154_p12), %v1498_v0  ;;  %445 = vst [vmem:[#allocation2 + $0x8] sm:$0xff] (!%p1154_p12), %v1498_v0 }
  0x47   : > { %443 = sbr.rel (%p1154_p12) target bundleno = 78 (0x4e), region = 63  ;;  %446 = vst [vmem:[#allocation2 + $0x10] sm:$0xff] (!%p1154_p12), %v1498_v0  ;;  %447 = vst [vmem:[#allocation2 + $0x18] sm:$0xff] (!%p1154_p12), %v1498_v0 }
  0x48   : > { %448 = vst [vmem:[#allocation2 + $0x20] sm:$0xff] (!%p1154_p12), %v1498_v0  ;;  %449 = vst [vmem:[#allocation2 + $0x28] sm:$0xff] (!%p1154_p12), %v1498_v0 }
  0x49   : > { %450 = vst [vmem:[#allocation2 + $0x30] sm:$0xff] (!%p1154_p12), %v1498_v0  ;;  %451 = vst [vmem:[#allocation2 + $0x38] sm:$0xff] (!%p1154_p12), %v1498_v0 }
  0x4a   : > { %452 = vst [vmem:[#allocation2 + $0x40] sm:$0xff] (!%p1154_p12), %v1498_v0  ;;  %453 = vst [vmem:[#allocation2 + $0x48] sm:$0xff] (!%p1154_p12), %v1498_v0 }
  0x4b   : > { %454 = vst [vmem:[#allocation2 + $0x50] sm:$0xff] (!%p1154_p12), %v1498_v0  ;;  %455 = vst [vmem:[#allocation2 + $0x58] sm:$0xff] (!%p1154_p12), %v1498_v0 }
  0x4c   : > { %456 = vst [vmem:[#allocation2 + $0x60] sm:$0xff] (!%p1154_p12), %v1498_v0  ;;  %457 = vst [vmem:[#allocation2 + $0x68] sm:$0xff] (!%p1154_p12), %v1498_v0 }
  0x4d   : > { %458 = vst [vmem:[#allocation2 + $0x70] sm:$0xff] (!%p1154_p12), %v1498_v0  ;;  %459 = vst [vmem:[#allocation2 + $0x78] sm:$0xff] (!%p1154_p12), %v1498_v0 }
  0x4e PF: > { %v556_v1 = vld [vmem:[%s1724_s30 + $0x80] sm:$0xff]  ;;  %v557_v2 = vld [vmem:[%s1724_s30 + $0x88] sm:$0xff]  ;;  %v558_v12 = vld [vmem:[%s1724_s30 + $0x90] sm:$0xff]  ;;  %p1155_p13 = scmp.ne.s32.totalorder %s1480_s17, 7 }
  0x4f   : > { %v588_v3 = vld [vmem:[%s1724_s30 + $0x180] sm:$0xff]  ;;  %v1321_v4 = vpack.c.bf16 %v557_v2, %v556_v1  ;;  %v589_v5 = vld [vmem:[%s1724_s30 + $0x188] sm:$0xff]  ;;  %v559_v14 = vld [vmem:[%s1724_s30 + $0x98] sm:$0xff] }
  0x50   : > { %v540_v6 = vld [vmem:[%s1724_s30] sm:$0xff]  ;;  %v541_v7 = vld [vmem:[%s1724_s30 + $0x8] sm:$0xff]  ;;  %v1353_v8 = vpack.c.bf16 %v589_v5, %v588_v3  ;;  %v590_v15 = vld [vmem:[%s1724_s30 + $0x190] sm:$0xff]  ;;  %v1325_v17 = vpack.c.bf16 %v559_v14, %v558_v12 }
  0x51   : > { %v1323_v9 = vpack.c.bf16 %v541_v7, %v540_v6  ;;  %v572_v10 = vld [vmem:[%s1724_s30 + $0x100] sm:$0xff]  ;;  %v573_v11 = vld [vmem:[%s1724_s30 + $0x108] sm:$0xff]  ;;  %1322 = vmatprep.subr.bf16.mxu0 %v1321_v4  ;;  %v591_v16 = vld [vmem:[%s1724_s30 + $0x198] sm:$0xff] }
  0x52   : > { %v1355_v13 = vpack.c.bf16 %v573_v11, %v572_v10  ;;  %1354 = vmatprep.subr.bf16.mxu1 %v1353_v8  ;;  %v1357_v18 = vpack.c.bf16 %v591_v16, %v590_v15  ;;  %v542_v19 = vld [vmem:[%s1724_s30 + $0x10] sm:$0xff]  ;;  %v543_v20 = vld [vmem:[%s1724_s30 + $0x18] sm:$0xff]  ;;  %v560_v24 = vld [vmem:[%s1724_s30 + $0xa0] sm:$0xff] }
  0x53   : > { %1324 = vmatpush3.bf16.msra.mxu0 %v1323_v9  ;;  %v574_v21 = vld [vmem:[%s1724_s30 + $0x110] sm:$0xff]  ;;  %v1327_v22 = vpack.c.bf16 %v543_v20, %v542_v19  ;;  %v575_v23 = vld [vmem:[%s1724_s30 + $0x118] sm:$0xff]  ;;  %v561_v25 = vld [vmem:[%s1724_s30 + $0xa8] sm:$0xff] }
  0x54   : > { %1356 = vmatpush3.bf16.msra.mxu1 %v1355_v13  ;;  %1326 = vmatprep.subr.bf16.mxu0 %v1325_v17  ;;  %v1359_v26 = vpack.c.bf16 %v575_v23, %v574_v21  ;;  %v1329_v27 = vpack.c.bf16 %v561_v25, %v560_v24  ;;  %v592_v28 = vld [vmem:[%s1724_s30 + $0x1a0] sm:$0xff]  ;;  %v593_v29 = vld [vmem:[%s1724_s30 + $0x1a8] sm:$0xff]  ;;  %v562_v36 = vld [vmem:[%s1724_s30 + $0xb0] sm:$0xff] }
  0x55   : > { %1358 = vmatprep.subr.bf16.mxu1 %v1357_v18  ;;  %v544_v30 = vld [vmem:[%s1724_s30 + $0x20] sm:$0xff]  ;;  %v1361_v31 = vpack.c.bf16 %v593_v29, %v592_v28  ;;  %v545_v32 = vld [vmem:[%s1724_s30 + $0x28] sm:$0xff]  ;;  %v563_v37 = vld [vmem:[%s1724_s30 + $0xb8] sm:$0xff] }
  0x56   : > { %v576_v33 = vld [vmem:[%s1724_s30 + $0x120] sm:$0xff]  ;;  %v577_v34 = vld [vmem:[%s1724_s30 + $0x128] sm:$0xff]  ;;  %v1331_v35 = vpack.c.bf16 %v545_v32, %v544_v30  ;;  %v594_v38 = vld [vmem:[%s1724_s30 + $0x1b0] sm:$0xff]  ;;  %v1333_v40 = vpack.c.bf16 %v563_v37, %v562_v36 }
  0x57   : > { %1328 = vmatpush3.bf16.msra.mxu0 %v1327_v22  ;;  %v1363_v39 = vpack.c.bf16 %v577_v34, %v576_v33  ;;  %v595_v41 = vld [vmem:[%s1724_s30 + $0x1b8] sm:$0xff]  ;;  %v546_v42 = vld [vmem:[%s1724_s30 + $0x30] sm:$0xff]  ;;  %v564_v47 = vld [vmem:[%s1724_s30 + $0xc0] sm:$0xff] }
  0x58   : > { %1360 = vmatpush3.bf16.msra.mxu1 %v1359_v26  ;;  %1330 = vmatprep.subr.bf16.mxu0 %v1329_v27  ;;  %v547_v43 = vld [vmem:[%s1724_s30 + $0x38] sm:$0xff]  ;;  %v1365_v44 = vpack.c.bf16 %v595_v41, %v594_v38  ;;  %v578_v45 = vld [vmem:[%s1724_s30 + $0x130] sm:$0xff]  ;;  %v565_v48 = vld [vmem:[%s1724_s30 + $0xc8] sm:$0xff] }
  0x59   : > { %1362 = vmatprep.subr.bf16.mxu1 %v1361_v31  ;;  %v579_v46 = vld [vmem:[%s1724_s30 + $0x138] sm:$0xff]  ;;  %v596_v49 = vld [vmem:[%s1724_s30 + $0x1c0] sm:$0xff]  ;;  %v597_v50 = vld [vmem:[%s1724_s30 + $0x1c8] sm:$0xff]  ;;  %v1335_v51 = vpack.c.bf16 %v547_v43, %v546_v42  ;;  %v1337_v53 = vpack.c.bf16 %v565_v48, %v564_v47 }
  0x5a   : > { %v1367_v52 = vpack.c.bf16 %v579_v46, %v578_v45  ;;  %v548_v54 = vld [vmem:[%s1724_s30 + $0x40] sm:$0xff]  ;;  %v549_v55 = vld [vmem:[%s1724_s30 + $0x48] sm:$0xff]  ;;  %v1369_v57 = vpack.c.bf16 %v597_v50, %v596_v49  ;;  %v566_v59 = vld [vmem:[%s1724_s30 + $0xd0] sm:$0xff] }
  0x5b   : > { %1332 = vmatpush3.bf16.msra.mxu0 %v1331_v35  ;;  %v580_v56 = vld [vmem:[%s1724_s30 + $0x140] sm:$0xff]  ;;  %v581_v58 = vld [vmem:[%s1724_s30 + $0x148] sm:$0xff]  ;;  %v567_v60 = vld [vmem:[%s1724_s30 + $0xd8] sm:$0xff]  ;;  %v1339_v63 = vpack.c.bf16 %v549_v55, %v548_v54 }
  0x5c   : > { %1364 = vmatpush3.bf16.msra.mxu1 %v1363_v39  ;;  %1334 = vmatprep.subr.bf16.mxu0 %v1333_v40  ;;  %v598_v61 = vld [vmem:[%s1724_s30 + $0x1d0] sm:$0xff]  ;;  %v599_v62 = vld [vmem:[%s1724_s30 + $0x1d8] sm:$0xff]  ;;  %v1371_v0 = vpack.c.bf16 %v581_v58, %v580_v56  ;;  %v1341_v1 = vpack.c.bf16 %v567_v60, %v566_v59  ;;  %v568_v7 = vld [vmem:[%s1724_s30 + $0xe0] sm:$0xff] }
  0x5d   : > { %1366 = vmatprep.subr.bf16.mxu1 %v1365_v44  ;;  %v550_v2 = vld [vmem:[%s1724_s30 + $0x50] sm:$0xff]  ;;  %v551_v3 = vld [vmem:[%s1724_s30 + $0x58] sm:$0xff]  ;;  %v1373_v5 = vpack.c.bf16 %v599_v62, %v598_v61  ;;  %v569_v8 = vld [vmem:[%s1724_s30 + $0xe8] sm:$0xff] }
  0x5e   : > { %v582_v4 = vld [vmem:[%s1724_s30 + $0x150] sm:$0xff]  ;;  %v583_v6 = vld [vmem:[%s1724_s30 + $0x158] sm:$0xff]  ;;  %v600_v9 = vld [vmem:[%s1724_s30 + $0x1e0] sm:$0xff]  ;;  %v1343_v11 = vpack.c.bf16 %v551_v3, %v550_v2  ;;  %v1345_v15 = vpack.c.bf16 %v569_v8, %v568_v7 }
  0x5f   : > { %1336 = vmatpush3.bf16.msra.mxu0 %v1335_v51  ;;  %v601_v10 = vld [vmem:[%s1724_s30 + $0x1e8] sm:$0xff]  ;;  %v552_v12 = vld [vmem:[%s1724_s30 + $0x60] sm:$0xff]  ;;  %v1375_v14 = vpack.c.bf16 %v583_v6, %v582_v4  ;;  %v479_v18 = vld [vmem:[%s1731_s15 + $0x18] sm:$0xff] }
  0x60   : > { %1368 = vmatpush3.bf16.msra.mxu1 %v1367_v52  ;;  %1338 = vmatprep.subr.bf16.mxu0 %v1337_v53  ;;  %v553_v13 = vld [vmem:[%s1724_s30 + $0x68] sm:$0xff]  ;;  %v584_v16 = vld [vmem:[%s1724_s30 + $0x160] sm:$0xff]  ;;  %v1377_v19 = vpack.c.bf16 %v601_v10, %v600_v9  ;;  %v570_v21 = vld [vmem:[%s1724_s30 + $0xf0] sm:$0xff] }
  0x61   : > { %1370 = vmatprep.subr.bf16.mxu1 %v1369_v57  ;;  %v477_v17 = vld [vmem:[%s1731_s15 + $0x8] sm:$0xff]  ;;  %v571_v22 = vld [vmem:[%s1724_s30 + $0xf8] sm:$0xff]  ;;  %v602_v23 = vld [vmem:[%s1724_s30 + $0x1f0] sm:$0xff]  ;;  %813 = vmatprep.mubr.f32.mxu1 %v479_v18  ;;  %v1347_v25 = vpack.c.bf16 %v553_v13, %v552_v12 }
  0x62   : > { %v585_v20 = vld [vmem:[%s1724_s30 + $0x168] sm:$0xff]  ;;  %668 = vmatprep.mubr.f32.mxu0 %v477_v17  ;;  %v603_v24 = vld [vmem:[%s1724_s30 + $0x1f8] sm:$0xff]  ;;  %v1349_v27 = vpack.c.bf16 %v571_v22, %v570_v21  ;;  %v554_v28 = vld [vmem:[%s1724_s30 + $0x70] sm:$0xff] }
  0x63   : > { %1340 = vmatpush3.bf16.msra.mxu0 %v1339_v63  ;;  %v1379_v26 = vpack.c.bf16 %v585_v20, %v584_v16  ;;  %v555_v29 = vld [vmem:[%s1724_s30 + $0x78] sm:$0xff]  ;;  %v1381_v30 = vpack.c.bf16 %v603_v24, %v602_v23  ;;  %v586_v31 = vld [vmem:[%s1724_s30 + $0x170] sm:$0xff]  ;;  %v476_v35 = vld [vmem:[%s1731_s15] sm:$0xff] }
  0x64   : > { %1372 = vmatpush3.bf16.msra.mxu1 %v1371_v0  ;;  %1342 = vmatprep.subr.bf16.mxu0 %v1341_v1  ;;  %v587_v32 = vld [vmem:[%s1724_s30 + $0x178] sm:$0xff]  ;;  %v1351_v33 = vpack.c.bf16 %v555_v29, %v554_v28  ;;  %v478_v36 = vld [vmem:[%s1731_s15 + $0x10] sm:$0xff]  ;;  %v481_v37 = vld [vmem:[%s1731_s15 + $0x28] sm:$0xff] }
  0x65   : > { %1374 = vmatprep.subr.bf16.mxu1 %v1373_v5  ;;  %v1383_v34 = vpack.c.bf16 %v587_v32, %v586_v31  ;;  %v483_v38 = vld [vmem:[%s1731_s15 + $0x38] sm:$0xff]  ;;  %v480_v39 = vld [vmem:[%s1731_s15 + $0x20] sm:$0xff]  ;;  %v482_v40 = vld [vmem:[%s1731_s15 + $0x30] sm:$0xff] }
  0x66   : > { %v485_v41 = vld [vmem:[%s1731_s15 + $0x48] sm:$0xff]  ;;  %v487_v42 = vld [vmem:[%s1731_s15 + $0x58] sm:$0xff]  ;;  %v484_v43 = vld [vmem:[%s1731_s15 + $0x40] sm:$0xff] }
  0x67   : > { %1344 = vmatpush3.bf16.msra.mxu0 %v1343_v11  ;;  %v486_v44 = vld [vmem:[%s1731_s15 + $0x50] sm:$0xff]  ;;  %v489_v45 = vld [vmem:[%s1731_s15 + $0x68] sm:$0xff]  ;;  %v491_v46 = vld [vmem:[%s1731_s15 + $0x78] sm:$0xff] }
  0x68   : > { %1376 = vmatpush3.bf16.msra.mxu1 %v1375_v14  ;;  %1346 = vmatprep.subr.bf16.mxu0 %v1345_v15  ;;  %v488_v47 = vld [vmem:[%s1731_s15 + $0x60] sm:$0xff]  ;;  %v490_v48 = vld [vmem:[%s1731_s15 + $0x70] sm:$0xff]  ;;  %v493_v49 = vld [vmem:[%s1731_s15 + $0x88] sm:$0xff] }
  0x69   : > { %1378 = vmatprep.subr.bf16.mxu1 %v1377_v19  ;;  %v495_v50 = vld [vmem:[%s1731_s15 + $0x98] sm:$0xff]  ;;  %v492_v51 = vld [vmem:[%s1731_s15 + $0x80] sm:$0xff]  ;;  %v494_v52 = vld [vmem:[%s1731_s15 + $0x90] sm:$0xff] }
  0x6a   : > { %v497_v53 = vld [vmem:[%s1731_s15 + $0xa8] sm:$0xff]  ;;  %v499_v54 = vld [vmem:[%s1731_s15 + $0xb8] sm:$0xff]  ;;  %v496_v55 = vld [vmem:[%s1731_s15 + $0xa0] sm:$0xff] }
  0x6b   : > { %1348 = vmatpush3.bf16.msra.mxu0 %v1347_v25  ;;  %v498_v56 = vld [vmem:[%s1731_s15 + $0xb0] sm:$0xff]  ;;  %v501_v57 = vld [vmem:[%s1731_s15 + $0xc8] sm:$0xff]  ;;  %v503_v58 = vld [vmem:[%s1731_s15 + $0xd8] sm:$0xff] }
  0x6c   : > { %1380 = vmatpush3.bf16.msra.mxu1 %v1379_v26  ;;  %1350 = vmatprep.subr.bf16.mxu0 %v1349_v27  ;;  %v500_v59 = vld [vmem:[%s1731_s15 + $0xc0] sm:$0xff]  ;;  %v502_v60 = vld [vmem:[%s1731_s15 + $0xd0] sm:$0xff]  ;;  %v505_v61 = vld [vmem:[%s1731_s15 + $0xe8] sm:$0xff] }
  0x6d   : > { %1382 = vmatprep.subr.bf16.mxu1 %v1381_v30  ;;  %v507_v62 = vld [vmem:[%s1731_s15 + $0xf8] sm:$0xff]  ;;  %v504_v63 = vld [vmem:[%s1731_s15 + $0xe0] sm:$0xff]  ;;  %v506_v0 = vld [vmem:[%s1731_s15 + $0xf0] sm:$0xff] }
  0x6e   : > { %v509_v1 = vld [vmem:[%s1731_s15 + $0x108] sm:$0xff]  ;;  %v511_v2 = vld [vmem:[%s1731_s15 + $0x118] sm:$0xff]  ;;  %v508_v3 = vld [vmem:[%s1731_s15 + $0x100] sm:$0xff] }
  0x6f   : > { %1352 = vmatpush3.bf16.msra.mxu0 %v1351_v33  ;;  %v510_v4 = vld [vmem:[%s1731_s15 + $0x110] sm:$0xff]  ;;  %v513_v5 = vld [vmem:[%s1731_s15 + $0x128] sm:$0xff]  ;;  %v515_v6 = vld [vmem:[%s1731_s15 + $0x138] sm:$0xff] }
  0x70   : > { %1384 = vmatpush3.bf16.msra.mxu1 %v1383_v34  ;;  %v512_v7 = vld [vmem:[%s1731_s15 + $0x120] sm:$0xff]  ;;  %v514_v8 = vld [vmem:[%s1731_s15 + $0x130] sm:$0xff]  ;;  %v517_v9 = vld [vmem:[%s1731_s15 + $0x148] sm:$0xff] }
  0x71   : > { %v519_v10 = vld [vmem:[%s1731_s15 + $0x158] sm:$0xff]  ;;  %v516_v11 = vld [vmem:[%s1731_s15 + $0x140] sm:$0xff]  ;;  %v518_v12 = vld [vmem:[%s1731_s15 + $0x150] sm:$0xff] }
  0x72   : > { %669 = vmatmul.mubr.f32.vlgmr.msra.gmra.mrb[0].mxu0 %v476_v35  ;;  %v521_v13 = vld [vmem:[%s1731_s15 + $0x168] sm:$0xff]  ;;  %v523_v14 = vld [vmem:[%s1731_s15 + $0x178] sm:$0xff]  ;;  %v520_v15 = vld [vmem:[%s1731_s15 + $0x160] sm:$0xff] }
  0x73   : > { %814 = vmatmul.mubr.f32.vlgmr.msra.gmra.mrb[0].mxu1 %v478_v36  ;;  %673 = vmatprep.mubr.f32.mxu0 %v481_v37  ;;  %v522_v16 = vld [vmem:[%s1731_s15 + $0x170] sm:$0xff]  ;;  %v525_v17 = vld [vmem:[%s1731_s15 + $0x188] sm:$0xff]  ;;  %v527_v18 = vld [vmem:[%s1731_s15 + $0x198] sm:$0xff] }
  0x74   : > { %818 = vmatprep.mubr.f32.mxu1 %v483_v38  ;;  %v524_v19 = vld [vmem:[%s1731_s15 + $0x180] sm:$0xff]  ;;  %v526_v20 = vld [vmem:[%s1731_s15 + $0x190] sm:$0xff]  ;;  %v529_v21 = vld [vmem:[%s1731_s15 + $0x1a8] sm:$0xff] }
  0x75   : > { %v531_v22 = vld [vmem:[%s1731_s15 + $0x1b8] sm:$0xff]  ;;  %v528_v23 = vld [vmem:[%s1731_s15 + $0x1a0] sm:$0xff]  ;;  %v530_v24 = vld [vmem:[%s1731_s15 + $0x1b0] sm:$0xff] }
  0x76   : > { %674 = vmatmul.mubr.f32.gmra.mrb[2].mxu0 %v480_v39  ;;  %v533_v25 = vld [vmem:[%s1731_s15 + $0x1c8] sm:$0xff]  ;;  %v535_v26 = vld [vmem:[%s1731_s15 + $0x1d8] sm:$0xff]  ;;  %v532_v27 = vld [vmem:[%s1731_s15 + $0x1c0] sm:$0xff] }
  0x77   : > { %819 = vmatmul.mubr.f32.gmra.mrb[2].mxu1 %v482_v40  ;;  %678 = vmatprep.mubr.f32.mxu0 %v485_v41  ;;  %v534_v28 = vld [vmem:[%s1731_s15 + $0x1d0] sm:$0xff]  ;;  %v537_v29 = vld [vmem:[%s1731_s15 + $0x1e8] sm:$0xff]  ;;  %v539_v30 = vld [vmem:[%s1731_s15 + $0x1f8] sm:$0xff] }
  0x78   : > { %823 = vmatprep.mubr.f32.mxu1 %v487_v42  ;;  %v536_v31 = vld [vmem:[%s1731_s15 + $0x1e0] sm:$0xff]  ;;  %v538_v32 = vld [vmem:[%s1731_s15 + $0x1f0] sm:$0xff] }
  0x79   : > { %v460_v39 = vld [vmem:[#allocation2] sm:$0xff] }
  0x7a   : > { %679 = vmatmul.mubr.f32.gmra.mrb[4].mxu0 %v484_v43 }
  0x7b   : > { %824 = vmatmul.mubr.f32.gmra.mrb[4].mxu1 %v486_v44  ;;  %683 = vmatprep.mubr.f32.mxu0 %v489_v45 }
  0x7c   : > { %828 = vmatprep.mubr.f32.mxu1 %v491_v46 }
  0x7e   : > { %684 = vmatmul.mubr.f32.gmra.mrb[6].mxu0 %v488_v47 }
  0x7f   : > { %829 = vmatmul.mubr.f32.gmra.mrb[6].mxu1 %v490_v48  ;;  %688 = vmatprep.mubr.f32.mxu0 %v493_v49  ;;  %v461_v48 = vld [vmem:[#allocation2 + $0x8] sm:$0xff] }
  0x80   : > { %833 = vmatprep.mubr.f32.mxu1 %v495_v50 }
  0x82   : > { %689 = vmatmul.mubr.f32.gmra.mrb[8].mxu0 %v492_v51 }
  0x83   : > { %834 = vmatmul.mubr.f32.gmra.mrb[8].mxu1 %v494_v52  ;;  %693 = vmatprep.mubr.f32.mxu0 %v497_v53 }
  0x84   : > { %838 = vmatprep.mubr.f32.mxu1 %v499_v54 }
  0x86   : > { %694 = vmatmul.mubr.f32.gmra.mrb[10].mxu0 %v496_v55 }
  0x87   : > { %839 = vmatmul.mubr.f32.gmra.mrb[10].mxu1 %v498_v56  ;;  %698 = vmatprep.mubr.f32.mxu0 %v501_v57  ;;  %v462_v57 = vld [vmem:[#allocation2 + $0x10] sm:$0xff] }
  0x88   : > { %843 = vmatprep.mubr.f32.mxu1 %v503_v58 }
  0x8a   : > { %699 = vmatmul.mubr.f32.gmra.mrb[12].mxu0 %v500_v59 }
  0x8b   : > { %844 = vmatmul.mubr.f32.gmra.mrb[12].mxu1 %v502_v60  ;;  %703 = vmatprep.mubr.f32.mxu0 %v505_v61 }
  0x8c   : > { %848 = vmatprep.mubr.f32.mxu1 %v507_v62 }
  0x8e   : > { %704 = vmatmul.mubr.f32.gmra.mrb[14].mxu0 %v504_v63 }
  0x8f   : > { %849 = vmatmul.mubr.f32.gmra.mrb[14].mxu1 %v506_v0  ;;  %708 = vmatprep.mubr.f32.mxu0 %v509_v1 }
  0x90   : > { %853 = vmatprep.mubr.f32.mxu1 %v511_v2  ;;  %v463_v2 = vld [vmem:[#allocation2 + $0x18] sm:$0xff] }
  0x92   : > { %709 = vmatmul.mubr.f32.gmra.mrb[16].mxu0 %v508_v3 }
  0x93   : > { %854 = vmatmul.mubr.f32.gmra.mrb[16].mxu1 %v510_v4  ;;  %713 = vmatprep.mubr.f32.mxu0 %v513_v5 }
  0x94   : > { %858 = vmatprep.mubr.f32.mxu1 %v515_v6 }
  0x96   : > { %714 = vmatmul.mubr.f32.gmra.mrb[18].mxu0 %v512_v7 }
  0x97   : > { %859 = vmatmul.mubr.f32.gmra.mrb[18].mxu1 %v514_v8  ;;  %718 = vmatprep.mubr.f32.mxu0 %v517_v9 }
  0x98   : > { %863 = vmatprep.mubr.f32.mxu1 %v519_v10 }
  0x9a   : > { %719 = vmatmul.mubr.f32.gmra.mrb[20].mxu0 %v516_v11  ;;  %v464_v11 = vld [vmem:[#allocation2 + $0x20] sm:$0xff] }
  0x9b   : > { %864 = vmatmul.mubr.f32.gmra.mrb[20].mxu1 %v518_v12  ;;  %723 = vmatprep.mubr.f32.mxu0 %v521_v13 }
  0x9c   : > { %868 = vmatprep.mubr.f32.mxu1 %v523_v14 }
  0x9e   : > { %724 = vmatmul.mubr.f32.gmra.mrb[22].mxu0 %v520_v15 }
  0x9f   : > { %869 = vmatmul.mubr.f32.gmra.mrb[22].mxu1 %v522_v16  ;;  %728 = vmatprep.mubr.f32.mxu0 %v525_v17 }
  0xa0   : > { %873 = vmatprep.mubr.f32.mxu1 %v527_v18 }
  0xa2   : > { %729 = vmatmul.mubr.f32.gmra.mrb[24].mxu0 %v524_v19 }
  0xa3   : > { %874 = vmatmul.mubr.f32.gmra.mrb[24].mxu1 %v526_v20  ;;  %733 = vmatprep.mubr.f32.mxu0 %v529_v21  ;;  %v465_v20 = vld [vmem:[#allocation2 + $0x28] sm:$0xff] }
  0xa4   : > { %878 = vmatprep.mubr.f32.mxu1 %v531_v22 }
  0xa6   : > { %734 = vmatmul.mubr.f32.gmra.mrb[26].mxu0 %v528_v23 }
  0xa7   : > { %879 = vmatmul.mubr.f32.gmra.mrb[26].mxu1 %v530_v24  ;;  %738 = vmatprep.mubr.f32.mxu0 %v533_v25 }
  0xa8   : > { %883 = vmatprep.mubr.f32.mxu1 %v535_v26 }
  0xaa   : > { %739 = vmatmul.mubr.f32.gmra.mrb[28].mxu0 %v532_v27 }
  0xab   : > { %884 = vmatmul.mubr.f32.gmra.mrb[28].mxu1 %v534_v28  ;;  %743 = vmatprep.mubr.f32.mxu0 %v537_v29  ;;  %v466_v29 = vld [vmem:[#allocation2 + $0x30] sm:$0xff] }
  0xac   : > { %888 = vmatprep.mubr.f32.mxu1 %v539_v30 }
  0xae   : > { %744 = vmatmul.mubr.f32.gmra.mrb[30].mxu0 %v536_v31 }
  0xaf   : > { %889 = vmatmul.mubr.f32.gmra.mrb[30].mxu1 %v538_v32 }
 0x145   : > { %v1193_v33 = vpop.f32.mrb[0].mxu0 }
 0x146   : > { %v1273_v34 = vpop.f32.mrb[0].mxu1  ;;  %v1194_v35 = vpop.f32.mrb[1].mxu0 }
 0x147   : > { %v1195_v36 = vadd.f32 %v1194_v35, %v1193_v33  ;;  %v1274_v37 = vpop.f32.mrb[1].mxu1 }
 0x148   : > { %v1275_v38 = vadd.f32 %v1274_v37, %v1273_v34 }
 0x149   : > { %v1196_v40 = vpop.f32.mrb[2].mxu0 }
 0x14a   : > { %v816_v41 = vadd.f32 %v1275_v38, %v1195_v36  ;;  %v1276_v42 = vpop.f32.mrb[2].mxu1  ;;  %v1197_v43 = vpop.f32.mrb[3].mxu0  ;;  %v467_v38 = vld [vmem:[#allocation2 + $0x38] sm:$0xff] }
 0x14b   : > { %v1198_v44 = vadd.f32 %v1197_v43, %v1196_v40  ;;  %v1277_v45 = vpop.f32.mrb[3].mxu1 }
 0x14c   : > { %v894_v46 = vadd.f32 %v816_v41, %v460_v39  ;;  %v1278_v47 = vadd.f32 %v1277_v45, %v1276_v42 }
 0x14d   : > { %v1199_v49 = vpop.f32.mrb[4].mxu0 }
 0x14e   : > { %910 = vst [vmem:[#allocation2] sm:$0xff] %v894_v46  ;;  %v821_v50 = vadd.f32 %v1278_v47, %v1198_v44  ;;  %v1279_v51 = vpop.f32.mrb[4].mxu1  ;;  %v1200_v52 = vpop.f32.mrb[5].mxu0  ;;  %v468_v47 = vld [vmem:[#allocation2 + $0x40] sm:$0xff] }
 0x14f   : > { %v1201_v53 = vadd.f32 %v1200_v52, %v1199_v49  ;;  %v1280_v54 = vpop.f32.mrb[5].mxu1 }
 0x150   : > { %v895_v55 = vadd.f32 %v821_v50, %v461_v48  ;;  %v1281_v56 = vadd.f32 %v1280_v54, %v1279_v51 }
 0x151   : > { %v1202_v58 = vpop.f32.mrb[6].mxu0 }
 0x152   : > { %911 = vst [vmem:[#allocation2 + $0x8] sm:$0xff] %v895_v55  ;;  %v826_v59 = vadd.f32 %v1281_v56, %v1201_v53  ;;  %v1282_v60 = vpop.f32.mrb[6].mxu1  ;;  %v1203_v61 = vpop.f32.mrb[7].mxu0  ;;  %v469_v56 = vld [vmem:[#allocation2 + $0x48] sm:$0xff] }
 0x153   : > { %v1204_v62 = vadd.f32 %v1203_v61, %v1202_v58  ;;  %v1283_v63 = vpop.f32.mrb[7].mxu1 }
 0x154   : > { %v896_v0 = vadd.f32 %v826_v59, %v462_v57  ;;  %v1284_v1 = vadd.f32 %v1283_v63, %v1282_v60 }
 0x155   : > { %v1205_v3 = vpop.f32.mrb[8].mxu0 }
 0x156   : > { %912 = vst [vmem:[#allocation2 + $0x10] sm:$0xff] %v896_v0  ;;  %v831_v4 = vadd.f32 %v1284_v1, %v1204_v62  ;;  %v1285_v5 = vpop.f32.mrb[8].mxu1  ;;  %v1206_v6 = vpop.f32.mrb[9].mxu0  ;;  %v470_v1 = vld [vmem:[#allocation2 + $0x50] sm:$0xff] }
 0x157   : > { %v1207_v7 = vadd.f32 %v1206_v6, %v1205_v3  ;;  %v1286_v8 = vpop.f32.mrb[9].mxu1 }
 0x158   : > { %v897_v9 = vadd.f32 %v831_v4, %v463_v2  ;;  %v1287_v10 = vadd.f32 %v1286_v8, %v1285_v5 }
 0x159   : > { %v1208_v12 = vpop.f32.mrb[10].mxu0 }
 0x15a   : > { %913 = vst [vmem:[#allocation2 + $0x18] sm:$0xff] %v897_v9  ;;  %v836_v13 = vadd.f32 %v1287_v10, %v1207_v7  ;;  %v1288_v14 = vpop.f32.mrb[10].mxu1  ;;  %v1209_v15 = vpop.f32.mrb[11].mxu0  ;;  %v471_v10 = vld [vmem:[#allocation2 + $0x58] sm:$0xff] }
 0x15b   : > { %v1210_v16 = vadd.f32 %v1209_v15, %v1208_v12  ;;  %v1289_v17 = vpop.f32.mrb[11].mxu1 }
 0x15c   : > { %v898_v18 = vadd.f32 %v836_v13, %v464_v11  ;;  %v1290_v19 = vadd.f32 %v1289_v17, %v1288_v14 }
 0x15d   : > { %v1211_v21 = vpop.f32.mrb[12].mxu0 }
 0x15e   : > { %914 = vst [vmem:[#allocation2 + $0x20] sm:$0xff] %v898_v18  ;;  %v841_v22 = vadd.f32 %v1290_v19, %v1210_v16  ;;  %v1291_v23 = vpop.f32.mrb[12].mxu1  ;;  %v1212_v24 = vpop.f32.mrb[13].mxu0  ;;  %v472_v19 = vld [vmem:[#allocation2 + $0x60] sm:$0xff] }
 0x15f   : > { %v1213_v25 = vadd.f32 %v1212_v24, %v1211_v21  ;;  %v1292_v26 = vpop.f32.mrb[13].mxu1 }
 0x160   : > { %v899_v27 = vadd.f32 %v841_v22, %v465_v20  ;;  %v1293_v28 = vadd.f32 %v1292_v26, %v1291_v23 }
 0x161   : > { %v1214_v30 = vpop.f32.mrb[14].mxu0 }
 0x162   : > { %915 = vst [vmem:[#allocation2 + $0x28] sm:$0xff] %v899_v27  ;;  %v846_v31 = vadd.f32 %v1293_v28, %v1213_v25  ;;  %v1294_v32 = vpop.f32.mrb[14].mxu1  ;;  %v1215_v33 = vpop.f32.mrb[15].mxu0  ;;  %v473_v28 = vld [vmem:[#allocation2 + $0x68] sm:$0xff] }
 0x163   : > { %v1216_v34 = vadd.f32 %v1215_v33, %v1214_v30  ;;  %v1295_v35 = vpop.f32.mrb[15].mxu1 }
 0x164   : > { %v900_v36 = vadd.f32 %v846_v31, %v466_v29  ;;  %v1296_v37 = vadd.f32 %v1295_v35, %v1294_v32 }
 0x165   : > { %v1217_v39 = vpop.f32.mrb[16].mxu0 }
 0x166   : > { %916 = vst [vmem:[#allocation2 + $0x30] sm:$0xff] %v900_v36  ;;  %v851_v40 = vadd.f32 %v1296_v37, %v1216_v34  ;;  %v1297_v41 = vpop.f32.mrb[16].mxu1  ;;  %v1218_v42 = vpop.f32.mrb[17].mxu0  ;;  %v474_v37 = vld [vmem:[#allocation2 + $0x70] sm:$0xff] }
 0x167   : > { %v1219_v43 = vadd.f32 %v1218_v42, %v1217_v39  ;;  %v1298_v44 = vpop.f32.mrb[17].mxu1 }
 0x168   : > { %v901_v45 = vadd.f32 %v851_v40, %v467_v38  ;;  %v1299_v46 = vadd.f32 %v1298_v44, %v1297_v41 }
 0x169   : > { %v1220_v48 = vpop.f32.mrb[18].mxu0 }
 0x16a   : > { %917 = vst [vmem:[#allocation2 + $0x38] sm:$0xff] %v901_v45  ;;  %v856_v49 = vadd.f32 %v1299_v46, %v1219_v43  ;;  %v1300_v50 = vpop.f32.mrb[18].mxu1  ;;  %v1221_v51 = vpop.f32.mrb[19].mxu0  ;;  %v475_v46 = vld [vmem:[#allocation2 + $0x78] sm:$0xff] }
 0x16b   : > { %v1222_v52 = vadd.f32 %v1221_v51, %v1220_v48  ;;  %v1301_v53 = vpop.f32.mrb[19].mxu1  ;;  %v1157_v51 = vld [vmem:[%s1909_s3] ss:$0 sm:$0xff] (!%p1155_p13) }
 0x16c   : > { %v902_v54 = vadd.f32 %v856_v49, %v468_v47  ;;  %v1302_v55 = vadd.f32 %v1301_v53, %v1300_v50  ;;  %v930_v49 = vld [vmem:[#allocation2] sm:$0xff] (!%p1155_p13)  ;;  %v931_v53 = vld [vmem:[#allocation2 + $0x8] sm:$0xff] (!%p1155_p13) }
 0x16d   : > { %v1223_v57 = vpop.f32.mrb[20].mxu0  ;;  %v1156_v50 = vld [vmem:[%s1908_s2] ss:$0 sm:$0xff] (!%p1155_p13) }
 0x16e   : > { %918 = vst [vmem:[#allocation2 + $0x40] sm:$0xff] %v902_v54  ;;  %v861_v58 = vadd.f32 %v1302_v55, %v1222_v52  ;;  %v1303_v59 = vpop.f32.mrb[20].mxu1  ;;  %v1224_v60 = vpop.f32.mrb[21].mxu0  ;;  %v953_v52 = vmul.f32 (!%p1155_p13), %v1156_v50, %v930_v49  ;;  %v932_v54 = vld [vmem:[#allocation2 + $0x10] sm:$0xff] (!%p1155_p13)  ;;  %v933_v55 = vld [vmem:[#allocation2 + $0x18] sm:$0xff] (!%p1155_p13) }
 0x16f   : > { %v1225_v61 = vadd.f32 %v1224_v60, %v1223_v57  ;;  %v1304_v62 = vpop.f32.mrb[21].mxu1  ;;  %v955_v57 = vmul.f32 (!%p1155_p13), %v1156_v50, %v932_v54  ;;  %v935_v60 = vld [vmem:[#allocation2 + $0x28] sm:$0xff] (!%p1155_p13) }
 0x170   : > { %v903_v63 = vadd.f32 %v861_v58, %v469_v56  ;;  %v1305_v0 = vadd.f32 %v1304_v62, %v1303_v59  ;;  %v954_v56 = vmul.f32 (!%p1155_p13), %v1156_v50, %v931_v53  ;;  %v956_v58 = vmul.f32 (!%p1155_p13), %v1156_v50, %v933_v55  ;;  %v934_v59 = vld [vmem:[#allocation2 + $0x20] sm:$0xff] (!%p1155_p13) }
 0x171   : > { %v1226_v2 = vpop.f32.mrb[22].mxu0  ;;  %v976_v62 = vadd.f32 (!%p1155_p13), %v1157_v51, %v953_v52 }
 0x172   : > { %919 = vst [vmem:[#allocation2 + $0x48] sm:$0xff] %v903_v63  ;;  %v866_v3 = vadd.f32 %v1305_v0, %v1225_v61  ;;  %v1306_v4 = vpop.f32.mrb[22].mxu1  ;;  %v1227_v5 = vpop.f32.mrb[23].mxu0  ;;  %v936_v61 = vld [vmem:[#allocation2 + $0x30] sm:$0xff] (!%p1155_p13)  ;;  %v957_v63 = vmul.f32 (!%p1155_p13), %v1156_v50, %v934_v59  ;;  %v958_v0 = vmul.f32 (!%p1155_p13), %v1156_v50, %v935_v60 }
 0x173   : > { %v1228_v6 = vadd.f32 %v1227_v5, %v1226_v2  ;;  %v1307_v7 = vpop.f32.mrb[23].mxu1  ;;  %v937_v2 = vld [vmem:[#allocation2 + $0x38] sm:$0xff] (!%p1155_p13)  ;;  %v977_v5 = vadd.f32 (!%p1155_p13), %v1157_v51, %v954_v56  ;;  %992 = vst [vmem:[%s1729_s8] sm:$0xff] (!%p1155_p13), %v976_v62 }
 0x174   : > { %v904_v8 = vadd.f32 %v866_v3, %v470_v1  ;;  %v1308_v9 = vadd.f32 %v1307_v7, %v1306_v4  ;;  %v959_v1 = vmul.f32 (!%p1155_p13), %v1156_v50, %v936_v61  ;;  %v979_v7 = vadd.f32 (!%p1155_p13), %v1157_v51, %v956_v58 }
 0x175   : > { %v1229_v11 = vpop.f32.mrb[24].mxu0  ;;  %v938_v3 = vld [vmem:[#allocation2 + $0x40] sm:$0xff] (!%p1155_p13)  ;;  %993 = vst [vmem:[%s1729_s8 + $0x8] sm:$0xff] (!%p1155_p13), %v977_v5 }
 0x176   : > { %920 = vst [vmem:[#allocation2 + $0x50] sm:$0xff] %v904_v8  ;;  %v871_v12 = vadd.f32 %v1308_v9, %v1228_v6  ;;  %v1309_v13 = vpop.f32.mrb[24].mxu1  ;;  %v1230_v14 = vpop.f32.mrb[25].mxu0  ;;  %v978_v6 = vadd.f32 (!%p1155_p13), %v1157_v51, %v955_v57  ;;  %v960_v8 = vmul.f32 (!%p1155_p13), %v1156_v50, %v937_v2  ;;  %995 = vst [vmem:[%s1729_s8 + $0x18] sm:$0xff] (!%p1155_p13), %v979_v7 }
 0x177   : > { %v1231_v15 = vadd.f32 %v1230_v14, %v1229_v11  ;;  %v1310_v16 = vpop.f32.mrb[25].mxu1  ;;  %v982_v14 = vadd.f32 (!%p1155_p13), %v1157_v51, %v959_v1 }
 0x178   : > { %v905_v17 = vadd.f32 %v871_v12, %v471_v10  ;;  %v1311_v18 = vadd.f32 %v1310_v16, %v1309_v13  ;;  %v980_v12 = vadd.f32 (!%p1155_p13), %v1157_v51, %v957_v63  ;;  %v981_v13 = vadd.f32 (!%p1155_p13), %v1157_v51, %v958_v0  ;;  %994 = vst [vmem:[%s1729_s8 + $0x10] sm:$0xff] (!%p1155_p13), %v978_v6 }
 0x179   : > { %v1232_v20 = vpop.f32.mrb[26].mxu0  ;;  %v939_v4 = vld [vmem:[#allocation2 + $0x48] sm:$0xff] (!%p1155_p13)  ;;  %998 = vst [vmem:[%s1729_s8 + $0x30] sm:$0xff] (!%p1155_p13), %v982_v14 }
 0x17a   : > { %921 = vst [vmem:[#allocation2 + $0x58] sm:$0xff] %v905_v17  ;;  %v876_v21 = vadd.f32 %v1311_v18, %v1231_v15  ;;  %v1312_v22 = vpop.f32.mrb[26].mxu1  ;;  %v1233_v23 = vpop.f32.mrb[27].mxu0  ;;  %v961_v15 = vmul.f32 (!%p1155_p13), %v1156_v50, %v938_v3  ;;  %996 = vst [vmem:[%s1729_s8 + $0x20] sm:$0xff] (!%p1155_p13), %v980_v12 }
 0x17b   : > { %v1234_v24 = vadd.f32 %v1233_v23, %v1232_v20  ;;  %v1313_v25 = vpop.f32.mrb[27].mxu1  ;;  %v962_v20 = vmul.f32 (!%p1155_p13), %v1156_v50, %v939_v4  ;;  %997 = vst [vmem:[%s1729_s8 + $0x28] sm:$0xff] (!%p1155_p13), %v981_v13 }
 0x17c   : > { %v906_v26 = vadd.f32 %v876_v21, %v472_v19  ;;  %v1314_v27 = vadd.f32 %v1313_v25, %v1312_v22  ;;  %v983_v19 = vadd.f32 (!%p1155_p13), %v1157_v51, %v960_v8  ;;  %v984_v23 = vadd.f32 (!%p1155_p13), %v1157_v51, %v961_v15 }
 0x17d   : > { %v1235_v29 = vpop.f32.mrb[28].mxu0  ;;  %v940_v9 = vld [vmem:[#allocation2 + $0x50] sm:$0xff] (!%p1155_p13) }
 0x17e   : > { %922 = vst [vmem:[#allocation2 + $0x60] sm:$0xff] %v906_v26  ;;  %v881_v30 = vadd.f32 %v1314_v27, %v1234_v24  ;;  %v1315_v31 = vpop.f32.mrb[28].mxu1  ;;  %v1236_v32 = vpop.f32.mrb[29].mxu0  ;;  %v963_v21 = vmul.f32 (!%p1155_p13), %v1156_v50, %v940_v9  ;;  %999 = vst [vmem:[%s1729_s8 + $0x38] sm:$0xff] (!%p1155_p13), %v983_v19  ;;  %v985_v27 = vadd.f32 (!%p1155_p13), %v1157_v51, %v962_v20 }
 0x17f   : > { %v1237_v33 = vadd.f32 %v1236_v32, %v1235_v29  ;;  %v1316_v34 = vpop.f32.mrb[29].mxu1  ;;  %1000 = vst [vmem:[%s1729_s8 + $0x40] sm:$0xff] (!%p1155_p13), %v984_v23 }
 0x180   : > { %v907_v35 = vadd.f32 %v881_v30, %v473_v28  ;;  %v1317_v36 = vadd.f32 %v1316_v34, %v1315_v31  ;;  %v986_v28 = vadd.f32 (!%p1155_p13), %v1157_v51, %v963_v21  ;;  %1001 = vst [vmem:[%s1729_s8 + $0x48] sm:$0xff] (!%p1155_p13), %v985_v27 }
 0x181   : > { %v1238_v38 = vpop.f32.mrb[30].mxu0  ;;  %v941_v10 = vld [vmem:[#allocation2 + $0x58] sm:$0xff] (!%p1155_p13) }
 0x182   : > { %923 = vst [vmem:[#allocation2 + $0x68] sm:$0xff] %v907_v35  ;;  %v886_v39 = vadd.f32 %v1317_v36, %v1237_v33  ;;  %v1318_v40 = vpop.f32.mrb[30].mxu1  ;;  %v1239_v41 = vpop.f32.mrb[31].mxu0  ;;  %v964_v22 = vmul.f32 (!%p1155_p13), %v1156_v50, %v941_v10  ;;  %1002 = vst [vmem:[%s1729_s8 + $0x50] sm:$0xff] (!%p1155_p13), %v986_v28 }
 0x183   : > { %v1240_v42 = vadd.f32 %v1239_v41, %v1238_v38  ;;  %v1319_v43 = vpop.f32.mrb[31].mxu1 }
 0x184   : > { %v908_v44 = vadd.f32 %v886_v39, %v474_v37  ;;  %v1320_v45 = vadd.f32 %v1319_v43, %v1318_v40  ;;  %929 = sbr.rel (%p1155_p13) target bundleno = 407 (0x197), region = 67  ;;  %v987_v29 = vadd.f32 (!%p1155_p13), %v1157_v51, %v964_v22 }
 0x185   : > { %v942_v11 = vld [vmem:[#allocation2 + $0x60] sm:$0xff] (!%p1155_p13) }
 0x186   : > { %924 = vst [vmem:[#allocation2 + $0x70] sm:$0xff] %v908_v44  ;;  %v891_v47 = vadd.f32 %v1320_v45, %v1240_v42  ;;  %v965_v24 = vmul.f32 (!%p1155_p13), %v1156_v50, %v942_v11  ;;  %1003 = vst [vmem:[%s1729_s8 + $0x58] sm:$0xff] (!%p1155_p13), %v987_v29 }
 0x188   : > { %v909_v48 = vadd.f32 %v891_v47, %v475_v46  ;;  %v988_v31 = vadd.f32 (!%p1155_p13), %v1157_v51, %v965_v24 }
 0x189   : > { %v943_v16 = vld [vmem:[#allocation2 + $0x68] sm:$0xff] (!%p1155_p13) }
 0x18a   : > { %925 = vst [vmem:[#allocation2 + $0x78] sm:$0xff] %v909_v48  ;;  %v966_v25 = vmul.f32 (!%p1155_p13), %v1156_v50, %v943_v16  ;;  %1004 = vst [vmem:[%s1729_s8 + $0x60] sm:$0xff] (!%p1155_p13), %v988_v31 }
 0x18c   : > { %v989_v32 = vadd.f32 %v1157_v51, %v966_v25 }
 0x18d   : > { %v944_v17 = vld [vmem:[#allocation2 + $0x70] sm:$0xff] }
 0x18e   : > { %v967_v26 = vmul.f32 %v1156_v50, %v944_v17  ;;  %1005 = vst [vmem:[%s1729_s8 + $0x68] sm:$0xff] %v989_v32 }
 0x190   : > { %v990_v33 = vadd.f32 %v1157_v51, %v967_v26 }
 0x191   : > { %v945_v18 = vld [vmem:[#allocation2 + $0x78] sm:$0xff] }
 0x192   : > { %v968_v30 = vmul.f32 %v1156_v50, %v945_v18  ;;  %1006 = vst [vmem:[%s1729_s8 + $0x70] sm:$0xff] %v990_v33 }
 0x194   : > { %v991_v34 = vadd.f32 %v1157_v51, %v968_v30 }
 0x196   : > { %1007 = vst [vmem:[%s1729_s8 + $0x78] sm:$0xff] %v991_v34 }
 0x197 PF: > { %s14_s21 = sadd.s32 1, %s1496_s21   ;;  %s1911_s15 = smov %s1476_s16 }
 0x198   : > { %p11_p0 = scmp.ge.s32.totalorder %s14_s21, 18   ;;  %s1912_s16 = smov %s1575_s28 }
 0x199   : > { %s1913_s17 = smov %s1488_s19  ;;  %s1914_s18 = smov %s1492_s20 }
 0x19a   : > { %s1915_s19 = smov %s1918_s22  ;;  %s1916_s20 = smov %s1922_s23 }
 0x19b   :  { %13 = sbr.rel (!%p11_p0) target bundleno = 4 (0x4), region = 111 }

</bundles_post_ra>
